<compile_context>
chip_gen: v7x
topology: tpu7x:2x2x1
jax: 0.10.0
libtpu: 0.0.40
codegen_flags: <defaults>
</compile_context>

<pallas_src>
from functools import partial

import jax
import jax.numpy as jnp
import numpy as np
from jax.experimental import pallas as pl
from jax.experimental.pallas import tpu as pltpu


def _soft_rank_kernel(p_col_ref, t_col_ref, p_row_ref, t_row_ref,
                      pr_ref, tr_ref, *, half_scale, rank_offset):
    """One (k-tile, j-tile) step of the soft-rank reduction.

    p_col_ref/t_col_ref: (TJ, 1) column blocks of the padded vectors.
    p_row_ref/t_row_ref: (1, TK) lane-dense row tiles of the same vectors.
    pr_ref/tr_ref:       (1, TK) resident accumulators / final rank tiles.
    """
    j = pl.program_id(1)

    @pl.when(j == 0)
    def _():
        pr_ref[...] = jnp.zeros_like(pr_ref)
        tr_ref[...] = jnp.zeros_like(tr_ref)

    # Pre-scale once per step (O(TJ + TK)), not per matrix element.
    p_row_s = p_row_ref[...] * half_scale   # (1, TK)
    p_col_s = p_col_ref[...] * half_scale   # (TJ, 1)
    t_row_s = t_row_ref[...] * half_scale
    t_col_s = t_col_ref[...] * half_scale

    # Per element: 1 VPU sub + 1 EUP tanh + 1 reduce-add (sublane sum).
    p_part = jnp.sum(jnp.tanh(p_row_s - p_col_s), axis=0, keepdims=True)
    t_part = jnp.sum(jnp.tanh(t_row_s - t_col_s), axis=0, keepdims=True)

    pr_ref[...] += p_part
    tr_ref[...] += t_part

    @pl.when(j == pl.num_programs(1) - 1)
    def _():
        # sigmoid affine hoist + padded-column correction + "+1" of the ref.
        pr_ref[...] = 0.5 * pr_ref[...] + rank_offset
        tr_ref[...] = 0.5 * tr_ref[...] + rank_offset


def spearman_loss(predictions, targets, temperature=0.01):
    """Pallas implementation of SpearmanLoss(differentiable=True).forward."""
    p = jnp.asarray(predictions, jnp.float32).reshape(-1)
    t = jnp.asarray(targets, jnp.float32).reshape(-1)
    n = p.shape[0]

    # --- tile sizing: lane-dense multiples of 128.  512x512 f32 tanh slabs
    # keep per-step VMEM at a few MiB independent of N (fits v5e/v6e/v7x with
    # large headroom) while per-step tanh work dwarfs the ~0.35 us grid
    # overhead.  Guarantee >= 2 k-tiles when N permits so v7x megacore can
    # shard the "parallel" axis across both TensorCores.
    lane = 128
    n_lane = pl.cdiv(n, lane) * lane
    tile = int(min(512, n_lane))
    if n_lane > lane and n_lane // tile < 2:
        tile = int(max(lane, (n_lane // 2) // lane * lane))
    npad = pl.cdiv(n, tile) * tile
    num_tiles = npad // tile

    # Pad with +1e30: padded j-columns contribute tanh(-huge) == -1 exactly
    # (corrected by rank_offset); padded k-lanes are sliced off below.
    pad = npad - n
    p_pad = jnp.pad(p, (0, pad), constant_values=1e30)
    t_pad = jnp.pad(t, (0, pad), constant_values=1e30)

    p_col = p_pad.reshape(npad, 1)
    p_row = p_pad.reshape(1, npad)
    t_col = t_pad.reshape(npad, 1)
    t_row = t_pad.reshape(1, npad)

    kernel = partial(_soft_rank_kernel,
                     half_scale=float(0.5 / temperature),
                     rank_offset=float(0.5 * npad + 1.0))

    cost = pl.CostEstimate(
        flops=int(6 * npad * npad),            # sub + reduce-add, both matrices
        transcendentals=int(2 * npad * npad),  # one tanh per matrix element
        bytes_accessed=int(32 * npad),         # O(N) inputs + rank outputs
    )

    pred_ranks, targ_ranks = pl.pallas_call(
        kernel,
        out_shape=(
            jax.ShapeDtypeStruct((1, npad), jnp.float32),
            jax.ShapeDtypeStruct((1, npad), jnp.float32),
        ),
        grid_spec=pltpu.PrefetchScalarGridSpec(
            num_scalar_prefetch=0,
            grid=(num_tiles, num_tiles),                       # (k-tiles, j-tiles)
            in_specs=[
                pl.BlockSpec((tile, 1), lambda k, j: (j, 0)),  # p column block
                pl.BlockSpec((tile, 1), lambda k, j: (j, 0)),  # t column block
                pl.BlockSpec((1, tile), lambda k, j: (0, k)),  # p lane tile
                pl.BlockSpec((1, tile), lambda k, j: (0, k)),  # t lane tile
            ],
            out_specs=[
                pl.BlockSpec((1, tile), lambda k, j: (0, k)),  # pred soft ranks
                pl.BlockSpec((1, tile), lambda k, j: (0, k)),  # targ soft ranks
            ],
        ),
        compiler_params=pltpu.CompilerParams(
            dimension_semantics=("parallel", "arbitrary"),
            vmem_limit_bytes=32 * 1024 * 1024,   # working set is a few MiB; leave
        ),                                       # headroom on v7x's 64 MiB VMEM
        cost_estimate=cost,
    )(p_col, t_col, p_row, t_row)

    # O(N) Pearson epilogue (two-pass, matches the PyTorch formula; rsqrt
    # replaces 2x sqrt + divide).  Kept outside the kernel so the k-tile grid
    # axis stays "parallel" with no carried scalar accumulator.
    pr = pred_ranks[0, :n]
    tr = targ_ranks[0, :n]
    pr_c = pr - jnp.mean(pr)
    tr_c = tr - jnp.mean(tr)
    numerator = jnp.sum(pr_c * tr_c)
    corr = numerator * jax.lax.rsqrt(jnp.sum(pr_c * pr_c) * jnp.sum(tr_c * tr_c))
    return -corr


def _spearman_loss_ref(predictions, targets, temperature=0.01):
    """Pure-JAX reference mirroring the PyTorch code."""
    pred_diff = predictions[:, None] - predictions[None, :]
    targ_diff = targets[:, None] - targets[None, :]
    pred_sign = jax.nn.sigmoid(pred_diff / temperature)
    targ_sign = jax.nn.sigmoid(targ_diff / temperature)
    pred_ranks = jnp.sum(pred_sign, axis=1) + 1
    targ_ranks = jnp.sum(targ_sign, axis=1) + 1
    pm, tm = jnp.mean(pred_ranks), jnp.mean(targ_ranks)
    num = jnp.sum((pred_ranks - pm) * (targ_ranks - tm))
    den = jnp.sqrt(jnp.sum((pred_ranks - pm) ** 2)) * jnp.sqrt(
        jnp.sum((targ_ranks - tm) ** 2))
    return -(num / den)


if __name__ == "__main__":
    key = jax.random.PRNGKey(0)
    kp, kt = jax.random.split(key)
    # Batch of scalar predictions / targets, shape (N,) each.  N is not a
    # multiple of the tile, so padding and the 2x2 (k, j) grid are exercised.
    N = 1000
    predictions = jax.random.normal(kp, (N,), dtype=jnp.float32)
    targets = jax.random.normal(kt, (N,), dtype=jnp.float32)

    loss = spearman_loss(predictions, targets, temperature=0.01)
    loss = jax.block_until_ready(loss)

    ref = jax.block_until_ready(_spearman_loss_ref(predictions, targets, 0.01))
    np.testing.assert_allclose(np.asarray(loss), np.asarray(ref),
                               rtol=1e-3, atol=1e-4)
    print("KERNEL_OK")
</pallas_src>

<mosaic_0001>
module attributes {stable_mosaic.version = 11 : i64} {
  func.func @_soft_rank_kernel(%arg0: i32, %arg1: i32, %arg2: memref<512x1xf32, #tpu.memory_space<vmem>>, %arg3: memref<512x1xf32, #tpu.memory_space<vmem>>, %arg4: memref<1x512xf32, #tpu.memory_space<vmem>>, %arg5: memref<1x512xf32, #tpu.memory_space<vmem>>, %arg6: memref<1x512xf32, #tpu.memory_space<vmem>>, %arg7: memref<1x512xf32, #tpu.memory_space<vmem>>) attributes {dimension_semantics = [#tpu.dimension_semantics<parallel>, #tpu.dimension_semantics<arbitrary>], iteration_bounds = array<i64: 2, 2>, scalar_prefetch = 0 : i64, scratch_operands = 0 : i64, tpu.core_type = #tpu.core_type<tc>, window_params = [{transform_indices = @transform_0, window_bounds = array<i64: 512, 1>}, {transform_indices = @transform_1, window_bounds = array<i64: 512, 1>}, {transform_indices = @transform_2, window_bounds = array<i64: 1, 512>}, {transform_indices = @transform_3, window_bounds = array<i64: 1, 512>}, {transform_indices = @transform_4, window_bounds = array<i64: 1, 512>}, {transform_indices = @transform_5, window_bounds = array<i64: 1, 512>}]} {
    %c0_i32 = arith.constant 0 : i32
    %0 = arith.cmpi eq, %arg1, %c0_i32 : i32
    %1 = arith.extui %0 : i1 to i32
    %c0_i32_0 = arith.constant 0 : i32
    %2 = arith.cmpi ne, %1, %c0_i32_0 : i32
    scf.if %2 {
      %cst_22 = arith.constant 0.000000e+00 : f32
      %36 = vector.broadcast %cst_22 : f32 to vector<1x512xf32>
      %c0_23 = arith.constant 0 : index
      %c0_24 = arith.constant 0 : index
      %37 = vector.load %arg6[%c0_23, %c0_24] : memref<1x512xf32, #tpu.memory_space<vmem>>, vector<1x512xf32>
      tpu.vector_store %arg6[%c0_23, %c0_24], %36 {strides = array<i32>} : memref<1x512xf32, #tpu.memory_space<vmem>>, vector<1x512xf32>,
      %cst_25 = arith.constant 0.000000e+00 : f32
      %38 = vector.broadcast %cst_25 : f32 to vector<1x512xf32>
      %c0_26 = arith.constant 0 : index
      %c0_27 = arith.constant 0 : index
      %39 = vector.load %arg7[%c0_26, %c0_27] : memref<1x512xf32, #tpu.memory_space<vmem>>, vector<1x512xf32>
      tpu.vector_store %arg7[%c0_26, %c0_27], %38 {strides = array<i32>} : memref<1x512xf32, #tpu.memory_space<vmem>>, vector<1x512xf32>,
    } else {
    }
    %c0 = arith.constant 0 : index
    %c0_1 = arith.constant 0 : index
    %3 = vector.load %arg4[%c0, %c0_1] : memref<1x512xf32, #tpu.memory_space<vmem>>, vector<1x512xf32>
    %cst = arith.constant 5.000000e+01 : f32
    %4 = vector.broadcast %cst : f32 to vector<1x512xf32>
    %5 = arith.mulf %3, %4 : vector<1x512xf32>
    %c0_2 = arith.constant 0 : index
    %c0_3 = arith.constant 0 : index
    %6 = vector.load %arg2[%c0_2, %c0_3] : memref<512x1xf32, #tpu.memory_space<vmem>>, vector<512x1xf32>
    %cst_4 = arith.constant 5.000000e+01 : f32
    %7 = vector.broadcast %cst_4 : f32 to vector<512x1xf32>
    %8 = arith.mulf %6, %7 : vector<512x1xf32>
    %c0_5 = arith.constant 0 : index
    %c0_6 = arith.constant 0 : index
    %9 = vector.load %arg5[%c0_5, %c0_6] : memref<1x512xf32, #tpu.memory_space<vmem>>, vector<1x512xf32>
    %cst_7 = arith.constant 5.000000e+01 : f32
    %10 = vector.broadcast %cst_7 : f32 to vector<1x512xf32>
    %11 = arith.mulf %9, %10 : vector<1x512xf32>
    %c0_8 = arith.constant 0 : index
    %c0_9 = arith.constant 0 : index
    %12 = vector.load %arg3[%c0_8, %c0_9] : memref<512x1xf32, #tpu.memory_space<vmem>>, vector<512x1xf32>
    %cst_10 = arith.constant 5.000000e+01 : f32
    %13 = vector.broadcast %cst_10 : f32 to vector<512x1xf32>
    %14 = arith.mulf %12, %13 : vector<512x1xf32>
    %15 = vector.broadcast %5 : vector<1x512xf32> to vector<512x512xf32>
    %16 = vector.broadcast %8 : vector<512x1xf32> to vector<512x512xf32>
    %17 = arith.subf %15, %16 : vector<512x512xf32>
    %18 = math.tanh %17 : vector<512x512xf32>
    %cst_11 = arith.constant dense<0.000000e+00> : vector<512xf32>
    %19 = vector.multi_reduction <add>, %18, %cst_11 [0] : vector<512x512xf32> to vector<512xf32>
    %20 = vector.shape_cast %19 : vector<512xf32> to vector<1x512xf32>
    %21 = vector.broadcast %11 : vector<1x512xf32> to vector<512x512xf32>
    %22 = vector.broadcast %14 : vector<512x1xf32> to vector<512x512xf32>
    %23 = arith.subf %21, %22 : vector<512x512xf32>
    %24 = math.tanh %23 : vector<512x512xf32>
    %cst_12 = arith.constant dense<0.000000e+00> : vector<512xf32>
    %25 = vector.multi_reduction <add>, %24, %cst_12 [0] : vector<512x512xf32> to vector<512xf32>
    %26 = vector.shape_cast %25 : vector<512xf32> to vector<1x512xf32>
    %c0_13 = arith.constant 0 : index
    %c0_14 = arith.constant 0 : index
    %27 = vector.load %arg6[%c0_13, %c0_14] : memref<1x512xf32, #tpu.memory_space<vmem>>, vector<1x512xf32>
    %28 = arith.addf %27, %20 : vector<1x512xf32>
    %c0_15 = arith.constant 0 : index
    %c0_16 = arith.constant 0 : index
    %29 = vector.load %arg6[%c0_15, %c0_16] : memref<1x512xf32, #tpu.memory_space<vmem>>, vector<1x512xf32>
    tpu.vector_store %arg6[%c0_15, %c0_16], %28 {strides = array<i32>} : memref<1x512xf32, #tpu.memory_space<vmem>>, vector<1x512xf32>,
    %c0_17 = arith.constant 0 : index
    %c0_18 = arith.constant 0 : index
    %30 = vector.load %arg7[%c0_17, %c0_18] : memref<1x512xf32, #tpu.memory_space<vmem>>, vector<1x512xf32>
    %31 = arith.addf %30, %26 : vector<1x512xf32>
    %c0_19 = arith.constant 0 : index
    %c0_20 = arith.constant 0 : index
    %32 = vector.load %arg7[%c0_19, %c0_20] : memref<1x512xf32, #tpu.memory_space<vmem>>, vector<1x512xf32>
    tpu.vector_store %arg7[%c0_19, %c0_20], %31 {strides = array<i32>} : memref<1x512xf32, #tpu.memory_space<vmem>>, vector<1x512xf32>,
    %c1_i32 = arith.constant 1 : i32
    %33 = arith.cmpi eq, %arg1, %c1_i32 : i32
    %34 = arith.extui %33 : i1 to i32
    %c0_i32_21 = arith.constant 0 : i32
    %35 = arith.cmpi ne, %34, %c0_i32_21 : i32
    scf.if %35 {
      %c0_22 = arith.constant 0 : index
      %c0_23 = arith.constant 0 : index
      %36 = vector.load %arg6[%c0_22, %c0_23] : memref<1x512xf32, #tpu.memory_space<vmem>>, vector<1x512xf32>
      %cst_24 = arith.constant 5.000000e-01 : f32
      %37 = vector.broadcast %cst_24 : f32 to vector<1x512xf32>
      %38 = arith.mulf %37, %36 : vector<1x512xf32>
      %cst_25 = arith.constant 5.130000e+02 : f32
      %39 = vector.broadcast %cst_25 : f32 to vector<1x512xf32>
      %40 = arith.addf %38, %39 : vector<1x512xf32>
      %c0_26 = arith.constant 0 : index
      %c0_27 = arith.constant 0 : index
      %41 = vector.load %arg6[%c0_26, %c0_27] : memref<1x512xf32, #tpu.memory_space<vmem>>, vector<1x512xf32>
      tpu.vector_store %arg6[%c0_26, %c0_27], %40 {strides = array<i32>} : memref<1x512xf32, #tpu.memory_space<vmem>>, vector<1x512xf32>,
      %c0_28 = arith.constant 0 : index
      %c0_29 = arith.constant 0 : index
      %42 = vector.load %arg7[%c0_28, %c0_29] : memref<1x512xf32, #tpu.memory_space<vmem>>, vector<1x512xf32>
      %cst_30 = arith.constant 5.000000e-01 : f32
      %43 = vector.broadcast %cst_30 : f32 to vector<1x512xf32>
      %44 = arith.mulf %43, %42 : vector<1x512xf32>
      %cst_31 = arith.constant 5.130000e+02 : f32
      %45 = vector.broadcast %cst_31 : f32 to vector<1x512xf32>
      %46 = arith.addf %44, %45 : vector<1x512xf32>
      %c0_32 = arith.constant 0 : index
      %c0_33 = arith.constant 0 : index
      %47 = vector.load %arg7[%c0_32, %c0_33] : memref<1x512xf32, #tpu.memory_space<vmem>>, vector<1x512xf32>
      tpu.vector_store %arg7[%c0_32, %c0_33], %46 {strides = array<i32>} : memref<1x512xf32, #tpu.memory_space<vmem>>, vector<1x512xf32>,
    } else {
    }
    return
  }
  func.func @transform_0(%arg0: i32, %arg1: i32) -> (i32, i32) {
    %c0_i32 = arith.constant 0 : i32
    %c0_i32_0 = arith.constant 0 : i32
    return %arg1, %c0_i32 : i32, i32
  }
  func.func @transform_1(%arg0: i32, %arg1: i32) -> (i32, i32) {
    %c0_i32 = arith.constant 0 : i32
    %c0_i32_0 = arith.constant 0 : i32
    return %arg1, %c0_i32 : i32, i32
  }
  func.func @transform_2(%arg0: i32, %arg1: i32) -> (i32, i32) {
    %c0_i32 = arith.constant 0 : i32
    %c0_i32_0 = arith.constant 0 : i32
    return %c0_i32, %arg0 : i32, i32
  }
  func.func @transform_3(%arg0: i32, %arg1: i32) -> (i32, i32) {
    %c0_i32 = arith.constant 0 : i32
    %c0_i32_0 = arith.constant 0 : i32
    return %c0_i32, %arg0 : i32, i32
  }
  func.func @transform_4(%arg0: i32, %arg1: i32) -> (i32, i32) {
    %c0_i32 = arith.constant 0 : i32
    %c0_i32_0 = arith.constant 0 : i32
    return %c0_i32, %arg0 : i32, i32
  }
  func.func @transform_5(%arg0: i32, %arg1: i32) -> (i32, i32) {
    %c0_i32 = arith.constant 0 : i32
    %c0_i32_0 = arith.constant 0 : i32
    return %c0_i32, %arg0 : i32, i32
  }
}

</mosaic_0001>

<bundles_post_ra>
// kernel: tpu_custom_call.1
= control target key start
LH: loop header
LB: loop body
LE: loop exit
PB: predicated region body
PF: predicated region fallthrough
CT: control target
= control target key end

     0   :  { %11 = vsyncpa [#allocation3], 0  ;;  %s5433_s0 = inlined_call_operand.vmem [shape: f32[1024,1], index: 0, kind: input, shape index: {}]   ;;  %s5434_s1 = inlined_call_operand.vmem [shape: f32[1024,1], index: 1, kind: input, shape index: {}]   ;;  %s5435_s2 = inlined_call_operand.vmem [shape: f32[1,1024], index: 2, kind: input, shape index: {}]   ;;  %s5436_s3 = inlined_call_operand.vmem [shape: f32[1,1024], index: 3, kind: input, shape index: {}]   ;;  %s5437_s4 = inlined_call_operand.hbm [shape: f32[1,1024], index: 4, kind: output, shape index: {0}]   ;;  %s5438_s5 = inlined_call_operand.hbm [shape: f32[1,1024], index: 5, kind: output, shape index: {1}]  }
   0x1   :  { %13 = vsyncpa [#allocation3 + $0x1], 0 }
   0x2   :  { %14 = vsyncpa [#allocation5], 0 }
   0x3   :  { %16 = vsyncpa [#allocation5 + $0x1], 0  ;;  %s4377_s18 = smov 0   ;;  %s4379_s19 = smov 0  }
   0x4   :  { %s4381_s20 = smov 0   ;;  %s4383_s21 = smov 0  }
   0x5   :  { %s4385_s22 = smov 0   ;;  %s4387_s23 = smov 0  }
   0x6   :  { %s4389_s24 = smov 0   ;;  %s4391_s25 = smov 0  }
   0x7 LB: > { %5442 = sst [smem:[#allocation8_spill]] %s4332_s23  ;;  %s3084_s26 = sadd.s32 4294967295, %s4340_s25   ;;  %s4340_s25 = sphi %s4391_s25, %s22_s25   ;;  %s4336_s24 = sphi %s4389_s24, %s5453_s24   ;;  %s4332_s23 = sphi %s4387_s23, %s5452_s23   ;;  %s4328_s22 = sphi %s4385_s22, %s5451_s22   ;;  %s4324_s21 = sphi %s4383_s21, %s5450_s21   ;;  %s4320_s20 = sphi %s4381_s20, %s5456_s20   ;;  %s4316_s19 = sphi %s4379_s19, %s5455_s19   ;;  %s4312_s18 = sphi %s4377_s18, %s5454_s18  }
   0x8   : > { %5443 = sst [smem:[#allocation9_spill]] %s4336_s24  ;;  %s3085_s27 = sadd.s32 4294967294, %s4340_s25  }
   0x9   : > { %s31_s28 = sadd.s32 1, %s4332_s23  ;;  %s34_s29 = sadd.s32 1, %s4336_s24 }
   0xa   : > { %p32_p0 = scmp.ge.s32.totalorder %s31_s28, 2  ;;  %p155_p1 = scmp.ne.s32.totalorder %s4320_s20, %s4316_s19 }
   0xb   : > { %p156_p2 = scmp.eq.s32.totalorder %s3084_s26, 3  ;;  %p161_p4 = scmp.ne.s32.totalorder %s4316_s19, %s4312_s18 }
   0xc   : > { %s5458_s28 = smov (%p32_p0, %s31_s28), 0  ;;  %s5460_s29 = smov (!%p32_p0, %s34_s29), %s4336_s24 }
   0xd   : > { %5444 = sst [smem:[#allocation10_spill]] %s5458_s28  ;;  %p4426_p3 = por %p156_p2, %p155_p1 }
   0xe   : > { %p36_p5 = scmp.ge.s32.totalorder %s5460_s29, 2  ;;  %p162_p6 = scmp.eq.s32.totalorder %s3085_s27, 3 }
   0xf   : > { %p3088_p7 = scmp.ge.s32.totalorder %s4340_s25, 1  ;;  %p240_p8 = scmp.lt.s32.totalorder %s4340_s25, 5 }
  0x10   : > { %s5462_s29 = smov (%p36_p5, %s5460_s29), 0  ;;  %p4436_p9 = por %p162_p6, %p161_p4 }
  0x11   : > { %5446 = sst [smem:[#allocation11_spill]] %s5462_s29  ;;  %p241_p10 = pnand %p3088_p7, %p240_p8 }
  0x12   : > { %s142_s7 = ssub.s32 %s4336_s24, %s5462_s29  ;;  %s145_s8 = sadd.s32 1, %s4320_s20 }
  0x13   : > { %p143_p11 = scmp.eq.s32.totalorder %s142_s7, 0  ;;  %244 = sbr.rel (%p241_p10) target bundleno = 776 (0x308), region = 36 }
  0x14   : > { %s4447_s10 = sand.u32 (!%p241_p10), 1, %s4316_s19   ;;  %s3091_s11 = sshll.u32 (!%p241_p10), %s4324_s21, 6 }
  0x15   : > { %s4444_s9 = scalar_select %p143_p11, %s4320_s20, %s145_s8  }
  0x16   : > { %s3089_s12 = sshll.u32 (!%p241_p10), %s4447_s10, 2  ;;  %p287_p12 = scmp.lt.s32.totalorder (!%p241_p10), %s3091_s11, 127 }
  0x17   : > { %s3095_s13 = sshll.u32 (!%p241_p10), %s4328_s22, 2  ;;  %s4472_s15 = scalar_lea.vmem (!%p241_p10), [#allocation2], %s3089_s12 }
  0x18   : > { %p299_p13 = scmp.lt.s32.totalorder (!%p241_p10), %s3095_s13, 7  ;;  %s4474_s16 = scalar_lea.vmem (!%p241_p10), [#allocation4], %s3089_s12 }
  0x19   : > { %p3097_p0 = scmp.ne.s32.totalorder (!%p241_p10), %s4324_s21, 0 }
  0x1a   : > { %s5464_s11 = smov (!%p287_p12, %s3091_s11), 127  ;;  %s5466_s13 = smov (!%p299_p13, %s3095_s13), 7 }
  0x1b   : > { %s3092_s14 = sshll.u32 %s5464_s11, 3  ;;  %s301_s28 = scalar_lea.vmem %s5435_s2, %s5466_s13  ;;  %v314_v0 = vlaneseq (!%p3097_p0)  ;;  %v4342_v1 = vmov (!%p3097_p0), 0.0  }
  0x1c   : > { %s4455_s17 = scalar_lea.vmem %s5433_s0, %s3092_s14  ;;  %s4460_s7 = scalar_lea.vmem %s5434_s1, %s3092_s14 }
  0x1d   : > { %s306_s23 = scalar_lea.vmem %s5436_s3, %s5466_s13  ;;  %313 = sbr.rel (%p3097_p0) target bundleno = 36 (0x24), region = 40  ;;  %vm316_vm0 = vcmp.lt.s32.totalorder (!%p3097_p0), %v314_v0, 512 }
  0x1e   : > { %318 = vst.msk [vmem:[%s4472_s15] sm:$0xf] (!%p3097_p0), %vm316_vm0, %v4342_v1  ;;  %319 = vst.msk [vmem:[%s4474_s16] sm:$0xf] (!%p3097_p0), %vm316_vm0, %v4342_v1 }
  0x24 PF: > { %v324_v2 = vld [vmem:[%s4455_s17 + $0x10] sm:$0xff]  ;;  %v322_v3 = vld [vmem:[%s4455_s17] sm:$0xff]  ;;  %v325_v4 = vld [vmem:[%s4455_s17 + $0x18] sm:$0xff]  ;;  %v4343_v5 = vmov 0   ;;  %p3098_p1 = scmp.ne.s32.totalorder %s4324_s21, 1 }
  0x25   : > { %3189 = vset.pattern.permute.xlu1 %v4343_v5  ;;  %3188 = vset.pattern.permute.xlu0 %v4343_v5  ;;  %v388_v6 = vmul.f32 50.0, %v324_v2  ;;  %v386_v7 = vmul.f32 50.0, %v322_v3  ;;  %v323_v8 = vld [vmem:[%s4455_s17 + $0x8] sm:$0xff]  ;;  %v389_v9 = vmul.f32 50.0, %v325_v4  ;;  %v326_v12 = vld [vmem:[%s4455_s17 + $0x20] sm:$0xff]  ;;  %v329_v15 = vld [vmem:[%s4455_s17 + $0x38] sm:$0xff] }
  0x26   : > { %v387_v10 = vmul.f32 50.0, %v323_v8  ;;  %v327_v11 = vld [vmem:[%s4455_s17 + $0x28] sm:$0xff]  ;;  %v390_v14 = vmul.f32 50.0, %v326_v12  ;;  %v328_v16 = vld [vmem:[%s4455_s17 + $0x30] sm:$0xff]  ;;  %v393_v17 = vmul.f32 50.0, %v329_v15  ;;  %v330_v20 = vld [vmem:[%s4455_s17 + $0x40] sm:$0xff] }
  0x27   : > { %613 = vperm.xlu1 %3189, %v388_v6   ;;  %603 = vperm.xlu0 %3188, %v386_v7   ;;  %v391_v13 = vmul.f32 50.0, %v327_v11  ;;  %v392_v18 = vmul.f32 50.0, %v328_v16  ;;  %v331_v19 = vld [vmem:[%s4455_s17 + $0x48] sm:$0xff]  ;;  %v394_v22 = vmul.f32 50.0, %v330_v20  ;;  %v333_v23 = vld [vmem:[%s4455_s17 + $0x58] sm:$0xff]  ;;  %v332_v24 = vld [vmem:[%s4455_s17 + $0x50] sm:$0xff] }
  0x28   : > { %v395_v21 = vmul.f32 50.0, %v331_v19  ;;  %v397_v25 = vmul.f32 50.0, %v333_v23  ;;  %v396_v26 = vmul.f32 50.0, %v332_v24  ;;  %v335_v27 = vld [vmem:[%s4455_s17 + $0x68] sm:$0xff]  ;;  %v334_v28 = vld [vmem:[%s4455_s17 + $0x60] sm:$0xff]  ;;  %v337_v31 = vld [vmem:[%s4455_s17 + $0x78] sm:$0xff] }
  0x29   : > { %v399_v29 = vmul.f32 50.0, %v335_v27  ;;  %v398_v30 = vmul.f32 50.0, %v334_v28  ;;  %v336_v32 = vld [vmem:[%s4455_s17 + $0x70] sm:$0xff]  ;;  %v401_v33 = vmul.f32 50.0, %v337_v31  ;;  %v339_v35 = vld [vmem:[%s4455_s17 + $0x88] sm:$0xff]  ;;  %v338_v36 = vld [vmem:[%s4455_s17 + $0x80] sm:$0xff] }
  0x2a   : > { %v400_v34 = vmul.f32 50.0, %v336_v32  ;;  %v403_v37 = vmul.f32 50.0, %v339_v35  ;;  %v402_v38 = vmul.f32 50.0, %v338_v36  ;;  %v341_v39 = vld [vmem:[%s4455_s17 + $0x98] sm:$0xff]  ;;  %v340_v40 = vld [vmem:[%s4455_s17 + $0x90] sm:$0xff]  ;;  %v343_v43 = vld [vmem:[%s4455_s17 + $0xa8] sm:$0xff] }
  0x2b   : > { %618 = vperm.xlu1 %3189, %v389_v9   ;;  %608 = vperm.xlu0 %3188, %v387_v10   ;;  %v405_v41 = vmul.f32 50.0, %v341_v39  ;;  %v404_v42 = vmul.f32 50.0, %v340_v40  ;;  %v342_v44 = vld [vmem:[%s4455_s17 + $0xa0] sm:$0xff]  ;;  %v407_v45 = vmul.f32 50.0, %v343_v43  ;;  %v345_v47 = vld [vmem:[%s4455_s17 + $0xb8] sm:$0xff]  ;;  %v344_v48 = vld [vmem:[%s4455_s17 + $0xb0] sm:$0xff] }
  0x2c   : > { %v406_v46 = vmul.f32 50.0, %v342_v44  ;;  %v409_v49 = vmul.f32 50.0, %v345_v47  ;;  %v408_v50 = vmul.f32 50.0, %v344_v48  ;;  %v347_v51 = vld [vmem:[%s4455_s17 + $0xc8] sm:$0xff]  ;;  %v346_v52 = vld [vmem:[%s4455_s17 + $0xc0] sm:$0xff]  ;;  %v349_v55 = vld [vmem:[%s4455_s17 + $0xd8] sm:$0xff] }
  0x2d   : > { %v411_v53 = vmul.f32 50.0, %v347_v51  ;;  %v410_v54 = vmul.f32 50.0, %v346_v52  ;;  %v348_v56 = vld [vmem:[%s4455_s17 + $0xd0] sm:$0xff]  ;;  %v413_v57 = vmul.f32 50.0, %v349_v55  ;;  %v351_v59 = vld [vmem:[%s4455_s17 + $0xe8] sm:$0xff]  ;;  %v350_v60 = vld [vmem:[%s4455_s17 + $0xe0] sm:$0xff] }
  0x2e   : > { %v412_v58 = vmul.f32 50.0, %v348_v56  ;;  %v415_v61 = vmul.f32 50.0, %v351_v59  ;;  %v414_v62 = vmul.f32 50.0, %v350_v60  ;;  %v353_v63 = vld [vmem:[%s4455_s17 + $0xf8] sm:$0xff]  ;;  %v352_v0 = vld [vmem:[%s4455_s17 + $0xf0] sm:$0xff]  ;;  %v355_v3 = vld [vmem:[%s4455_s17 + $0x108] sm:$0xff] }
  0x2f   : > { %628 = vperm.xlu1 %3189, %v391_v13   ;;  %623 = vperm.xlu0 %3188, %v390_v14   ;;  %v417_v1 = vmul.f32 50.0, %v353_v63  ;;  %v416_v2 = vmul.f32 50.0, %v352_v0  ;;  %v354_v4 = vld [vmem:[%s4455_s17 + $0x100] sm:$0xff]  ;;  %v419_v5 = vmul.f32 50.0, %v355_v3  ;;  %v357_v7 = vld [vmem:[%s4455_s17 + $0x118] sm:$0xff]  ;;  %v356_v8 = vld [vmem:[%s4455_s17 + $0x110] sm:$0xff] }
  0x30   : > { %v418_v6 = vmul.f32 50.0, %v354_v4  ;;  %v421_v9 = vmul.f32 50.0, %v357_v7  ;;  %v420_v10 = vmul.f32 50.0, %v356_v8  ;;  %v359_v11 = vld [vmem:[%s4455_s17 + $0x128] sm:$0xff]  ;;  %v358_v12 = vld [vmem:[%s4455_s17 + $0x120] sm:$0xff]  ;;  %v361_v15 = vld [vmem:[%s4455_s17 + $0x138] sm:$0xff] }
  0x31   : > { %v423_v13 = vmul.f32 50.0, %v359_v11  ;;  %v422_v14 = vmul.f32 50.0, %v358_v12  ;;  %v360_v16 = vld [vmem:[%s4455_s17 + $0x130] sm:$0xff]  ;;  %v363_v19 = vld [vmem:[%s4455_s17 + $0x148] sm:$0xff]  ;;  %v362_v20 = vld [vmem:[%s4455_s17 + $0x140] sm:$0xff] }
  0x32   : > { %v365_v23 = vld [vmem:[%s4455_s17 + $0x158] sm:$0xff]  ;;  %v364_v24 = vld [vmem:[%s4455_s17 + $0x150] sm:$0xff]  ;;  %v367_v27 = vld [vmem:[%s4455_s17 + $0x168] sm:$0xff] }
  0x33   : > { %638 = vperm.xlu1 %3189, %v393_v17   ;;  %633 = vperm.xlu0 %3188, %v392_v18   ;;  %v425_v17 = vmul.f32 50.0, %v361_v15  ;;  %v424_v18 = vmul.f32 50.0, %v360_v16  ;;  %v366_v28 = vld [vmem:[%s4455_s17 + $0x160] sm:$0xff]  ;;  %v369_v31 = vld [vmem:[%s4455_s17 + $0x178] sm:$0xff]  ;;  %v368_v32 = vld [vmem:[%s4455_s17 + $0x170] sm:$0xff] }
  0x34   : > { %v371_v35 = vld [vmem:[%s4455_s17 + $0x188] sm:$0xff]  ;;  %v370_v36 = vld [vmem:[%s4455_s17 + $0x180] sm:$0xff]  ;;  %v373_v39 = vld [vmem:[%s4455_s17 + $0x198] sm:$0xff] }
  0x35   : > { %v372_v40 = vld [vmem:[%s4455_s17 + $0x190] sm:$0xff]  ;;  %v375_v43 = vld [vmem:[%s4455_s17 + $0x1a8] sm:$0xff]  ;;  %v374_v44 = vld [vmem:[%s4455_s17 + $0x1a0] sm:$0xff] }
  0x36   : > { %v377_v47 = vld [vmem:[%s4455_s17 + $0x1b8] sm:$0xff]  ;;  %v376_v48 = vld [vmem:[%s4455_s17 + $0x1b0] sm:$0xff]  ;;  %v379_v51 = vld [vmem:[%s4455_s17 + $0x1c8] sm:$0xff] }
  0x37   : > { %648 = vperm.xlu1 %3189, %v395_v21   ;;  %643 = vperm.xlu0 %3188, %v394_v22   ;;  %v427_v21 = vmul.f32 50.0, %v363_v19  ;;  %v426_v22 = vmul.f32 50.0, %v362_v20  ;;  %v378_v52 = vld [vmem:[%s4455_s17 + $0x1c0] sm:$0xff]  ;;  %v381_v55 = vld [vmem:[%s4455_s17 + $0x1d8] sm:$0xff]  ;;  %v380_v56 = vld [vmem:[%s4455_s17 + $0x1d0] sm:$0xff] }
  0x38   : > { %v383_v59 = vld [vmem:[%s4455_s17 + $0x1e8] sm:$0xff]  ;;  %v382_v60 = vld [vmem:[%s4455_s17 + $0x1e0] sm:$0xff]  ;;  %v385_v0 = vld [vmem:[%s4455_s17 + $0x1f8] sm:$0xff] }
  0x39   : > { %v446_v63 = vmul.f32 50.0, %v382_v60  ;;  %v320_v3 = vld [vmem:[%s301_s28] sm:$0xf]  ;;  %v449_v4 = vmul.f32 50.0, %v385_v0  ;;  %v455_v15 = vld [vmem:[%s4460_s7 + $0x18] sm:$0xff] }
  0x3a   : > { %v321_v8 = vmul.f32 50.0, %v320_v3 }
  0x3b   : > { %658 = vperm.xlu1 %3189, %v397_v25   ;;  %653 = vperm.xlu0 %3188, %v396_v26   ;;  %v429_v25 = vmul.f32 50.0, %v365_v23  ;;  %v428_v26 = vmul.f32 50.0, %v364_v24 }
  0x3f   : > { %668 = vperm.xlu1 %3189, %v399_v29   ;;  %663 = vperm.xlu0 %3188, %v398_v30   ;;  %v431_v29 = vmul.f32 50.0, %v367_v27  ;;  %v430_v30 = vmul.f32 50.0, %v366_v28  ;;  %v457_v27 = vld [vmem:[%s4460_s7 + $0x28] sm:$0xff] }
  0x43   : > { %678 = vperm.xlu1 %3189, %v401_v33   ;;  %673 = vperm.xlu0 %3188, %v400_v34   ;;  %v433_v33 = vmul.f32 50.0, %v369_v31  ;;  %v432_v34 = vmul.f32 50.0, %v368_v32  ;;  %v521_v32 = vmul.f32 50.0, %v457_v27  ;;  %v466_v27 = vld [vmem:[%s4460_s7 + $0x70] sm:$0xff] }
  0x47   : > { %688 = vperm.xlu1 %3189, %v403_v37   ;;  %683 = vperm.xlu0 %3188, %v402_v38   ;;  %v435_v37 = vmul.f32 50.0, %v371_v35  ;;  %v434_v38 = vmul.f32 50.0, %v370_v36  ;;  %v459_v36 = vld [vmem:[%s4460_s7 + $0x38] sm:$0xff] }
  0x4b   : > { %698 = vperm.xlu1 %3189, %v405_v41   ;;  %693 = vperm.xlu0 %3188, %v404_v42   ;;  %v437_v41 = vmul.f32 50.0, %v373_v39  ;;  %v436_v42 = vmul.f32 50.0, %v372_v40 }
  0x4f   : > { %708 = vperm.xlu1 %3189, %v407_v45   ;;  %703 = vperm.xlu0 %3188, %v406_v46   ;;  %v439_v45 = vmul.f32 50.0, %v375_v43  ;;  %v438_v46 = vmul.f32 50.0, %v374_v44 }
  0x53   : > { %718 = vperm.xlu1 %3189, %v409_v49   ;;  %713 = vperm.xlu0 %3188, %v408_v50   ;;  %v441_v49 = vmul.f32 50.0, %v377_v47  ;;  %v440_v50 = vmul.f32 50.0, %v376_v48  ;;  %v460_v47 = vld [vmem:[%s4460_s7 + $0x40] sm:$0xff] }
  0x57   : > { %728 = vperm.xlu1 %3189, %v411_v53   ;;  %723 = vperm.xlu0 %3188, %v410_v54   ;;  %v443_v53 = vmul.f32 50.0, %v379_v51  ;;  %v442_v54 = vmul.f32 50.0, %v378_v52 }
  0x5b   : > { %738 = vperm.xlu1 %3189, %v413_v57   ;;  %733 = vperm.xlu0 %3188, %v412_v58   ;;  %v445_v57 = vmul.f32 50.0, %v381_v55  ;;  %v444_v58 = vmul.f32 50.0, %v380_v56 }
  0x5f   : > { %748 = vperm.xlu1 %3189, %v415_v61   ;;  %743 = vperm.xlu0 %3188, %v414_v62   ;;  %v581_v61 = vlaneseq  ;;  %v447_v62 = vmul.f32 50.0, %v383_v59 }
  0x61   : > { %vm5105_vm1 = vcmp.lt.s32.totalorder %v581_v61, 512 }
  0x63   : > { %758 = vperm.xlu1 %3189, %v417_v1   ;;  %753 = vperm.xlu0 %3188, %v416_v2   ;;  %v384_v1 = vld [vmem:[%s4455_s17 + $0x1f0] sm:$0xff]  ;;  %v4544_v2 = vshrl.u32 %v581_v61, 7 }
  0x65   : > { %v583_v7 = vsub.s32 0, %v4544_v2  ;;  %v591_v11 = vsub.s32 2, %v4544_v2 }
  0x67   : > { %768 = vperm.xlu1 %3189, %v419_v5   ;;  %763 = vperm.xlu0 %3188, %v418_v6   ;;  %v448_v5 = vmul.f32 50.0, %v384_v1  ;;  %v453_v6 = vld [vmem:[%s4460_s7 + $0x8] sm:$0xff]  ;;  %v4560_v16 = vrot.slane %v321_v8, %v583_v7  ;;  %v4569_v20 = vrot.slane %v321_v8, %v591_v11 }
  0x68   : > { %v517_v12 = vmul.f32 50.0, %v453_v6 }
  0x6b   : > { %778 = vperm.xlu1 %3189, %v421_v9   ;;  %773 = vperm.xlu0 %3188, %v420_v10   ;;  %v452_v9 = vld [vmem:[%s4460_s7] sm:$0xff]  ;;  %v587_v10 = vsub.s32 1, %v4544_v2 }
  0x6d   : > { %v4565_v19 = vrot.slane %v321_v8, %v587_v10 }
  0x6f   : > { %788 = vperm.xlu1 %3189, %v423_v13   ;;  %783 = vperm.xlu0 %3188, %v422_v14   ;;  %v595_v13 = vsub.s32 3, %v4544_v2  ;;  %v516_v14 = vmul.f32 50.0, %v452_v9  ;;  %v464_v9 = vld [vmem:[%s4460_s7 + $0x60] sm:$0xff] }
  0x71   : > { %v4574_v23 = vrot.slane %v321_v8, %v595_v13 }
  0x73   : > { %798 = vperm.xlu1 %3189, %v425_v17   ;;  %793 = vperm.xlu0 %3188, %v424_v18   ;;  %v454_v17 = vld [vmem:[%s4460_s7 + $0x10] sm:$0xff] }
  0x77   : > { %808 = vperm.xlu1 %3189, %v427_v21   ;;  %803 = vperm.xlu0 %3188, %v426_v22   ;;  %v519_v22 = vmul.f32 50.0, %v455_v15 }
  0x7b   : > { %818 = vperm.xlu1 %3189, %v429_v25   ;;  %813 = vperm.xlu0 %3188, %v428_v26   ;;  %v518_v26 = vmul.f32 50.0, %v454_v17 }
  0x7f   : > { %828 = vperm.xlu1 %3189, %v431_v29   ;;  %823 = vperm.xlu0 %3188, %v430_v30   ;;  %v456_v29 = vld [vmem:[%s4460_s7 + $0x20] sm:$0xff] }
  0x80   : > { %v520_v35 = vmul.f32 50.0, %v456_v29 }
  0x83   : > { %838 = vperm.xlu1 %3189, %v433_v33   ;;  %833 = vperm.xlu0 %3188, %v432_v34  }
  0x87   : > { %848 = vperm.xlu1 %3189, %v435_v37   ;;  %843 = vperm.xlu0 %3188, %v434_v38   ;;  %v458_v38 = vld [vmem:[%s4460_s7 + $0x30] sm:$0xff] }
  0x88   : > { %v522_v44 = vmul.f32 50.0, %v458_v38  ;;  %v530_v38 = vmul.f32 50.0, %v466_v27 }
  0x8b   : > { %858 = vperm.xlu1 %3189, %v437_v41   ;;  %853 = vperm.xlu0 %3188, %v436_v42   ;;  %v523_v42 = vmul.f32 50.0, %v459_v36 }
  0x8f   : > { %868 = vperm.xlu1 %3189, %v439_v45   ;;  %863 = vperm.xlu0 %3188, %v438_v46   ;;  %v461_v45 = vld [vmem:[%s4460_s7 + $0x48] sm:$0xff] }
  0x93   : > { %878 = vperm.xlu1 %3189, %v441_v49   ;;  %873 = vperm.xlu0 %3188, %v440_v50   ;;  %v525_v50 = vmul.f32 50.0, %v461_v45 }
  0x97   : > { %888 = vperm.xlu1 %3189, %v443_v53   ;;  %883 = vperm.xlu0 %3188, %v442_v54   ;;  %v524_v53 = vmul.f32 50.0, %v460_v47  ;;  %v463_v54 = vld [vmem:[%s4460_s7 + $0x58] sm:$0xff] }
  0x98   : > { %v527_v0 = vmul.f32 50.0, %v463_v54 }
  0x9b   : > { %898 = vperm.xlu1 %3189, %v445_v57   ;;  %893 = vperm.xlu0 %3188, %v444_v58   ;;  %v462_v57 = vld [vmem:[%s4460_s7 + $0x50] sm:$0xff] }
  0x9f   : > { %908 = vperm.xlu1 %3189, %v447_v62   ;;  %903 = vperm.xlu0 %3188, %v446_v63  }
  0xa3   : > { %918 = vperm.xlu1 %3189, %v449_v4   ;;  %913 = vperm.xlu0 %3188, %v448_v5   ;;  %v526_v4 = vmul.f32 50.0, %v462_v57  ;;  %v465_v5 = vld [vmem:[%s4460_s7 + $0x68] sm:$0xff] }
  0xa6   : > { %v614_v18 = vpop.permute.xlu1 %613  ;;  %v604_v25 = vpop.permute.xlu0 %603 }
  0xa7   : > { %v929_v21 = vsub.f32 %v4560_v16, %v614_v18  ;;  %1737 = vperm.xlu1 %3189, %v517_v12   ;;  %v930_v24 = vsub.f32 %v4565_v19, %v614_v18  ;;  %1732 = vperm.xlu0 %3188, %v516_v14   ;;  %v931_v28 = vsub.f32 %v4569_v20, %v614_v18 }
  0xa8   : > { %v932_v30 = vsub.f32 %v4574_v23, %v614_v18  ;;  %v921_v31 = vsub.f32 %v4560_v16, %v604_v25  ;;  %v922_v33 = vsub.f32 %v4565_v19, %v604_v25  ;;  %v923_v37 = vsub.f32 %v4569_v20, %v604_v25 }
  0xa9   : > { %3190 = vtanh.f32 %v929_v21  ;;  %v924_v39 = vsub.f32 %v4574_v23, %v604_v25  ;;  %v529_v18 = vmul.f32 50.0, %v465_v5  ;;  %v528_v25 = vmul.f32 50.0, %v464_v9  ;;  %v470_v5 = vld [vmem:[%s4460_s7 + $0x90] sm:$0xff] }
  0xaa   : > { %3192 = vtanh.f32 %v930_v24  ;;  %v619_v34 = vpop.permute.xlu1 %618  ;;  %v609_v40 = vpop.permute.xlu0 %608 }
  0xab   : > { %1747 = vperm.xlu1 %3189, %v519_v22   ;;  %1742 = vperm.xlu0 %3188, %v518_v26   ;;  %3194 = vtanh.f32 %v931_v28  ;;  %v933_v41 = vsub.f32 %v4560_v16, %v619_v34  ;;  %v934_v43 = vsub.f32 %v4565_v19, %v619_v34  ;;  %v925_v46 = vsub.f32 %v4560_v16, %v609_v40  ;;  %v467_v26 = vld [vmem:[%s4460_s7 + $0x78] sm:$0xff] }
  0xac   : > { %3196 = vtanh.f32 %v932_v30  ;;  %v926_v48 = vsub.f32 %v4565_v19, %v609_v40  ;;  %v927_v49 = vsub.f32 %v4569_v20, %v609_v40  ;;  %v928_v51 = vsub.f32 %v4574_v23, %v609_v40  ;;  %v469_v30 = vld [vmem:[%s4460_s7 + $0x88] sm:$0xff] }
  0xad   : > { %3198 = vtanh.f32 %v921_v31  ;;  %v935_v56 = vsub.f32 %v4569_v20, %v619_v34  ;;  %v936_v59 = vsub.f32 %v4574_v23, %v619_v34  ;;  %v468_v34 = vld [vmem:[%s4460_s7 + $0x80] sm:$0xff] }
  0xae   : > { %3200 = vtanh.f32 %v922_v33  ;;  %v4595_v52 = vpop.permute.xlu1 %628  ;;  %v624_v60 = vpop.permute.xlu0 %623 }
  0xaf   : > { %1757 = vperm.xlu1 %3189, %v521_v32   ;;  %1752 = vperm.xlu0 %3188, %v520_v35   ;;  %3202 = vtanh.f32 %v923_v37  ;;  %v941_v63 = vsub.f32 %v4560_v16, %v4595_v52  ;;  %v942_v3 = vsub.f32 %v4565_v19, %v4595_v52  ;;  %v937_v8 = vsub.f32 %v4560_v16, %v624_v60 }
  0xb0   : > { %3204 = vtanh.f32 %v924_v39  ;;  %v938_v14 = vsub.f32 %v4565_v19, %v624_v60  ;;  %v939_v17 = vsub.f32 %v4569_v20, %v624_v60  ;;  %v940_v22 = vsub.f32 %v4574_v23, %v624_v60 }
  0xb1   : > { %3206 = vtanh.f32 %v933_v41  ;;  %v943_v29 = vsub.f32 %v4569_v20, %v4595_v52  ;;  %v944_v32 = vsub.f32 %v4574_v23, %v4595_v52  ;;  %v531_v37 = vmul.f32 50.0, %v467_v26 }
  0xb2   : > { %3208 = vtanh.f32 %v934_v43  ;;  %v4619_v24 = vpop.permute.xlu1 %638  ;;  %v634_v33 = vpop.permute.xlu0 %633 }
  0xb3   : > { %1767 = vperm.xlu1 %3189, %v523_v42   ;;  %1762 = vperm.xlu0 %3188, %v522_v44   ;;  %v4598_v55 = vpop.eup %3190  ;;  %3210 = vtanh.f32 %v925_v46  ;;  %v949_v36 = vsub.f32 %v4560_v16, %v4619_v24  ;;  %v950_v41 = vsub.f32 %v4565_v19, %v4619_v24  ;;  %v533_v42 = vmul.f32 50.0, %v469_v30 }
  0xb4   : > { %v4602_v58 = vpop.eup %3192  ;;  %3212 = vtanh.f32 %v926_v48  ;;  %v945_v45 = vsub.f32 %v4560_v16, %v634_v33  ;;  %v532_v46 = vmul.f32 50.0, %v468_v34  ;;  %v947_v54 = vsub.f32 %v4569_v20, %v634_v33 }
  0xb5   : > { %v4605_v62 = vpop.eup %3194  ;;  %3214 = vtanh.f32 %v927_v49 }
  0xb6   : > { %v4609_v1 = vpop.eup %3196  ;;  %3216 = vtanh.f32 %v928_v51  ;;  %v4640_v60 = vpop.permute.xlu1 %648 }
  0xb7   : > { %1777 = vperm.xlu1 %3189, %v525_v50   ;;  %1772 = vperm.xlu0 %3188, %v524_v53   ;;  %v3199_v6 = vpop.eup %3198  ;;  %3218 = vtanh.f32 %v935_v56  ;;  %v946_v50 = vsub.f32 %v4565_v19, %v634_v33  ;;  %v644_v9 = vpop.permute.xlu0 %643 }
  0xb8   : > { %v3201_v12 = vpop.eup %3200  ;;  %3220 = vtanh.f32 %v936_v59  ;;  %v953_v27 = vsub.f32 %v4560_v16, %v644_v9  ;;  %v955_v34 = vsub.f32 %v4569_v20, %v644_v9 }
  0xb9   : > { %v3203_v15 = vpop.eup %3202  ;;  %3222 = vtanh.f32 %v941_v63  ;;  %v471_v63 = vld [vmem:[%s4460_s7 + $0x98] sm:$0xff] }
  0xba   : > { %v3205_v21 = vpop.eup %3204  ;;  %3224 = vtanh.f32 %v942_v3 }
  0xbb   : > { %1787 = vperm.xlu1 %3189, %v527_v0   ;;  %1782 = vperm.xlu0 %3188, %v526_v4   ;;  %v3207_v28 = vpop.eup %3206  ;;  %3226 = vtanh.f32 %v937_v8  ;;  %v951_v4 = vsub.f32 %v4569_v20, %v4619_v24 }
  0xbc   : > { %v3209_v31 = vpop.eup %3208  ;;  %3228 = vtanh.f32 %v938_v14 }
  0xbd   : > { %v3211_v35 = vpop.eup %3210  ;;  %3230 = vtanh.f32 %v939_v17 }
  0xbe   : > { %v3213_v39 = vpop.eup %3212  ;;  %v1433_v40 = vadd.f32 %v3211_v35, %v3199_v6  ;;  %3232 = vtanh.f32 %v940_v22  ;;  %v534_v22 = vmul.f32 50.0, %v470_v5 }
  0xbf   : > { %1797 = vperm.xlu1 %3189, %v529_v18   ;;  %1792 = vperm.xlu0 %3188, %v528_v25   ;;  %v3215_v43 = vpop.eup %3214  ;;  %v1502_v44 = vadd.f32 %v3213_v39, %v3201_v12  ;;  %3234 = vtanh.f32 %v943_v29  ;;  %v4659_v39 = vpop.permute.xlu1 %658 }
  0xc0   : > { %v3217_v47 = vpop.eup %3216  ;;  %v1434_v48 = vadd.f32 %v4598_v55, %v1433_v40  ;;  %v1571_v49 = vadd.f32 %v3215_v43, %v3203_v15  ;;  %3236 = vtanh.f32 %v944_v32  ;;  %v948_v55 = vsub.f32 %v4574_v23, %v634_v33 }
  0xc1   : > { %v3219_v51 = vpop.eup %3218  ;;  %v1503_v52 = vadd.f32 %v4602_v58, %v1502_v44  ;;  %v1640_v53 = vadd.f32 %v3217_v47, %v3205_v21  ;;  %3238 = vtanh.f32 %v949_v36  ;;  %v535_v15 = vmul.f32 50.0, %v471_v63 }
  0xc2   : > { %v3221_v56 = vpop.eup %3220  ;;  %v1572_v57 = vadd.f32 %v4605_v62, %v1571_v49  ;;  %v1435_v59 = vadd.f32 %v3207_v28, %v1434_v48  ;;  %3240 = vtanh.f32 %v950_v41  ;;  %v952_v62 = vsub.f32 %v4574_v23, %v4619_v24  ;;  %v473_v24 = vld [vmem:[%s4460_s7 + $0xa8] sm:$0xff]  ;;  %v472_v28 = vld [vmem:[%s4460_s7 + $0xa0] sm:$0xff]  ;;  %v475_v41 = vld [vmem:[%s4460_s7 + $0xb8] sm:$0xff]  ;;  %v654_v49 = vpop.permute.xlu0 %653 }
  0xc3   : > { %1807 = vperm.xlu1 %3189, %v531_v37   ;;  %1802 = vperm.xlu0 %3188, %v530_v38   ;;  %v3223_v0 = vpop.eup %3222  ;;  %v1641_v58 = vadd.f32 %v4609_v1, %v1640_v53  ;;  %v1504_v3 = vadd.f32 %v3209_v31, %v1503_v52  ;;  %3242 = vtanh.f32 %v945_v45  ;;  %v957_v1 = vsub.f32 %v4560_v16, %v4640_v60  ;;  %v474_v45 = vld [vmem:[%s4460_s7 + $0xb0] sm:$0xff] }
  0xc4   : > { %v3225_v6 = vpop.eup %3224  ;;  %v1573_v8 = vadd.f32 %v3219_v51, %v1572_v57  ;;  %3244 = vtanh.f32 %v946_v50  ;;  %v958_v21 = vsub.f32 %v4565_v19, %v4640_v60  ;;  %v954_v31 = vsub.f32 %v4565_v19, %v644_v9 }
  0xc5   : > { %v3227_v12 = vpop.eup %3226  ;;  %v1642_v14 = vadd.f32 %v3221_v56, %v1641_v58  ;;  %3246 = vtanh.f32 %v947_v54  ;;  %v537_v35 = vmul.f32 50.0, %v473_v24  ;;  %v956_v38 = vsub.f32 %v4574_v23, %v644_v9  ;;  %v476_v58 = vld [vmem:[%s4460_s7 + $0xc0] sm:$0xff] }
  0xc6   : > { %v3229_v17 = vpop.eup %3228  ;;  %v1436_v18 = vadd.f32 %v3227_v12, %v1435_v59  ;;  %3248 = vtanh.f32 %v948_v55  ;;  %v536_v40 = vmul.f32 50.0, %v472_v28  ;;  %v959_v44 = vsub.f32 %v4569_v20, %v4640_v60  ;;  %v477_v55 = vld [vmem:[%s4460_s7 + $0xc8] sm:$0xff] }
  0xc7   : > { %1817 = vperm.xlu1 %3189, %v533_v42   ;;  %1812 = vperm.xlu0 %3188, %v532_v46   ;;  %v3231_v25 = vpop.eup %3230  ;;  %v1505_v26 = vadd.f32 %v3229_v17, %v1504_v3  ;;  %3250 = vtanh.f32 %v951_v4  ;;  %v960_v48 = vsub.f32 %v4574_v23, %v4640_v60  ;;  %v965_v52 = vsub.f32 %v4560_v16, %v4659_v39 }
  0xc8   : > { %v3233_v29 = vpop.eup %3232  ;;  %v1574_v30 = vadd.f32 %v3231_v25, %v1573_v8  ;;  %3252 = vtanh.f32 %v952_v62  ;;  %v1437_v37 = vadd.f32 %v3223_v0, %v1436_v18  ;;  %v539_v53 = vmul.f32 50.0, %v475_v41  ;;  %v479_v18 = vld [vmem:[%s4460_s7 + $0xd8] sm:$0xff]  ;;  %v478_v25 = vld [vmem:[%s4460_s7 + $0xd0] sm:$0xff] }
  0xc9   : > { %v3235_v32 = vpop.eup %3234  ;;  %v1643_v33 = vadd.f32 %v3233_v29, %v1642_v14  ;;  %3254 = vtanh.f32 %v957_v1  ;;  %v1506_v43 = vadd.f32 %v3225_v6, %v1505_v26  ;;  %v966_v57 = vsub.f32 %v4565_v19, %v4659_v39  ;;  %v664_v29 = vpop.permute.xlu0 %663 }
  0xca   : > { %v3237_v36 = vpop.eup %3236  ;;  %3256 = vtanh.f32 %v958_v21  ;;  %v1575_v47 = vadd.f32 %v3235_v32, %v1574_v30  ;;  %v538_v59 = vmul.f32 50.0, %v474_v45  ;;  %v961_v0 = vsub.f32 %v4560_v16, %v654_v49 }
  0xcb   : > { %1827 = vperm.xlu1 %3189, %v535_v15   ;;  %1822 = vperm.xlu0 %3188, %v534_v22   ;;  %v3239_v42 = vpop.eup %3238  ;;  %3258 = vtanh.f32 %v953_v27  ;;  %v1644_v51 = vadd.f32 %v3237_v36, %v1643_v33  ;;  %v962_v5 = vsub.f32 %v4565_v19, %v654_v49  ;;  %v963_v62 = vsub.f32 %v4569_v20, %v654_v49  ;;  %v4677_v15 = vpop.permute.xlu1 %668 }
  0xcc   : > { %v3241_v46 = vpop.eup %3240  ;;  %3260 = vtanh.f32 %v954_v31  ;;  %v541_v9 = vmul.f32 50.0, %v477_v55  ;;  %v964_v1 = vsub.f32 %v4574_v23, %v654_v49  ;;  %v540_v17 = vmul.f32 50.0, %v476_v58 }
  0xcd   : > { %v3243_v50 = vpop.eup %3242  ;;  %3262 = vtanh.f32 %v955_v34  ;;  %v967_v24 = vsub.f32 %v4569_v20, %v4659_v39  ;;  %v968_v28 = vsub.f32 %v4574_v23, %v4659_v39  ;;  %v973_v32 = vsub.f32 %v4560_v16, %v4677_v15 }
  0xce   : > { %v3245_v54 = vpop.eup %3244  ;;  %v1438_v56 = vadd.f32 %v3243_v50, %v1437_v37  ;;  %3264 = vtanh.f32 %v956_v38  ;;  %v543_v33 = vmul.f32 50.0, %v479_v18  ;;  %v974_v36 = vsub.f32 %v4565_v19, %v4677_v15  ;;  %v481_v38 = vld [vmem:[%s4460_s7 + $0xe8] sm:$0xff] }
  0xcf   : > { %1837 = vperm.xlu1 %3189, %v537_v35   ;;  %1832 = vperm.xlu0 %3188, %v536_v40   ;;  %v3247_v60 = vpop.eup %3246  ;;  %v1507_v63 = vadd.f32 %v3245_v54, %v1506_v43  ;;  %3266 = vtanh.f32 %v959_v44  ;;  %v542_v37 = vmul.f32 50.0, %v478_v25  ;;  %v969_v41 = vsub.f32 %v4560_v16, %v664_v29 }
  0xd0   : > { %v3249_v3 = vpop.eup %3248  ;;  %v1576_v4 = vadd.f32 %v3247_v60, %v1575_v47  ;;  %3268 = vtanh.f32 %v960_v48  ;;  %v1439_v14 = vadd.f32 %v3239_v42, %v1438_v56  ;;  %v480_v42 = vld [vmem:[%s4460_s7 + $0xe0] sm:$0xff]  ;;  %v970_v45 = vsub.f32 %v4565_v19, %v664_v29  ;;  %v483_v56 = vld [vmem:[%s4460_s7 + $0xf8] sm:$0xff]  ;;  %v482_v60 = vld [vmem:[%s4460_s7 + $0xf0] sm:$0xff] }
  0xd1   : > { %v3251_v6 = vpop.eup %3250  ;;  %v1645_v8 = vadd.f32 %v3249_v3, %v1644_v51  ;;  %3270 = vtanh.f32 %v965_v52  ;;  %v1508_v22 = vadd.f32 %v3241_v46, %v1507_v63  ;;  %v971_v48 = vsub.f32 %v4569_v20, %v664_v29  ;;  %v674_v3 = vpop.permute.xlu0 %673 }
  0xd2   : > { %v3253_v12 = vpop.eup %3252  ;;  %3272 = vtanh.f32 %v966_v57  ;;  %v1577_v27 = vadd.f32 %v3251_v6, %v1576_v4  ;;  %v545_v49 = vmul.f32 50.0, %v481_v38  ;;  %v972_v52 = vsub.f32 %v4574_v23, %v664_v29 }
  0xd3   : > { %1847 = vperm.xlu1 %3189, %v539_v53   ;;  %1842 = vperm.xlu0 %3188, %v538_v59   ;;  %v3255_v21 = vpop.eup %3254  ;;  %3274 = vtanh.f32 %v961_v0  ;;  %v1646_v31 = vadd.f32 %v3253_v12, %v1645_v8  ;;  %v4695_v53 = vpop.permute.xlu1 %678  ;;  %v544_v54 = vmul.f32 50.0, %v480_v42  ;;  %v975_v55 = vsub.f32 %v4569_v20, %v4677_v15 }
  0xd4   : > { %v3257_v26 = vpop.eup %3256  ;;  %3276 = vtanh.f32 %v962_v5  ;;  %v976_v58 = vsub.f32 %v4574_v23, %v4677_v15  ;;  %v981_v6 = vsub.f32 %v4560_v16, %v4695_v53  ;;  %v547_v8 = vmul.f32 50.0, %v483_v56 }
  0xd5   : > { %v3259_v30 = vpop.eup %3258  ;;  %3278 = vtanh.f32 %v963_v62  ;;  %v982_v12 = vsub.f32 %v4565_v19, %v4695_v53  ;;  %v977_v18 = vsub.f32 %v4560_v16, %v674_v3  ;;  %v978_v25 = vsub.f32 %v4565_v19, %v674_v3 }
  0xd6   : > { %v3261_v34 = vpop.eup %3260  ;;  %v1440_v35 = vadd.f32 %v3259_v30, %v1439_v14  ;;  %3280 = vtanh.f32 %v964_v1  ;;  %v546_v14 = vmul.f32 50.0, %v482_v60  ;;  %v485_v1 = vld [vmem:[%s4460_s7 + $0x108] sm:$0xff]  ;;  %v983_v38 = vsub.f32 %v4569_v20, %v4695_v53 }
  0xd7   : > { %1857 = vperm.xlu1 %3189, %v541_v9   ;;  %1852 = vperm.xlu0 %3188, %v540_v17   ;;  %v3263_v39 = vpop.eup %3262  ;;  %v1509_v40 = vadd.f32 %v3261_v34, %v1508_v22  ;;  %3282 = vtanh.f32 %v967_v24  ;;  %v549_v29 = vmul.f32 50.0, %v485_v1  ;;  %v984_v42 = vsub.f32 %v4574_v23, %v4695_v53 }
  0xd8   : > { %v3265_v43 = vpop.eup %3264  ;;  %v1578_v44 = vadd.f32 %v3263_v39, %v1577_v27  ;;  %3284 = vtanh.f32 %v968_v28  ;;  %v1441_v51 = vadd.f32 %v3255_v21, %v1440_v35  ;;  %v484_v21 = vld [vmem:[%s4460_s7 + $0x100] sm:$0xff]  ;;  %v979_v28 = vsub.f32 %v4569_v20, %v674_v3  ;;  %v487_v35 = vld [vmem:[%s4460_s7 + $0x118] sm:$0xff]  ;;  %v486_v39 = vld [vmem:[%s4460_s7 + $0x110] sm:$0xff] }
  0xd9   : > { %v3267_v46 = vpop.eup %3266  ;;  %v1647_v47 = vadd.f32 %v3265_v43, %v1646_v31  ;;  %3286 = vtanh.f32 %v973_v32  ;;  %v1510_v59 = vadd.f32 %v3257_v26, %v1509_v40  ;;  %v980_v32 = vsub.f32 %v4574_v23, %v674_v3  ;;  %v684_v43 = vpop.permute.xlu0 %683 }
  0xda   : > { %v3269_v50 = vpop.eup %3268  ;;  %3288 = vtanh.f32 %v974_v36  ;;  %v1579_v0 = vadd.f32 %v3267_v46, %v1578_v44  ;;  %v548_v34 = vmul.f32 50.0, %v484_v21  ;;  %v985_v56 = vsub.f32 %v4560_v16, %v684_v43 }
  0xdb   : > { %1867 = vperm.xlu1 %3189, %v543_v33   ;;  %1862 = vperm.xlu0 %3188, %v542_v37   ;;  %v3271_v57 = vpop.eup %3270  ;;  %3290 = vtanh.f32 %v969_v41  ;;  %v1648_v5 = vadd.f32 %v3269_v50, %v1647_v47  ;;  %v4713_v33 = vpop.permute.xlu1 %688  ;;  %v551_v47 = vmul.f32 50.0, %v487_v35  ;;  %v986_v60 = vsub.f32 %v4565_v19, %v684_v43 }
  0xdc   : > { %v3273_v63 = vpop.eup %3272  ;;  %3292 = vtanh.f32 %v970_v45  ;;  %v989_v46 = vsub.f32 %v4560_v16, %v4713_v33  ;;  %v990_v50 = vsub.f32 %v4565_v19, %v4713_v33 }
  0xdd   : > { %v3275_v4 = vpop.eup %3274  ;;  %3294 = vtanh.f32 %v971_v48 }
  0xde   : > { %v3277_v62 = vpop.eup %3276  ;;  %v1442_v9 = vadd.f32 %v3275_v4, %v1441_v51  ;;  %3296 = vtanh.f32 %v972_v52  ;;  %v550_v51 = vmul.f32 50.0, %v486_v39  ;;  %v489_v52 = vld [vmem:[%s4460_s7 + $0x128] sm:$0xff] }
  0xdf   : > { %1877 = vperm.xlu1 %3189, %v545_v49   ;;  %1872 = vperm.xlu0 %3188, %v544_v54   ;;  %v3279_v15 = vpop.eup %3278  ;;  %v1511_v17 = vadd.f32 %v3277_v62, %v1510_v59  ;;  %3298 = vtanh.f32 %v975_v55  ;;  %v553_v3 = vmul.f32 50.0, %v489_v52 }
  0xe0   : > { %v3281_v22 = vpop.eup %3280  ;;  %v1580_v24 = vadd.f32 %v3279_v15, %v1579_v0  ;;  %3300 = vtanh.f32 %v976_v58  ;;  %v1443_v31 = vadd.f32 %v3271_v57, %v1442_v9  ;;  %v488_v57 = vld [vmem:[%s4460_s7 + $0x120] sm:$0xff]  ;;  %v987_v58 = vsub.f32 %v4569_v20, %v684_v43 }
  0xe1   : > { %v3283_v26 = vpop.eup %3282  ;;  %v1649_v27 = vadd.f32 %v3281_v22, %v1648_v5  ;;  %3302 = vtanh.f32 %v981_v6  ;;  %v1512_v37 = vadd.f32 %v3273_v63, %v1511_v17  ;;  %v988_v6 = vsub.f32 %v4574_v23, %v684_v43 }
  0xe2   : > { %v3285_v30 = vpop.eup %3284  ;;  %3304 = vtanh.f32 %v982_v12  ;;  %v1581_v41 = vadd.f32 %v3283_v26, %v1580_v24  ;;  %v552_v62 = vmul.f32 50.0, %v488_v57  ;;  %v992_v17 = vsub.f32 %v4574_v23, %v4713_v33 }
  0xe3   : > { %1887 = vperm.xlu1 %3189, %v547_v8   ;;  %1882 = vperm.xlu0 %3188, %v546_v14   ;;  %v3287_v36 = vpop.eup %3286  ;;  %3306 = vtanh.f32 %v977_v18  ;;  %v1650_v45 = vadd.f32 %v3285_v30, %v1649_v27  ;;  %v4731_v8 = vpop.permute.xlu1 %698  ;;  %v991_v14 = vsub.f32 %v4569_v20, %v4713_v33 }
  0xe4   : > { %v3289_v40 = vpop.eup %3288  ;;  %3308 = vtanh.f32 %v978_v25  ;;  %v694_v18 = vpop.permute.xlu0 %693  ;;  %v997_v24 = vsub.f32 %v4560_v16, %v4731_v8  ;;  %v998_v27 = vsub.f32 %v4565_v19, %v4731_v8  ;;  %v999_v43 = vsub.f32 %v4569_v20, %v4731_v8 }
  0xe5   : > { %v3291_v44 = vpop.eup %3290  ;;  %3310 = vtanh.f32 %v979_v28  ;;  %v993_v30 = vsub.f32 %v4560_v16, %v694_v18  ;;  %v994_v33 = vsub.f32 %v4565_v19, %v694_v18  ;;  %v996_v39 = vsub.f32 %v4574_v23, %v694_v18 }
  0xe6   : > { %v3293_v48 = vpop.eup %3292  ;;  %v1444_v49 = vadd.f32 %v3291_v44, %v1443_v31  ;;  %3312 = vtanh.f32 %v980_v32  ;;  %v491_v44 = vld [vmem:[%s4460_s7 + $0x138] sm:$0xff] }
  0xe7   : > { %1897 = vperm.xlu1 %3189, %v549_v29   ;;  %1892 = vperm.xlu0 %3188, %v548_v34   ;;  %v3295_v53 = vpop.eup %3294  ;;  %v1513_v54 = vadd.f32 %v3293_v48, %v1512_v37  ;;  %3314 = vtanh.f32 %v983_v38  ;;  %v555_v57 = vmul.f32 50.0, %v491_v44 }
  0xe8   : > { %v3297_v59 = vpop.eup %3296  ;;  %v1582_v55 = vadd.f32 %v3295_v53, %v1581_v41  ;;  %3316 = vtanh.f32 %v984_v42  ;;  %v1445_v5 = vadd.f32 %v3287_v36, %v1444_v49  ;;  %v995_v36 = vsub.f32 %v4569_v20, %v694_v18  ;;  %v704_v48 = vpop.permute.xlu0 %703  ;;  %v490_v49 = vld [vmem:[%s4460_s7 + $0x130] sm:$0xff] }
  0xe9   : > { %v3299_v63 = vpop.eup %3298  ;;  %v1651_v0 = vadd.f32 %v3297_v59, %v1650_v45  ;;  %3318 = vtanh.f32 %v989_v46  ;;  %v1514_v12 = vadd.f32 %v3289_v40, %v1513_v54  ;;  %v4745_v40 = vpop.permute.xlu1 %708 }
  0xea   : > { %v3301_v4 = vpop.eup %3300  ;;  %3320 = vtanh.f32 %v990_v50  ;;  %v1583_v15 = vadd.f32 %v3299_v63, %v1582_v55  ;;  %v1005_v52 = vsub.f32 %v4560_v16, %v4745_v40  ;;  %v554_v63 = vmul.f32 50.0, %v490_v49 }
  0xeb   : > { %1907 = vperm.xlu1 %3189, %v551_v47   ;;  %1902 = vperm.xlu0 %3188, %v550_v51   ;;  %v3303_v9 = vpop.eup %3302  ;;  %3322 = vtanh.f32 %v985_v56  ;;  %v1652_v22 = vadd.f32 %v3301_v4, %v1651_v0  ;;  %v1000_v47 = vsub.f32 %v4574_v23, %v4731_v8  ;;  %v1006_v56 = vsub.f32 %v4565_v19, %v4745_v40  ;;  %v493_v8 = vld [vmem:[%s4460_s7 + $0x148] sm:$0xff] }
  0xec   : > { %v3305_v1 = vpop.eup %3304  ;;  %3324 = vtanh.f32 %v986_v60  ;;  %v1001_v60 = vsub.f32 %v4560_v16, %v704_v48  ;;  %v1007_v18 = vsub.f32 %v4569_v20, %v4745_v40 }
  0xed   : > { %v3307_v21 = vpop.eup %3306  ;;  %3326 = vtanh.f32 %v987_v58 }
  0xee   : > { %v3309_v25 = vpop.eup %3308  ;;  %v1446_v26 = vadd.f32 %v3307_v21, %v1445_v5  ;;  %3328 = vtanh.f32 %v988_v6  ;;  %v1003_v6 = vsub.f32 %v4569_v20, %v704_v48  ;;  %v1008_v21 = vsub.f32 %v4574_v23, %v4745_v40 }
  0xef   : > { %1917 = vperm.xlu1 %3189, %v553_v3   ;;  %1912 = vperm.xlu0 %3188, %v552_v62   ;;  %v3311_v28 = vpop.eup %3310  ;;  %v1515_v29 = vadd.f32 %v3309_v25, %v1514_v12  ;;  %3330 = vtanh.f32 %v991_v14  ;;  %v1002_v3 = vsub.f32 %v4565_v19, %v704_v48  ;;  %v492_v62 = vld [vmem:[%s4460_s7 + $0x140] sm:$0xff]  ;;  %v1004_v14 = vsub.f32 %v4574_v23, %v704_v48  ;;  %v714_v25 = vpop.permute.xlu0 %713 }
  0xf0   : > { %v3313_v31 = vpop.eup %3312  ;;  %v1584_v32 = vadd.f32 %v3311_v28, %v1583_v15  ;;  %3332 = vtanh.f32 %v992_v17  ;;  %v1447_v38 = vadd.f32 %v3303_v9, %v1446_v26  ;;  %v557_v26 = vmul.f32 50.0, %v493_v8 }
  0xf1   : > { %v3315_v34 = vpop.eup %3314  ;;  %v1653_v35 = vadd.f32 %v3313_v31, %v1652_v22  ;;  %3334 = vtanh.f32 %v997_v24  ;;  %v1516_v42 = vadd.f32 %v3305_v1, %v1515_v29  ;;  %v4763_v1 = vpop.permute.xlu1 %718  ;;  %v1011_v44 = vsub.f32 %v4569_v20, %v714_v25 }
  0xf2   : > { %v3317_v37 = vpop.eup %3316  ;;  %3336 = vtanh.f32 %v998_v27  ;;  %v1585_v46 = vadd.f32 %v3315_v34, %v1584_v32  ;;  %v556_v27 = vmul.f32 50.0, %v492_v62  ;;  %v495_v34 = vld [vmem:[%s4460_s7 + $0x158] sm:$0xff]  ;;  %v1012_v48 = vsub.f32 %v4574_v23, %v714_v25 }
  0xf3   : > { %v3319_v41 = vpop.eup %3318  ;;  %3338 = vtanh.f32 %v993_v30  ;;  %v1654_v51 = vadd.f32 %v3317_v37, %v1653_v35  ;;  %1927 = vperm.xlu1 %3189, %v555_v57   ;;  %1922 = vperm.xlu0 %3188, %v554_v63   ;;  %v1013_v30 = vsub.f32 %v4560_v16, %v4763_v1  ;;  %v1009_v37 = vsub.f32 %v4560_v16, %v714_v25 }
  0xf4   : > { %v3321_v45 = vpop.eup %3320  ;;  %3340 = vtanh.f32 %v994_v33  ;;  %v1014_v33 = vsub.f32 %v4565_v19, %v4763_v1 }
  0xf5   : > { %v3323_v50 = vpop.eup %3322  ;;  %3342 = vtanh.f32 %v995_v36  ;;  %v4779_v49 = vpop.permute.xlu1 %728 }
  0xf6   : > { %v3325_v53 = vpop.eup %3324  ;;  %v1448_v54 = vadd.f32 %v3323_v50, %v1447_v38  ;;  %3344 = vtanh.f32 %v996_v39  ;;  %v494_v38 = vld [vmem:[%s4460_s7 + $0x150] sm:$0xff] }
  0xf7   : > { %v3327_v59 = vpop.eup %3326  ;;  %v1517_v55 = vadd.f32 %v3325_v53, %v1516_v42  ;;  %3346 = vtanh.f32 %v999_v43  ;;  %1937 = vperm.xlu1 %3189, %v557_v26   ;;  %1932 = vperm.xlu0 %3188, %v556_v27   ;;  %v558_v50 = vmul.f32 50.0, %v494_v38  ;;  %v501_v38 = vld [vmem:[%s4460_s7 + $0x188] sm:$0xff] }
  0xf8   : > { %v3329_v0 = vpop.eup %3328  ;;  %v1586_v58 = vadd.f32 %v3327_v59, %v1585_v46  ;;  %3348 = vtanh.f32 %v1000_v47  ;;  %v1449_v12 = vadd.f32 %v3319_v41, %v1448_v54  ;;  %v1010_v41 = vsub.f32 %v4565_v19, %v714_v25 }
  0xf9   : > { %v3331_v4 = vpop.eup %3330  ;;  %v1655_v5 = vadd.f32 %v3329_v0, %v1654_v51  ;;  %3350 = vtanh.f32 %v1005_v52  ;;  %v1518_v17 = vadd.f32 %v3321_v45, %v1517_v55  ;;  %v559_v45 = vmul.f32 50.0, %v495_v34  ;;  %v497_v51 = vld [vmem:[%s4460_s7 + $0x168] sm:$0xff] }
  0xfa   : > { %v3333_v9 = vpop.eup %3332  ;;  %3352 = vtanh.f32 %v1006_v56  ;;  %v1587_v24 = vadd.f32 %v3331_v4, %v1586_v58  ;;  %v1015_v54 = vsub.f32 %v4569_v20, %v4763_v1  ;;  %v496_v56 = vld [vmem:[%s4460_s7 + $0x160] sm:$0xff]  ;;  %v1016_v55 = vsub.f32 %v4574_v23, %v4763_v1 }
  0xfb   : > { %v3335_v15 = vpop.eup %3334  ;;  %3354 = vtanh.f32 %v1001_v60  ;;  %v1656_v29 = vadd.f32 %v3333_v9, %v1655_v5  ;;  %1947 = vperm.xlu1 %3189, %v559_v45   ;;  %v724_v60 = vpop.permute.xlu0 %723  ;;  %1942 = vperm.xlu0 %3188, %v558_v50   ;;  %v1021_v58 = vsub.f32 %v4560_v16, %v4779_v49  ;;  %v560_v8 = vmul.f32 50.0, %v496_v56 }
  0xfc   : > { %v3337_v22 = vpop.eup %3336  ;;  %3356 = vtanh.f32 %v1002_v3  ;;  %v561_v3 = vmul.f32 50.0, %v497_v51  ;;  %v1020_v27 = vsub.f32 %v4574_v23, %v724_v60 }
  0xfd   : > { %v3339_v28 = vpop.eup %3338  ;;  %3358 = vtanh.f32 %v1003_v6  ;;  %v1022_v6 = vsub.f32 %v4565_v19, %v4779_v49 }
  0xfe   : > { %v3341_v31 = vpop.eup %3340  ;;  %v1450_v32 = vadd.f32 %v3339_v28, %v1449_v12  ;;  %3360 = vtanh.f32 %v1004_v14  ;;  %v1017_v12 = vsub.f32 %v4560_v16, %v724_v60  ;;  %v4797_v28 = vpop.permute.xlu1 %738 }
  0xff   : > { %v3343_v35 = vpop.eup %3342  ;;  %v1519_v36 = vadd.f32 %v3341_v31, %v1518_v17  ;;  %3362 = vtanh.f32 %v1007_v18  ;;  %1957 = vperm.xlu1 %3189, %v561_v3   ;;  %1952 = vperm.xlu0 %3188, %v560_v8   ;;  %v499_v17 = vld [vmem:[%s4460_s7 + $0x178] sm:$0xff]  ;;  %v1023_v31 = vsub.f32 %v4569_v20, %v4779_v49  ;;  %v1030_v45 = vsub.f32 %v4565_v19, %v4797_v28 }
 0x100   : > { %v3345_v39 = vpop.eup %3344  ;;  %v1588_v40 = vadd.f32 %v3343_v35, %v1587_v24  ;;  %3364 = vtanh.f32 %v1008_v21  ;;  %v1451_v47 = vadd.f32 %v3335_v15, %v1450_v32  ;;  %v1018_v15 = vsub.f32 %v4565_v19, %v724_v60  ;;  %v498_v24 = vld [vmem:[%s4460_s7 + $0x170] sm:$0xff] }
 0x101   : > { %v3347_v42 = vpop.eup %3346  ;;  %v1657_v43 = vadd.f32 %v3345_v39, %v1656_v29  ;;  %3366 = vtanh.f32 %v1013_v30  ;;  %v1520_v53 = vadd.f32 %v3337_v22, %v1519_v36  ;;  %v1019_v22 = vsub.f32 %v4569_v20, %v724_v60  ;;  %v734_v36 = vpop.permute.xlu0 %733 }
 0x102   : > { %v3349_v46 = vpop.eup %3348  ;;  %3368 = vtanh.f32 %v1014_v33  ;;  %v1589_v59 = vadd.f32 %v3347_v42, %v1588_v40  ;;  %v563_v32 = vmul.f32 50.0, %v499_v17  ;;  %v1024_v35 = vsub.f32 %v4574_v23, %v4779_v49  ;;  %v500_v42 = vld [vmem:[%s4460_s7 + $0x180] sm:$0xff] }
 0x103   : > { %v3351_v52 = vpop.eup %3350  ;;  %3370 = vtanh.f32 %v1009_v37  ;;  %v1658_v0 = vadd.f32 %v3349_v46, %v1657_v43  ;;  %v562_v37 = vmul.f32 50.0, %v498_v24  ;;  %v565_v49 = vmul.f32 50.0, %v501_v38 }
 0x104   : > { %v3353_v57 = vpop.eup %3352  ;;  %3372 = vtanh.f32 %v1010_v41  ;;  %v1029_v41 = vsub.f32 %v4560_v16, %v4797_v28  ;;  %1967 = vperm.xlu1 %3189, %v563_v32  }
 0x105   : > { %v3355_v63 = vpop.eup %3354  ;;  %3374 = vtanh.f32 %v1011_v44  ;;  %1962 = vperm.xlu0 %3188, %v562_v37  }
 0x106   : > { %v3357_v4 = vpop.eup %3356  ;;  %v1452_v5 = vadd.f32 %v3355_v63, %v1451_v47  ;;  %3376 = vtanh.f32 %v1012_v48  ;;  %v1025_v48 = vsub.f32 %v4560_v16, %v734_v36  ;;  %v1028_v63 = vsub.f32 %v4574_v23, %v734_v36 }
 0x107   : > { %v3359_v62 = vpop.eup %3358  ;;  %v1521_v9 = vadd.f32 %v3357_v4, %v1520_v53  ;;  %3378 = vtanh.f32 %v1015_v54  ;;  %v564_v53 = vmul.f32 50.0, %v500_v42 }
 0x108   : > { %v3361_v14 = vpop.eup %3360  ;;  %v1590_v1 = vadd.f32 %v3359_v62, %v1589_v59  ;;  %3380 = vtanh.f32 %v1016_v55  ;;  %v1453_v26 = vadd.f32 %v3351_v52, %v1452_v5  ;;  %v1026_v52 = vsub.f32 %v4565_v19, %v734_v36  ;;  %v4812_v59 = vpop.permute.xlu1 %748  ;;  %1977 = vperm.xlu1 %3189, %v565_v49   ;;  %v506_v49 = vld [vmem:[%s4460_s7 + $0x1b0] sm:$0xff] }
 0x109   : > { %v3363_v18 = vpop.eup %3362  ;;  %v1659_v21 = vadd.f32 %v3361_v14, %v1658_v0  ;;  %3382 = vtanh.f32 %v1021_v58  ;;  %v1522_v30 = vadd.f32 %v3353_v57, %v1521_v9  ;;  %v1027_v57 = vsub.f32 %v4569_v20, %v734_v36  ;;  %1972 = vperm.xlu0 %3188, %v564_v53   ;;  %v503_v0 = vld [vmem:[%s4460_s7 + $0x198] sm:$0xff]  ;;  %v502_v58 = vld [vmem:[%s4460_s7 + $0x190] sm:$0xff] }
 0x10a   : > { %v3365_v25 = vpop.eup %3364  ;;  %3384 = vtanh.f32 %v1022_v6  ;;  %v1591_v34 = vadd.f32 %v3363_v18, %v1590_v1  ;;  %v1031_v5 = vsub.f32 %v4569_v20, %v4797_v28  ;;  %v1032_v62 = vsub.f32 %v4574_v23, %v4797_v28 }
 0x10b   : > { %v3367_v29 = vpop.eup %3366  ;;  %3386 = vtanh.f32 %v1017_v12  ;;  %v1660_v40 = vadd.f32 %v3365_v25, %v1659_v21  ;;  %v1037_v9 = vsub.f32 %v4560_v16, %v4812_v59  ;;  %v744_v12 = vpop.permute.xlu0 %743  ;;  %v566_v17 = vmul.f32 50.0, %v502_v58 }
 0x10c   : > { %v3369_v33 = vpop.eup %3368  ;;  %3388 = vtanh.f32 %v1018_v15  ;;  %v567_v15 = vmul.f32 50.0, %v503_v0  ;;  %v1036_v37 = vsub.f32 %v4574_v23, %v744_v12  ;;  %v4831_v38 = vpop.permute.xlu1 %758  ;;  %v1039_v42 = vsub.f32 %v4569_v20, %v4812_v59 }
 0x10d   : > { %v3371_v39 = vpop.eup %3370  ;;  %3390 = vtanh.f32 %v1019_v22  ;;  %v1038_v22 = vsub.f32 %v4565_v19, %v4812_v59  ;;  %1982 = vperm.xlu0 %3188, %v566_v17  }
 0x10e   : > { %v3373_v43 = vpop.eup %3372  ;;  %v1454_v44 = vadd.f32 %v3371_v39, %v1453_v26  ;;  %3392 = vtanh.f32 %v1020_v27  ;;  %v1033_v26 = vsub.f32 %v4560_v16, %v744_v12  ;;  %1987 = vperm.xlu1 %3189, %v567_v15   ;;  %v505_v27 = vld [vmem:[%s4460_s7 + $0x1a8] sm:$0xff] }
 0x10f   : > { %v3375_v46 = vpop.eup %3374  ;;  %v1523_v47 = vadd.f32 %v3373_v43, %v1522_v30  ;;  %3394 = vtanh.f32 %v1023_v31  ;;  %v1034_v30 = vsub.f32 %v4565_v19, %v744_v12  ;;  %v504_v31 = vld [vmem:[%s4460_s7 + $0x1a0] sm:$0xff]  ;;  %v569_v39 = vmul.f32 50.0, %v505_v27 }
 0x110   : > { %v3377_v50 = vpop.eup %3376  ;;  %v1592_v51 = vadd.f32 %v3375_v46, %v1591_v34  ;;  %3396 = vtanh.f32 %v1024_v35  ;;  %v1455_v60 = vadd.f32 %v3367_v29, %v1454_v44  ;;  %v1035_v34 = vsub.f32 %v4569_v20, %v744_v12  ;;  %v507_v44 = vld [vmem:[%s4460_s7 + $0x1b8] sm:$0xff] }
 0x111   : > { %v3379_v54 = vpop.eup %3378  ;;  %v1661_v56 = vadd.f32 %v3377_v50, %v1660_v40  ;;  %3398 = vtanh.f32 %v1029_v41  ;;  %v1524_v4 = vadd.f32 %v3369_v33, %v1523_v47  ;;  %v568_v43 = vmul.f32 50.0, %v504_v31 }
 0x112   : > { %v3381_v55 = vpop.eup %3380  ;;  %3400 = vtanh.f32 %v1030_v45  ;;  %v1593_v8 = vadd.f32 %v3379_v54, %v1592_v51  ;;  %v1040_v47 = vsub.f32 %v4574_v23, %v4812_v59  ;;  %1997 = vperm.xlu1 %3189, %v569_v39  }
 0x113   : > { %v3383_v3 = vpop.eup %3382  ;;  %3402 = vtanh.f32 %v1025_v48  ;;  %v1662_v1 = vadd.f32 %v3381_v55, %v1661_v56  ;;  %v754_v48 = vpop.permute.xlu0 %753  ;;  %1992 = vperm.xlu0 %3188, %v568_v43   ;;  %v1046_v56 = vsub.f32 %v4565_v19, %v4831_v38 }
 0x114   : > { %v3385_v6 = vpop.eup %3384  ;;  %3404 = vtanh.f32 %v1026_v52  ;;  %v1045_v52 = vsub.f32 %v4560_v16, %v4831_v38 }
 0x115   : > { %v3387_v14 = vpop.eup %3386  ;;  %3406 = vtanh.f32 %v1027_v57  ;;  %v571_v57 = vmul.f32 50.0, %v507_v44 }
 0x116   : > { %v3389_v18 = vpop.eup %3388  ;;  %v1456_v21 = vadd.f32 %v3387_v14, %v1455_v60  ;;  %3408 = vtanh.f32 %v1028_v63  ;;  %v1041_v60 = vsub.f32 %v4560_v16, %v754_v48  ;;  %v570_v63 = vmul.f32 50.0, %v506_v49 }
 0x117   : > { %v3391_v24 = vpop.eup %3390  ;;  %v1525_v25 = vadd.f32 %v3389_v18, %v1524_v4  ;;  %3410 = vtanh.f32 %v1031_v5  ;;  %2007 = vperm.xlu1 %3189, %v571_v57   ;;  %v1044_v14 = vsub.f32 %v4574_v23, %v754_v48  ;;  %v1047_v18 = vsub.f32 %v4569_v20, %v4831_v38 }
 0x118   : > { %v3393_v28 = vpop.eup %3392  ;;  %v1594_v29 = vadd.f32 %v3391_v24, %v1593_v8  ;;  %3412 = vtanh.f32 %v1032_v62  ;;  %v1457_v36 = vadd.f32 %v3383_v3, %v1456_v21  ;;  %v1042_v3 = vsub.f32 %v4565_v19, %v754_v48  ;;  %2002 = vperm.xlu0 %3188, %v570_v63   ;;  %v509_v8 = vld [vmem:[%s4460_s7 + $0x1c8] sm:$0xff]  ;;  %v508_v62 = vld [vmem:[%s4460_s7 + $0x1c0] sm:$0xff] }
 0x119   : > { %v3395_v32 = vpop.eup %3394  ;;  %v1663_v33 = vadd.f32 %v3393_v28, %v1662_v1  ;;  %3414 = vtanh.f32 %v1037_v9  ;;  %v1526_v41 = vadd.f32 %v3385_v6, %v1525_v25  ;;  %v1043_v6 = vsub.f32 %v4569_v20, %v754_v48  ;;  %v4849_v1 = vpop.permute.xlu1 %768 }
 0x11a   : > { %v3397_v35 = vpop.eup %3396  ;;  %3416 = vtanh.f32 %v1038_v22  ;;  %v1595_v46 = vadd.f32 %v3395_v32, %v1594_v29  ;;  %v1048_v21 = vsub.f32 %v4574_v23, %v4831_v38  ;;  %v764_v25 = vpop.permute.xlu0 %763  ;;  %v572_v27 = vmul.f32 50.0, %v508_v62  ;;  %v510_v38 = vld [vmem:[%s4460_s7 + $0x1d0] sm:$0xff] }
 0x11b   : > { %v3399_v40 = vpop.eup %3398  ;;  %3418 = vtanh.f32 %v1033_v26  ;;  %v1664_v51 = vadd.f32 %v3397_v35, %v1663_v33  ;;  %v573_v26 = vmul.f32 50.0, %v509_v8  ;;  %v1054_v33 = vsub.f32 %v4565_v19, %v4849_v1 }
 0x11c   : > { %v3401_v45 = vpop.eup %3400  ;;  %3420 = vtanh.f32 %v1034_v30  ;;  %v1053_v30 = vsub.f32 %v4560_v16, %v4849_v1  ;;  %2012 = vperm.xlu0 %3188, %v572_v27   ;;  %v1051_v44 = vsub.f32 %v4569_v20, %v764_v25  ;;  %v1052_v48 = vsub.f32 %v4574_v23, %v764_v25  ;;  %v515_v27 = vld [vmem:[%s4460_s7 + $0x1f8] sm:$0xff] }
 0x11d   : > { %v3403_v50 = vpop.eup %3402  ;;  %3422 = vtanh.f32 %v1035_v34  ;;  %2017 = vperm.xlu1 %3189, %v573_v26   ;;  %v511_v34 = vld [vmem:[%s4460_s7 + $0x1d8] sm:$0xff]  ;;  %v4865_v49 = vpop.permute.xlu1 %778 }
 0x11e   : > { %v3405_v53 = vpop.eup %3404  ;;  %v1458_v54 = vadd.f32 %v3403_v50, %v1457_v36  ;;  %3424 = vtanh.f32 %v1036_v37  ;;  %v1049_v37 = vsub.f32 %v4560_v16, %v764_v25  ;;  %v574_v50 = vmul.f32 50.0, %v510_v38 }
 0x11f   : > { %v3407_v59 = vpop.eup %3406  ;;  %v1527_v55 = vadd.f32 %v3405_v53, %v1526_v41  ;;  %3426 = vtanh.f32 %v1039_v42  ;;  %v1050_v41 = vsub.f32 %v4565_v19, %v764_v25 }
 0x120   : > { %v3409_v0 = vpop.eup %3408  ;;  %v1596_v58 = vadd.f32 %v3407_v59, %v1595_v46  ;;  %3428 = vtanh.f32 %v1040_v47  ;;  %v1459_v12 = vadd.f32 %v3399_v40, %v1458_v54  ;;  %v1055_v54 = vsub.f32 %v4569_v20, %v4849_v1  ;;  %2022 = vperm.xlu0 %3188, %v574_v50  }
 0x121   : > { %v3411_v4 = vpop.eup %3410  ;;  %v1665_v5 = vadd.f32 %v3409_v0, %v1664_v51  ;;  %3430 = vtanh.f32 %v1045_v52  ;;  %v1528_v17 = vadd.f32 %v3401_v45, %v1527_v55  ;;  %v575_v45 = vmul.f32 50.0, %v511_v34  ;;  %v513_v51 = vld [vmem:[%s4460_s7 + $0x1e8] sm:$0xff] }
 0x122   : > { %v3413_v9 = vpop.eup %3412  ;;  %3432 = vtanh.f32 %v1046_v56  ;;  %v1597_v24 = vadd.f32 %v3411_v4, %v1596_v58  ;;  %v512_v56 = vld [vmem:[%s4460_s7 + $0x1e0] sm:$0xff]  ;;  %v1056_v55 = vsub.f32 %v4574_v23, %v4849_v1  ;;  %v1061_v58 = vsub.f32 %v4560_v16, %v4865_v49 }
 0x123   : > { %v3415_v15 = vpop.eup %3414  ;;  %3434 = vtanh.f32 %v1041_v60  ;;  %v1666_v29 = vadd.f32 %v3413_v9, %v1665_v5  ;;  %2027 = vperm.xlu1 %3189, %v575_v45   ;;  %v774_v60 = vpop.permute.xlu0 %773  ;;  %v576_v8 = vmul.f32 50.0, %v512_v56  ;;  %v1064_v34 = vsub.f32 %v4574_v23, %v4865_v49 }
 0x124   : > { %v3417_v22 = vpop.eup %3416  ;;  %3436 = vtanh.f32 %v1042_v3  ;;  %v577_v3 = vmul.f32 50.0, %v513_v51  ;;  %v1060_v26 = vsub.f32 %v4574_v23, %v774_v60 }
 0x125   : > { %v3419_v28 = vpop.eup %3418  ;;  %3438 = vtanh.f32 %v1043_v6  ;;  %v1062_v6 = vsub.f32 %v4565_v19, %v4865_v49  ;;  %2032 = vperm.xlu0 %3188, %v576_v8  }
 0x126   : > { %v3421_v31 = vpop.eup %3420  ;;  %v1460_v32 = vadd.f32 %v3419_v28, %v1459_v12  ;;  %3440 = vtanh.f32 %v1044_v14  ;;  %v1057_v12 = vsub.f32 %v4560_v16, %v774_v60  ;;  %v514_v28 = vld [vmem:[%s4460_s7 + $0x1f0] sm:$0xff] }
 0x127   : > { %v3423_v35 = vpop.eup %3422  ;;  %v1529_v36 = vadd.f32 %v3421_v31, %v1528_v17  ;;  %3442 = vtanh.f32 %v1047_v18  ;;  %2037 = vperm.xlu1 %3189, %v577_v3   ;;  %v1063_v31 = vsub.f32 %v4569_v20, %v4865_v49 }
 0x128   : > { %v3425_v39 = vpop.eup %3424  ;;  %v1598_v40 = vadd.f32 %v3423_v35, %v1597_v24  ;;  %3444 = vtanh.f32 %v1048_v21  ;;  %v1461_v47 = vadd.f32 %v3415_v15, %v1460_v32  ;;  %v1058_v15 = vsub.f32 %v4565_v19, %v774_v60 }
 0x129   : > { %v3427_v42 = vpop.eup %3426  ;;  %v1667_v43 = vadd.f32 %v3425_v39, %v1666_v29  ;;  %3446 = vtanh.f32 %v1053_v30  ;;  %v1530_v53 = vadd.f32 %v3417_v22, %v1529_v36  ;;  %v1059_v21 = vsub.f32 %v4569_v20, %v774_v60  ;;  %v4880_v22 = vpop.permute.xlu1 %788 }
 0x12a   : > { %v3429_v46 = vpop.eup %3428  ;;  %3448 = vtanh.f32 %v1054_v33  ;;  %v1599_v59 = vadd.f32 %v3427_v42, %v1598_v40  ;;  %v1069_v35 = vsub.f32 %v4560_v16, %v4880_v22  ;;  %v784_v36 = vpop.permute.xlu0 %783  ;;  %v579_v39 = vmul.f32 50.0, %v515_v27 }
 0x12b   : > { %v3431_v52 = vpop.eup %3430  ;;  %3450 = vtanh.f32 %v1049_v37  ;;  %v1668_v0 = vadd.f32 %v3429_v46, %v1667_v43  ;;  %v578_v40 = vmul.f32 50.0, %v514_v28  ;;  %v1070_v43 = vsub.f32 %v4565_v19, %v4880_v22 }
 0x12c   : > { %v3433_v57 = vpop.eup %3432  ;;  %3452 = vtanh.f32 %v1050_v41  ;;  %v1065_v46 = vsub.f32 %v4560_v16, %v784_v36  ;;  %2047 = vperm.xlu1 %3189, %v579_v39   ;;  %v1066_v49 = vsub.f32 %v4565_v19, %v784_v36  ;;  %v1068_v56 = vsub.f32 %v4574_v23, %v784_v36 }
 0x12d   : > { %v3435_v63 = vpop.eup %3434  ;;  %3454 = vtanh.f32 %v1051_v44  ;;  %2042 = vperm.xlu0 %3188, %v578_v40   ;;  %v1071_v60 = vsub.f32 %v4569_v20, %v4880_v22 }
 0x12e   : > { %v3437_v4 = vpop.eup %3436  ;;  %v1462_v5 = vadd.f32 %v3435_v63, %v1461_v47  ;;  %3456 = vtanh.f32 %v1052_v48  ;;  %v794_v3 = vpop.permute.xlu0 %793 }
 0x12f   : > { %v3439_v62 = vpop.eup %3438  ;;  %v1531_v9 = vadd.f32 %v3437_v4, %v1530_v53  ;;  %3458 = vtanh.f32 %v1055_v54  ;;  %v1076_v27 = vsub.f32 %v4574_v23, %v794_v3 }
 0x130   : > { %v3441_v14 = vpop.eup %3440  ;;  %v1600_v1 = vadd.f32 %v3439_v62, %v1599_v59  ;;  %3460 = vtanh.f32 %v1056_v55  ;;  %v1463_v25 = vadd.f32 %v3431_v52, %v1462_v5  ;;  %v1067_v52 = vsub.f32 %v4569_v20, %v784_v36 }
 0x131   : > { %v3443_v17 = vpop.eup %3442  ;;  %v1669_v18 = vadd.f32 %v3441_v14, %v1668_v0  ;;  %3462 = vtanh.f32 %v1061_v58  ;;  %v1532_v30 = vadd.f32 %v3433_v57, %v1531_v9  ;;  %v799_v57 = vpop.permute.xlu1 %798  ;;  %v1072_v58 = vsub.f32 %v4574_v23, %v4880_v22 }
 0x132   : > { %v3445_v24 = vpop.eup %3444  ;;  %3464 = vtanh.f32 %v1062_v6  ;;  %v1601_v33 = vadd.f32 %v3443_v17, %v1600_v1  ;;  %v1077_v6 = vsub.f32 %v4560_v16, %v799_v57  ;;  %v1078_v9 = vsub.f32 %v4565_v19, %v799_v57 }
 0x133   : > { %v3447_v29 = vpop.eup %3446  ;;  %3466 = vtanh.f32 %v1057_v12  ;;  %v1670_v38 = vadd.f32 %v3445_v24, %v1669_v18  ;;  %v1073_v1 = vsub.f32 %v4560_v16, %v794_v3  ;;  %v1074_v18 = vsub.f32 %v4565_v19, %v794_v3 }
 0x134   : > { %v3449_v32 = vpop.eup %3448  ;;  %3468 = vtanh.f32 %v1058_v15  ;;  %v1075_v24 = vsub.f32 %v4569_v20, %v794_v3 }
 0x135   : > { %v3451_v37 = vpop.eup %3450  ;;  %3470 = vtanh.f32 %v1059_v21  ;;  %v809_v28 = vpop.permute.xlu1 %808 }
 0x136   : > { %v3453_v41 = vpop.eup %3452  ;;  %v1464_v42 = vadd.f32 %v3451_v37, %v1463_v25  ;;  %3472 = vtanh.f32 %v1060_v26 }
 0x137   : > { %v3455_v44 = vpop.eup %3454  ;;  %v1533_v45 = vadd.f32 %v3453_v41, %v1532_v30  ;;  %3474 = vtanh.f32 %v1063_v31  ;;  %v1079_v31 = vsub.f32 %v4569_v20, %v799_v57  ;;  %v1086_v41 = vsub.f32 %v4565_v19, %v809_v28 }
 0x138   : > { %v3457_v47 = vpop.eup %3456  ;;  %v1602_v48 = vadd.f32 %v3455_v44, %v1601_v33  ;;  %3476 = vtanh.f32 %v1064_v34  ;;  %v1465_v54 = vadd.f32 %v3447_v29, %v1464_v42  ;;  %v1080_v34 = vsub.f32 %v4574_v23, %v799_v57 }
 0x139   : > { %v3459_v50 = vpop.eup %3458  ;;  %v1671_v51 = vadd.f32 %v3457_v47, %v1670_v38  ;;  %3478 = vtanh.f32 %v1069_v35  ;;  %v1534_v55 = vadd.f32 %v3449_v32, %v1533_v45  ;;  %v804_v35 = vpop.permute.xlu0 %803  ;;  %v1085_v38 = vsub.f32 %v4560_v16, %v809_v28 }
 0x13a   : > { %v3461_v53 = vpop.eup %3460  ;;  %3480 = vtanh.f32 %v1070_v43  ;;  %v1603_v0 = vadd.f32 %v3459_v50, %v1602_v48  ;;  %v1081_v44 = vsub.f32 %v4560_v16, %v804_v35  ;;  %v1082_v47 = vsub.f32 %v4565_v19, %v804_v35 }
 0x13b   : > { %v3463_v59 = vpop.eup %3462  ;;  %3482 = vtanh.f32 %v1065_v46  ;;  %v1672_v5 = vadd.f32 %v3461_v53, %v1671_v51  ;;  %v1083_v50 = vsub.f32 %v4569_v20, %v804_v35  ;;  %v1084_v53 = vsub.f32 %v4574_v23, %v804_v35 }
 0x13c   : > { %v3465_v63 = vpop.eup %3464  ;;  %3484 = vtanh.f32 %v1066_v49 }
 0x13d   : > { %v3467_v4 = vpop.eup %3466  ;;  %3486 = vtanh.f32 %v1067_v52 }
 0x13e   : > { %v3469_v8 = vpop.eup %3468  ;;  %v1466_v62 = vadd.f32 %v3467_v4, %v1465_v54  ;;  %3488 = vtanh.f32 %v1068_v56  ;;  %v819_v54 = vpop.permute.xlu1 %818 }
 0x13f   : > { %v3471_v12 = vpop.eup %3470  ;;  %v1535_v14 = vadd.f32 %v3469_v8, %v1534_v55  ;;  %3490 = vtanh.f32 %v1071_v60  ;;  %v1093_v4 = vsub.f32 %v4560_v16, %v819_v54  ;;  %v1094_v8 = vsub.f32 %v4565_v19, %v819_v54 }
 0x140   : > { %v3473_v15 = vpop.eup %3472  ;;  %v1604_v17 = vadd.f32 %v3471_v12, %v1603_v0  ;;  %3492 = vtanh.f32 %v1072_v58  ;;  %v1467_v26 = vadd.f32 %v3463_v59, %v1466_v62  ;;  %v1087_v59 = vsub.f32 %v4569_v20, %v809_v28  ;;  %v814_v0 = vpop.permute.xlu0 %813 }
 0x141   : > { %v3475_v21 = vpop.eup %3474  ;;  %v1673_v22 = vadd.f32 %v3473_v15, %v1672_v5  ;;  %3494 = vtanh.f32 %v1077_v6  ;;  %v1536_v30 = vadd.f32 %v3465_v63, %v1535_v14  ;;  %v1088_v63 = vsub.f32 %v4574_v23, %v809_v28 }
 0x142   : > { %v3477_v25 = vpop.eup %3476  ;;  %3496 = vtanh.f32 %v1078_v9  ;;  %v1605_v33 = vadd.f32 %v3475_v21, %v1604_v17  ;;  %v1089_v12 = vsub.f32 %v4560_v16, %v814_v0  ;;  %v1090_v15 = vsub.f32 %v4565_v19, %v814_v0 }
 0x143   : > { %v3479_v29 = vpop.eup %3478  ;;  %3498 = vtanh.f32 %v1073_v1  ;;  %v1674_v37 = vadd.f32 %v3477_v25, %v1673_v22  ;;  %v1091_v21 = vsub.f32 %v4569_v20, %v814_v0  ;;  %v1092_v25 = vsub.f32 %v4574_v23, %v814_v0 }
 0x144   : > { %v3481_v32 = vpop.eup %3480  ;;  %3500 = vtanh.f32 %v1074_v18 }
 0x145   : > { %v3483_v36 = vpop.eup %3482  ;;  %3502 = vtanh.f32 %v1075_v24 }
 0x146   : > { %v3485_v39 = vpop.eup %3484  ;;  %v1468_v40 = vadd.f32 %v3483_v36, %v1467_v26  ;;  %3504 = vtanh.f32 %v1076_v27  ;;  %v829_v26 = vpop.permute.xlu1 %828 }
 0x147   : > { %v3487_v42 = vpop.eup %3486  ;;  %v1537_v43 = vadd.f32 %v3485_v39, %v1536_v30  ;;  %3506 = vtanh.f32 %v1079_v31  ;;  %v1101_v36 = vsub.f32 %v4560_v16, %v829_v26  ;;  %v1102_v39 = vsub.f32 %v4565_v19, %v829_v26 }
 0x148   : > { %v3489_v45 = vpop.eup %3488  ;;  %v1606_v46 = vadd.f32 %v3487_v42, %v1605_v33  ;;  %3508 = vtanh.f32 %v1080_v34  ;;  %v1469_v52 = vadd.f32 %v3479_v29, %v1468_v40  ;;  %v1095_v29 = vsub.f32 %v4569_v20, %v819_v54  ;;  %v824_v33 = vpop.permute.xlu0 %823 }
 0x149   : > { %v3491_v48 = vpop.eup %3490  ;;  %v1675_v49 = vadd.f32 %v3489_v45, %v1674_v37  ;;  %3510 = vtanh.f32 %v1085_v38  ;;  %v1538_v57 = vadd.f32 %v3481_v32, %v1537_v43  ;;  %v1096_v32 = vsub.f32 %v4574_v23, %v819_v54 }
 0x14a   : > { %v3493_v51 = vpop.eup %3492  ;;  %3512 = vtanh.f32 %v1086_v41  ;;  %v1607_v60 = vadd.f32 %v3491_v48, %v1606_v46  ;;  %v1097_v42 = vsub.f32 %v4560_v16, %v824_v33  ;;  %v1098_v45 = vsub.f32 %v4565_v19, %v824_v33 }
 0x14b   : > { %v3495_v56 = vpop.eup %3494  ;;  %3514 = vtanh.f32 %v1081_v44  ;;  %v1676_v3 = vadd.f32 %v3493_v51, %v1675_v49  ;;  %v1099_v48 = vsub.f32 %v4569_v20, %v824_v33  ;;  %v1100_v51 = vsub.f32 %v4574_v23, %v824_v33 }
 0x14c   : > { %v3497_v55 = vpop.eup %3496  ;;  %3516 = vtanh.f32 %v1082_v47 }
 0x14d   : > { %v3499_v58 = vpop.eup %3498  ;;  %3518 = vtanh.f32 %v1083_v50 }
 0x14e   : > { %v3501_v5 = vpop.eup %3500  ;;  %v1470_v6 = vadd.f32 %v3499_v58, %v1469_v52  ;;  %3520 = vtanh.f32 %v1084_v53  ;;  %v839_v52 = vpop.permute.xlu1 %838 }
 0x14f   : > { %v3503_v62 = vpop.eup %3502  ;;  %v1539_v9 = vadd.f32 %v3501_v5, %v1538_v57  ;;  %3522 = vtanh.f32 %v1087_v59  ;;  %v1109_v58 = vsub.f32 %v4560_v16, %v839_v52  ;;  %v1110_v5 = vsub.f32 %v4565_v19, %v839_v52 }
 0x150   : > { %v3505_v14 = vpop.eup %3504  ;;  %v1608_v1 = vadd.f32 %v3503_v62, %v1607_v60  ;;  %3524 = vtanh.f32 %v1088_v63  ;;  %v1471_v24 = vadd.f32 %v3495_v56, %v1470_v6  ;;  %v1103_v56 = vsub.f32 %v4569_v20, %v829_v26  ;;  %v834_v60 = vpop.permute.xlu0 %833 }
 0x151   : > { %v3507_v17 = vpop.eup %3506  ;;  %v1677_v18 = vadd.f32 %v3505_v14, %v1676_v3  ;;  %3526 = vtanh.f32 %v1093_v4  ;;  %v1540_v28 = vadd.f32 %v3497_v55, %v1539_v9  ;;  %v1104_v55 = vsub.f32 %v4574_v23, %v829_v26 }
 0x152   : > { %v3509_v22 = vpop.eup %3508  ;;  %3528 = vtanh.f32 %v1094_v8  ;;  %v1609_v31 = vadd.f32 %v3507_v17, %v1608_v1  ;;  %v1105_v62 = vsub.f32 %v4560_v16, %v834_v60  ;;  %v1106_v14 = vsub.f32 %v4565_v19, %v834_v60 }
 0x153   : > { %v3511_v27 = vpop.eup %3510  ;;  %3530 = vtanh.f32 %v1089_v12  ;;  %v1678_v35 = vadd.f32 %v3509_v22, %v1677_v18  ;;  %v1107_v17 = vsub.f32 %v4569_v20, %v834_v60  ;;  %v1108_v22 = vsub.f32 %v4574_v23, %v834_v60 }
 0x154   : > { %v3513_v30 = vpop.eup %3512  ;;  %3532 = vtanh.f32 %v1090_v15 }
 0x155   : > { %v3515_v34 = vpop.eup %3514  ;;  %3534 = vtanh.f32 %v1091_v21 }
 0x156   : > { %v3517_v37 = vpop.eup %3516  ;;  %v1472_v38 = vadd.f32 %v3515_v34, %v1471_v24  ;;  %3536 = vtanh.f32 %v1092_v25  ;;  %v849_v24 = vpop.permute.xlu1 %848 }
 0x157   : > { %v3519_v40 = vpop.eup %3518  ;;  %v1541_v41 = vadd.f32 %v3517_v37, %v1540_v28  ;;  %3538 = vtanh.f32 %v1095_v29  ;;  %v1117_v34 = vsub.f32 %v4560_v16, %v849_v24  ;;  %v1118_v37 = vsub.f32 %v4565_v19, %v849_v24 }
 0x158   : > { %v3521_v43 = vpop.eup %3520  ;;  %v1610_v44 = vadd.f32 %v3519_v40, %v1609_v31  ;;  %3540 = vtanh.f32 %v1096_v32  ;;  %v1473_v50 = vadd.f32 %v3511_v27, %v1472_v38  ;;  %v1111_v27 = vsub.f32 %v4569_v20, %v839_v52  ;;  %v844_v31 = vpop.permute.xlu0 %843 }
 0x159   : > { %v3523_v46 = vpop.eup %3522  ;;  %v1679_v47 = vadd.f32 %v3521_v43, %v1678_v35  ;;  %3542 = vtanh.f32 %v1101_v36  ;;  %v1542_v54 = vadd.f32 %v3513_v30, %v1541_v41  ;;  %v1112_v30 = vsub.f32 %v4574_v23, %v839_v52 }
 0x15a   : > { %v3525_v49 = vpop.eup %3524  ;;  %3544 = vtanh.f32 %v1102_v39  ;;  %v1611_v59 = vadd.f32 %v3523_v46, %v1610_v44  ;;  %v1113_v40 = vsub.f32 %v4560_v16, %v844_v31  ;;  %v1114_v43 = vsub.f32 %v4565_v19, %v844_v31 }
 0x15b   : > { %v3527_v53 = vpop.eup %3526  ;;  %3546 = vtanh.f32 %v1097_v42  ;;  %v1680_v0 = vadd.f32 %v3525_v49, %v1679_v47  ;;  %v1115_v46 = vsub.f32 %v4569_v20, %v844_v31  ;;  %v1116_v49 = vsub.f32 %v4574_v23, %v844_v31 }
 0x15c   : > { %v3529_v57 = vpop.eup %3528  ;;  %3548 = vtanh.f32 %v1098_v45 }
 0x15d   : > { %v3531_v63 = vpop.eup %3530  ;;  %3550 = vtanh.f32 %v1099_v48 }
 0x15e   : > { %v3533_v3 = vpop.eup %3532  ;;  %v1474_v4 = vadd.f32 %v3531_v63, %v1473_v50  ;;  %3552 = vtanh.f32 %v1100_v51  ;;  %v859_v50 = vpop.permute.xlu1 %858 }
 0x15f   : > { %v3535_v6 = vpop.eup %3534  ;;  %v1543_v8 = vadd.f32 %v3533_v3, %v1542_v54  ;;  %3554 = vtanh.f32 %v1103_v56  ;;  %v1125_v63 = vsub.f32 %v4560_v16, %v859_v50  ;;  %v1126_v3 = vsub.f32 %v4565_v19, %v859_v50 }
 0x160   : > { %v3537_v9 = vpop.eup %3536  ;;  %v1612_v12 = vadd.f32 %v3535_v6, %v1611_v59  ;;  %3556 = vtanh.f32 %v1104_v55  ;;  %v1475_v21 = vadd.f32 %v3527_v53, %v1474_v4  ;;  %v1119_v53 = vsub.f32 %v4569_v20, %v849_v24  ;;  %v854_v59 = vpop.permute.xlu0 %853 }
 0x161   : > { %v3539_v1 = vpop.eup %3538  ;;  %v1681_v15 = vadd.f32 %v3537_v9, %v1680_v0  ;;  %3558 = vtanh.f32 %v1109_v58  ;;  %v1544_v26 = vadd.f32 %v3529_v57, %v1543_v8  ;;  %v1120_v57 = vsub.f32 %v4574_v23, %v849_v24 }
 0x162   : > { %v3541_v18 = vpop.eup %3540  ;;  %3560 = vtanh.f32 %v1110_v5  ;;  %v1613_v29 = vadd.f32 %v3539_v1, %v1612_v12  ;;  %v1121_v6 = vsub.f32 %v4560_v16, %v854_v59  ;;  %v1122_v9 = vsub.f32 %v4565_v19, %v854_v59 }
 0x163   : > { %v3543_v25 = vpop.eup %3542  ;;  %3562 = vtanh.f32 %v1105_v62  ;;  %v1682_v33 = vadd.f32 %v3541_v18, %v1681_v15  ;;  %v1123_v1 = vsub.f32 %v4569_v20, %v854_v59  ;;  %v1124_v18 = vsub.f32 %v4574_v23, %v854_v59 }
 0x164   : > { %v3545_v28 = vpop.eup %3544  ;;  %3564 = vtanh.f32 %v1106_v14 }
 0x165   : > { %v3547_v32 = vpop.eup %3546  ;;  %3566 = vtanh.f32 %v1107_v17 }
 0x166   : > { %v3549_v35 = vpop.eup %3548  ;;  %v1476_v36 = vadd.f32 %v3547_v32, %v1475_v21  ;;  %3568 = vtanh.f32 %v1108_v22  ;;  %v869_v21 = vpop.permute.xlu1 %868 }
 0x167   : > { %v3551_v38 = vpop.eup %3550  ;;  %v1545_v39 = vadd.f32 %v3549_v35, %v1544_v26  ;;  %3570 = vtanh.f32 %v1111_v27  ;;  %v1133_v32 = vsub.f32 %v4560_v16, %v869_v21  ;;  %v1134_v35 = vsub.f32 %v4565_v19, %v869_v21 }
 0x168   : > { %v3553_v41 = vpop.eup %3552  ;;  %v1614_v42 = vadd.f32 %v3551_v38, %v1613_v29  ;;  %3572 = vtanh.f32 %v1112_v30  ;;  %v1477_v48 = vadd.f32 %v3543_v25, %v1476_v36  ;;  %v1127_v25 = vsub.f32 %v4569_v20, %v859_v50  ;;  %v864_v29 = vpop.permute.xlu0 %863 }
 0x169   : > { %v3555_v44 = vpop.eup %3554  ;;  %v1683_v45 = vadd.f32 %v3553_v41, %v1682_v33  ;;  %3574 = vtanh.f32 %v1117_v34  ;;  %v1546_v52 = vadd.f32 %v3545_v28, %v1545_v39  ;;  %v1128_v28 = vsub.f32 %v4574_v23, %v859_v50 }
 0x16a   : > { %v3557_v47 = vpop.eup %3556  ;;  %3576 = vtanh.f32 %v1118_v37  ;;  %v1615_v56 = vadd.f32 %v3555_v44, %v1614_v42  ;;  %v1129_v38 = vsub.f32 %v4560_v16, %v864_v29  ;;  %v1130_v41 = vsub.f32 %v4565_v19, %v864_v29 }
 0x16b   : > { %v3559_v51 = vpop.eup %3558  ;;  %3578 = vtanh.f32 %v1113_v40  ;;  %v1684_v60 = vadd.f32 %v3557_v47, %v1683_v45  ;;  %v1131_v44 = vsub.f32 %v4569_v20, %v864_v29  ;;  %v1132_v47 = vsub.f32 %v4574_v23, %v864_v29 }
 0x16c   : > { %v3561_v54 = vpop.eup %3560  ;;  %3580 = vtanh.f32 %v1114_v43 }
 0x16d   : > { %v3563_v55 = vpop.eup %3562  ;;  %3582 = vtanh.f32 %v1115_v46 }
 0x16e   : > { %v3565_v0 = vpop.eup %3564  ;;  %v1478_v58 = vadd.f32 %v3563_v55, %v1477_v48  ;;  %3584 = vtanh.f32 %v1116_v49  ;;  %v879_v48 = vpop.permute.xlu1 %878 }
 0x16f   : > { %v3567_v4 = vpop.eup %3566  ;;  %v1547_v5 = vadd.f32 %v3565_v0, %v1546_v52  ;;  %3586 = vtanh.f32 %v1119_v53  ;;  %v1141_v55 = vsub.f32 %v4560_v16, %v879_v48  ;;  %v1142_v0 = vsub.f32 %v4565_v19, %v879_v48 }
 0x170   : > { %v3569_v8 = vpop.eup %3568  ;;  %v1616_v62 = vadd.f32 %v3567_v4, %v1615_v56  ;;  %3588 = vtanh.f32 %v1120_v57  ;;  %v1479_v17 = vadd.f32 %v3559_v51, %v1478_v58  ;;  %v1135_v51 = vsub.f32 %v4569_v20, %v869_v21  ;;  %v874_v56 = vpop.permute.xlu0 %873 }
 0x171   : > { %v3571_v12 = vpop.eup %3570  ;;  %v1685_v14 = vadd.f32 %v3569_v8, %v1684_v60  ;;  %3590 = vtanh.f32 %v1125_v63  ;;  %v1548_v24 = vadd.f32 %v3561_v54, %v1547_v5  ;;  %v1136_v54 = vsub.f32 %v4574_v23, %v869_v21 }
 0x172   : > { %v3573_v15 = vpop.eup %3572  ;;  %3592 = vtanh.f32 %v1126_v3  ;;  %v1617_v27 = vadd.f32 %v3571_v12, %v1616_v62  ;;  %v1137_v4 = vsub.f32 %v4560_v16, %v874_v56  ;;  %v1138_v8 = vsub.f32 %v4565_v19, %v874_v56 }
 0x173   : > { %v3575_v22 = vpop.eup %3574  ;;  %3594 = vtanh.f32 %v1121_v6  ;;  %v1686_v31 = vadd.f32 %v3573_v15, %v1685_v14  ;;  %v1139_v12 = vsub.f32 %v4569_v20, %v874_v56  ;;  %v1140_v15 = vsub.f32 %v4574_v23, %v874_v56 }
 0x174   : > { %v3577_v26 = vpop.eup %3576  ;;  %3596 = vtanh.f32 %v1122_v9 }
 0x175   : > { %v3579_v30 = vpop.eup %3578  ;;  %3598 = vtanh.f32 %v1123_v1 }
 0x176   : > { %v3581_v33 = vpop.eup %3580  ;;  %v1480_v34 = vadd.f32 %v3579_v30, %v1479_v17  ;;  %3600 = vtanh.f32 %v1124_v18  ;;  %v889_v17 = vpop.permute.xlu1 %888 }
 0x177   : > { %v3583_v36 = vpop.eup %3582  ;;  %v1549_v37 = vadd.f32 %v3581_v33, %v1548_v24  ;;  %3602 = vtanh.f32 %v1127_v25  ;;  %v1149_v30 = vsub.f32 %v4560_v16, %v889_v17  ;;  %v1150_v33 = vsub.f32 %v4565_v19, %v889_v17 }
 0x178   : > { %v3585_v39 = vpop.eup %3584  ;;  %v1618_v40 = vadd.f32 %v3583_v36, %v1617_v27  ;;  %3604 = vtanh.f32 %v1128_v28  ;;  %v1481_v46 = vadd.f32 %v3575_v22, %v1480_v34  ;;  %v1143_v22 = vsub.f32 %v4569_v20, %v879_v48  ;;  %v884_v27 = vpop.permute.xlu0 %883 }
 0x179   : > { %v3587_v42 = vpop.eup %3586  ;;  %v1687_v43 = vadd.f32 %v3585_v39, %v1686_v31  ;;  %3606 = vtanh.f32 %v1133_v32  ;;  %v1550_v50 = vadd.f32 %v3577_v26, %v1549_v37  ;;  %v1144_v26 = vsub.f32 %v4574_v23, %v879_v48 }
 0x17a   : > { %v3589_v45 = vpop.eup %3588  ;;  %3608 = vtanh.f32 %v1134_v35  ;;  %v1619_v53 = vadd.f32 %v3587_v42, %v1618_v40  ;;  %v1145_v36 = vsub.f32 %v4560_v16, %v884_v27  ;;  %v1146_v39 = vsub.f32 %v4565_v19, %v884_v27 }
 0x17b   : > { %v3591_v49 = vpop.eup %3590  ;;  %3610 = vtanh.f32 %v1129_v38  ;;  %v1688_v59 = vadd.f32 %v3589_v45, %v1687_v43  ;;  %v1147_v42 = vsub.f32 %v4569_v20, %v884_v27  ;;  %v1148_v45 = vsub.f32 %v4574_v23, %v884_v27 }
 0x17c   : > { %v3593_v52 = vpop.eup %3592  ;;  %3612 = vtanh.f32 %v1130_v41 }
 0x17d   : > { %v3595_v57 = vpop.eup %3594  ;;  %3614 = vtanh.f32 %v1131_v44 }
 0x17e   : > { %v3597_v60 = vpop.eup %3596  ;;  %v1482_v63 = vadd.f32 %v3595_v57, %v1481_v46  ;;  %3616 = vtanh.f32 %v1132_v47  ;;  %v899_v46 = vpop.permute.xlu1 %898 }
 0x17f   : > { %v3599_v58 = vpop.eup %3598  ;;  %v1551_v3 = vadd.f32 %v3597_v60, %v1550_v50  ;;  %3618 = vtanh.f32 %v1135_v51  ;;  %v1157_v57 = vsub.f32 %v4560_v16, %v899_v46  ;;  %v1158_v60 = vsub.f32 %v4565_v19, %v899_v46 }
 0x180   : > { %v3601_v5 = vpop.eup %3600  ;;  %v1620_v6 = vadd.f32 %v3599_v58, %v1619_v53  ;;  %3620 = vtanh.f32 %v1136_v54  ;;  %v1483_v1 = vadd.f32 %v3591_v49, %v1482_v63  ;;  %v1151_v49 = vsub.f32 %v4569_v20, %v889_v17  ;;  %v894_v53 = vpop.permute.xlu0 %893 }
 0x181   : > { %v3603_v62 = vpop.eup %3602  ;;  %v1689_v9 = vadd.f32 %v3601_v5, %v1688_v59  ;;  %3622 = vtanh.f32 %v1141_v55  ;;  %v1552_v21 = vadd.f32 %v3593_v52, %v1551_v3  ;;  %v1152_v52 = vsub.f32 %v4574_v23, %v889_v17 }
 0x182   : > { %v3605_v14 = vpop.eup %3604  ;;  %3624 = vtanh.f32 %v1142_v0  ;;  %v1621_v25 = vadd.f32 %v3603_v62, %v1620_v6  ;;  %v1153_v58 = vsub.f32 %v4560_v16, %v894_v53  ;;  %v1154_v5 = vsub.f32 %v4565_v19, %v894_v53 }
 0x183   : > { %v3607_v18 = vpop.eup %3606  ;;  %3626 = vtanh.f32 %v1137_v4  ;;  %v1690_v29 = vadd.f32 %v3605_v14, %v1689_v9  ;;  %v1155_v62 = vsub.f32 %v4569_v20, %v894_v53  ;;  %v1156_v14 = vsub.f32 %v4574_v23, %v894_v53 }
 0x184   : > { %v3609_v24 = vpop.eup %3608  ;;  %3628 = vtanh.f32 %v1138_v8 }
 0x185   : > { %v3611_v28 = vpop.eup %3610  ;;  %3630 = vtanh.f32 %v1139_v12 }
 0x186   : > { %v3613_v31 = vpop.eup %3612  ;;  %v1484_v32 = vadd.f32 %v3611_v28, %v1483_v1  ;;  %3632 = vtanh.f32 %v1140_v15  ;;  %v909_v1 = vpop.permute.xlu1 %908 }
 0x187   : > { %v3615_v34 = vpop.eup %3614  ;;  %v1553_v35 = vadd.f32 %v3613_v31, %v1552_v21  ;;  %3634 = vtanh.f32 %v1143_v22  ;;  %v1165_v28 = vsub.f32 %v4560_v16, %v909_v1  ;;  %v1166_v31 = vsub.f32 %v4565_v19, %v909_v1 }
 0x188   : > { %v3617_v37 = vpop.eup %3616  ;;  %v1622_v38 = vadd.f32 %v3615_v34, %v1621_v25  ;;  %3636 = vtanh.f32 %v1144_v26  ;;  %v1485_v44 = vadd.f32 %v3607_v18, %v1484_v32  ;;  %v1159_v18 = vsub.f32 %v4569_v20, %v899_v46  ;;  %v904_v25 = vpop.permute.xlu0 %903 }
 0x189   : > { %v3619_v40 = vpop.eup %3618  ;;  %v1691_v41 = vadd.f32 %v3617_v37, %v1690_v29  ;;  %3638 = vtanh.f32 %v1149_v30  ;;  %v1554_v48 = vadd.f32 %v3609_v24, %v1553_v35  ;;  %v1160_v24 = vsub.f32 %v4574_v23, %v899_v46 }
 0x18a   : > { %v3621_v43 = vpop.eup %3620  ;;  %3640 = vtanh.f32 %v1150_v33  ;;  %v1623_v51 = vadd.f32 %v3619_v40, %v1622_v38  ;;  %v1161_v34 = vsub.f32 %v4560_v16, %v904_v25  ;;  %v1162_v37 = vsub.f32 %v4565_v19, %v904_v25 }
 0x18b   : > { %v3623_v47 = vpop.eup %3622  ;;  %3642 = vtanh.f32 %v1145_v36  ;;  %v1692_v56 = vadd.f32 %v3621_v43, %v1691_v41  ;;  %v1163_v40 = vsub.f32 %v4569_v20, %v904_v25  ;;  %v1164_v43 = vsub.f32 %v4574_v23, %v904_v25 }
 0x18c   : > { %v3625_v50 = vpop.eup %3624  ;;  %3644 = vtanh.f32 %v1146_v39 }
 0x18d   : > { %v3627_v54 = vpop.eup %3626  ;;  %3646 = vtanh.f32 %v1147_v42 }
 0x18e   : > { %v3629_v59 = vpop.eup %3628  ;;  %v1486_v55 = vadd.f32 %v3627_v54, %v1485_v44  ;;  %3648 = vtanh.f32 %v1148_v45  ;;  %v4995_v44 = vpop.permute.xlu1 %918 }
 0x18f   : > { %v3631_v63 = vpop.eup %3630  ;;  %v1555_v0 = vadd.f32 %v3629_v59, %v1554_v48  ;;  %3650 = vtanh.f32 %v1151_v49  ;;  %v450_v48 = vld [vmem:[%s306_s23] sm:$0xf]  ;;  %v1176_v25 = vsub.f32 %v4574_v23, %v4995_v44 }
 0x190   : > { %v3633_v3 = vpop.eup %3632  ;;  %v1624_v4 = vadd.f32 %v3631_v63, %v1623_v51  ;;  %3652 = vtanh.f32 %v1152_v52  ;;  %v1487_v12 = vadd.f32 %v3623_v47, %v1486_v55  ;;  %v1167_v47 = vsub.f32 %v4569_v20, %v909_v1  ;;  %v914_v52 = vpop.permute.xlu0 %913 }
 0x191   : > { %v3635_v6 = vpop.eup %3634  ;;  %v1693_v8 = vadd.f32 %v3633_v3, %v1692_v56  ;;  %3654 = vtanh.f32 %v1157_v57  ;;  %v1556_v17 = vadd.f32 %v3625_v50, %v1555_v0  ;;  %v1168_v51 = vsub.f32 %v4574_v23, %v909_v1 }
 0x192   : > { %v3637_v9 = vpop.eup %3636  ;;  %3656 = vtanh.f32 %v1158_v60  ;;  %v1625_v22 = vadd.f32 %v3635_v6, %v1624_v4  ;;  %v1173_v56 = vsub.f32 %v4560_v16, %v4995_v44  ;;  %v1174_v55 = vsub.f32 %v4565_v19, %v4995_v44 }
 0x193   : > { %v3639_v15 = vpop.eup %3638  ;;  %3658 = vtanh.f32 %v1153_v58  ;;  %v1694_v27 = vadd.f32 %v3637_v9, %v1693_v8  ;;  %v451_v60 = vmul.f32 50.0, %v450_v48  ;;  %v1169_v58 = vsub.f32 %v4560_v16, %v914_v52 }
 0x194   : > { %v3641_v21 = vpop.eup %3640  ;;  %3660 = vtanh.f32 %v1154_v5  ;;  %v1170_v5 = vsub.f32 %v4565_v19, %v914_v52  ;;  %v1171_v9 = vsub.f32 %v4569_v20, %v914_v52  ;;  %v1172_v1 = vsub.f32 %v4574_v23, %v914_v52 }
 0x195   : > { %v3643_v26 = vpop.eup %3642  ;;  %3662 = vtanh.f32 %v1155_v62  ;;  %v1175_v62 = vsub.f32 %v4569_v20, %v4995_v44  ;;  %v5016_v16 = vrot.slane %v451_v60, %v583_v7  ;;  %v4344_v19 = vmov 1966171168  }
 0x196   : > { %v3645_v29 = vpop.eup %3644  ;;  %v1488_v30 = vadd.f32 %v3643_v26, %v1487_v12  ;;  %3664 = vtanh.f32 %v1156_v14  ;;  %v5026_v7 = vrot.slane %v451_v60, %v591_v11 }
 0x197   : > { %v3647_v32 = vpop.eup %3646  ;;  %v1557_v33 = vadd.f32 %v3645_v29, %v1556_v17  ;;  %3666 = vtanh.f32 %v1159_v18  ;;  %v2846_v18 = vunpack.c.l.s4 %v4344_v19 }
 0x198   : > { %v3649_v35 = vpop.eup %3648  ;;  %v1626_v36 = vadd.f32 %v3647_v32, %v1625_v22  ;;  %3668 = vtanh.f32 %v1160_v24  ;;  %v1489_v42 = vadd.f32 %v3639_v15, %v1488_v30  ;;  %v1738_v22 = vpop.permute.xlu1 %1737 }
 0x199   : > { %v3651_v38 = vpop.eup %3650  ;;  %v1695_v39 = vadd.f32 %v3649_v35, %v1694_v27  ;;  %3670 = vtanh.f32 %v1165_v28  ;;  %v1558_v46 = vadd.f32 %v3641_v21, %v1557_v33  ;;  %v5020_v21 = vrot.slane %v451_v60, %v587_v10 }
 0x19a   : > { %v3653_v41 = vpop.eup %3652  ;;  %3672 = vtanh.f32 %v1166_v31  ;;  %v1627_v50 = vadd.f32 %v3651_v38, %v1626_v36  ;;  %v5030_v28 = vrot.slane %v451_v60, %v595_v13  ;;  %v2054_v30 = vsub.f32 %v5016_v16, %v1738_v22  ;;  %v1733_v31 = vpop.permute.xlu0 %1732 }
 0x19b   : > { %v3655_v45 = vpop.eup %3654  ;;  %3674 = vtanh.f32 %v1161_v34  ;;  %v1696_v54 = vadd.f32 %v3653_v41, %v1695_v39  ;;  %v2847_v33 = vunpack.c.0.s8 %v2846_v18  ;;  %v2055_v11 = vsub.f32 %v5020_v21, %v1738_v22 }
 0x19c   : > { %v3657_v49 = vpop.eup %3656  ;;  %3676 = vtanh.f32 %v1162_v37  ;;  %v2056_v36 = vsub.f32 %v5026_v7, %v1738_v22  ;;  %v2057_v38 = vsub.f32 %v5030_v28, %v1738_v22  ;;  %v5036_v39 = vpop.permute.xlu1 %1747 }
 0x19d   : > { %v3659_v53 = vpop.eup %3658  ;;  %3678 = vtanh.f32 %v1163_v40  ;;  %v5040_v44 = vsub.s32 %v2847_v33, %v4544_v2  ;;  %v2063_v2 = vsub.f32 %v5020_v21, %v5036_v39 }
 0x19e   : > { %v3661_v57 = vpop.eup %3660  ;;  %v1490_v59 = vadd.f32 %v3659_v53, %v1489_v42  ;;  %3680 = vtanh.f32 %v1164_v43  ;;  %v2050_v42 = vsub.f32 %v5016_v16, %v1733_v31 }
 0x19f   : > { %v3663_v63 = vpop.eup %3662  ;;  %v1559_v0 = vadd.f32 %v3661_v57, %v1558_v46  ;;  %3682 = vtanh.f32 %v1167_v47  ;;  %v2051_v46 = vsub.f32 %v5020_v21, %v1733_v31 }
 0x1a0   : > { %v3665_v3 = vpop.eup %3664  ;;  %v1628_v4 = vadd.f32 %v3663_v63, %v1627_v50  ;;  %3684 = vtanh.f32 %v1168_v51  ;;  %v1491_v14 = vadd.f32 %v3655_v45, %v1490_v59  ;;  %v2053_v50 = vsub.f32 %v5030_v28, %v1733_v31  ;;  %v1743_v51 = vpop.permute.xlu0 %1742 }
 0x1a1   : > { %v3667_v6 = vpop.eup %3666  ;;  %v1697_v8 = vadd.f32 %v3665_v3, %v1696_v54  ;;  %3686 = vtanh.f32 %v1173_v56  ;;  %v1560_v17 = vadd.f32 %v3657_v49, %v1559_v0  ;;  %v2052_v49 = vsub.f32 %v5026_v7, %v1733_v31  ;;  %v5055_v3 = vpop.permute.xlu1 %1757 }
 0x1a2   : > { %v3669_v12 = vpop.eup %3668  ;;  %3688 = vtanh.f32 %v1174_v55  ;;  %v1629_v24 = vadd.f32 %v3667_v6, %v1628_v4  ;;  %v2062_v54 = vsub.f32 %v5016_v16, %v5036_v39  ;;  %v2064_v59 = vsub.f32 %v5026_v7, %v5036_v39 }
 0x1a3   : > { %v3671_v15 = vpop.eup %3670  ;;  %3690 = vtanh.f32 %v1169_v58  ;;  %v1698_v27 = vadd.f32 %v3669_v12, %v1697_v8  ;;  %v2065_v55 = vsub.f32 %v5030_v28, %v5036_v39  ;;  %v2058_v0 = vsub.f32 %v5016_v16, %v1743_v51 }
 0x1a4   : > { %v3673_v20 = vpop.eup %3672  ;;  %3692 = vtanh.f32 %v1170_v5  ;;  %v2059_v58 = vsub.f32 %v5020_v21, %v1743_v51  ;;  %v2060_v8 = vsub.f32 %v5026_v7, %v1743_v51  ;;  %v2070_v19 = vsub.f32 %v5016_v16, %v5055_v3 }
 0x1a5   : > { %v3675_v26 = vpop.eup %3674  ;;  %3694 = vtanh.f32 %v1171_v9 }
 0x1a6   : > { %v3677_v10 = vpop.eup %3676  ;;  %v1492_v29 = vadd.f32 %v3675_v26, %v1491_v14  ;;  %3696 = vtanh.f32 %v1172_v1  ;;  %v2061_v14 = vsub.f32 %v5030_v28, %v1743_v51 }
 0x1a7   : > { %v3679_v32 = vpop.eup %3678  ;;  %v1561_v23 = vadd.f32 %v3677_v10, %v1560_v17  ;;  %3698 = vtanh.f32 %v1175_v62  ;;  %v2072_v10 = vsub.f32 %v5026_v7, %v5055_v3 }
 0x1a8   : > { %v3681_v34 = vpop.eup %3680  ;;  %v1630_v35 = vadd.f32 %v3679_v32, %v1629_v24  ;;  %3700 = vtanh.f32 %v1176_v25  ;;  %v1493_v41 = vadd.f32 %v3671_v15, %v1492_v29  ;;  %v1753_v24 = vpop.permute.xlu0 %1752  ;;  %v2073_v32 = vsub.f32 %v5030_v28, %v5055_v3 }
 0x1a9   : > { %v3683_v37 = vpop.eup %3682  ;;  %v1699_v13 = vadd.f32 %v3681_v34, %v1698_v27  ;;  %3702 = vtanh.f32 %v2054_v30  ;;  %v1562_v45 = vadd.f32 %v3673_v20, %v1561_v23  ;;  %v2071_v20 = vsub.f32 %v5020_v21, %v5055_v3 }
 0x1aa   : > { %v3685_v40 = vpop.eup %3684  ;;  %3704 = vtanh.f32 %v2055_v11  ;;  %v1631_v48 = vadd.f32 %v3683_v37, %v1630_v35  ;;  %v2066_v34 = vsub.f32 %v5016_v16, %v1753_v24 }
 0x1ab   : > { %v3687_v43 = vpop.eup %3686  ;;  %3706 = vtanh.f32 %v2056_v36  ;;  %v1700_v53 = vadd.f32 %v3685_v40, %v1699_v13  ;;  %v2067_v13 = vsub.f32 %v5020_v21, %v1753_v24 }
 0x1ac   : > { %v3689_v47 = vpop.eup %3688  ;;  %3708 = vtanh.f32 %v2057_v38  ;;  %v5069_v38 = vpop.permute.xlu1 %1767 }
 0x1ad   : > { %v3691_v52 = vpop.eup %3690  ;;  %3710 = vtanh.f32 %v2050_v42  ;;  %v2068_v42 = vsub.f32 %v5026_v7, %v1753_v24 }
 0x1ae   : > { %v3693_v56 = vpop.eup %3692  ;;  %v1494_v57 = vadd.f32 %v3691_v52, %v1493_v41  ;;  %3712 = vtanh.f32 %v2051_v46  ;;  %v2078_v52 = vsub.f32 %v5016_v16, %v5069_v38 }
 0x1af   : > { %v3695_v60 = vpop.eup %3694  ;;  %v1563_v63 = vadd.f32 %v3693_v56, %v1562_v45  ;;  %3714 = vtanh.f32 %v2052_v49  ;;  %v2079_v56 = vsub.f32 %v5020_v21, %v5069_v38 }
 0x1b0   : > { %v3697_v4 = vpop.eup %3696  ;;  %v1495_v5 = vadd.f32 %v3687_v43, %v1494_v57  ;;  %v1632_v6 = vadd.f32 %v3695_v60, %v1631_v48  ;;  %3716 = vtanh.f32 %v2053_v50  ;;  %v5073_v48 = vpop.permute.xlu0 %1762 }
 0x1b1   : > { %v3699_v62 = vpop.eup %3698  ;;  %v1564_v9 = vadd.f32 %v3689_v47, %v1563_v63  ;;  %v1701_v12 = vadd.f32 %v3697_v4, %v1700_v53  ;;  %3718 = vtanh.f32 %v2062_v54  ;;  %v2069_v47 = vsub.f32 %v5030_v28, %v1753_v24 }
 0x1b2   : > { %v3701_v1 = vpop.eup %3700  ;;  %v1496_v15 = vrot.slane %v1495_v5, 4  ;;  %v1633_v17 = vadd.f32 %v3699_v62, %v1632_v6  ;;  %3720 = vtanh.f32 %v2058_v0  ;;  %v2074_v60 = vsub.f32 %v5016_v16, %v5073_v48 }
 0x1b3   : > { %v1565_v18 = vrot.slane %v1564_v9, 4  ;;  %v1702_v22 = vadd.f32 %v3701_v1, %v1701_v12  ;;  %v3703_v25 = vpop.eup %3702  ;;  %3722 = vtanh.f32 %v2059_v58  ;;  %v2076_v3 = vsub.f32 %v5026_v7, %v5073_v48 }
 0x1b4   : > { %v1497_v26 = vadd.f32 %v1496_v15, %v1495_v5  ;;  %v1634_v27 = vrot.slane %v1633_v17, 4  ;;  %v3705_v29 = vpop.eup %3704  ;;  %3724 = vtanh.f32 %v2060_v8 }
 0x1b5   : > { %v1566_v30 = vadd.f32 %v1565_v18, %v1564_v9  ;;  %v1703_v31 = vrot.slane %v1702_v22, 4  ;;  %v3707_v23 = vpop.eup %3706  ;;  %3726 = vtanh.f32 %v2061_v14  ;;  %v2075_v18 = vsub.f32 %v5020_v21, %v5073_v48 }
 0x1b6   : > { %v1498_v33 = vrot.slane %v1497_v26, 2  ;;  %v1635_v11 = vadd.f32 %v1634_v27, %v1633_v17  ;;  %v3709_v35 = vpop.eup %3708  ;;  %3728 = vtanh.f32 %v2063_v2 }
 0x1b7   : > { %v1567_v36 = vrot.slane %v1566_v30, 2  ;;  %v1704_v37 = vadd.f32 %v1703_v31, %v1702_v22  ;;  %v3711_v39 = vpop.eup %3710  ;;  %3730 = vtanh.f32 %v2064_v59  ;;  %v2077_v31 = vsub.f32 %v5030_v28, %v5073_v48 }
 0x1b8   : > { %v1499_v40 = vadd.f32 %v1498_v33, %v1497_v26  ;;  %v1636_v41 = vrot.slane %v1635_v11, 2  ;;  %v3713_v43 = vpop.eup %3712  ;;  %3732 = vtanh.f32 %v2065_v55  ;;  %v2562_v4 = vadd.f32 %v3711_v39, %v3703_v25 }
 0x1b9   : > { %v1568_v45 = vadd.f32 %v1567_v36, %v1566_v30  ;;  %v1705_v46 = vrot.slane %v1704_v37, 2  ;;  %v3715_v49 = vpop.eup %3714  ;;  %3734 = vtanh.f32 %v2070_v19  ;;  %v2631_v8 = vadd.f32 %v3713_v43, %v3705_v29 }
 0x1ba   : > { %v1500_v50 = vrot.slane %v1499_v40, 1  ;;  %v1637_v51 = vadd.f32 %v1636_v41, %v1635_v11  ;;  %v3717_v53 = vpop.eup %3716  ;;  %3736 = vtanh.f32 %v2066_v34  ;;  %v2700_v62 = vadd.f32 %v3715_v49, %v3707_v23  ;;  %v5092_v23 = vpop.permute.xlu1 %1777 }
 0x1bb   : > { %v1569_v54 = vrot.slane %v1568_v45, 1  ;;  %v1706_v2 = vadd.f32 %v1705_v46, %v1704_v37  ;;  %v3719_v57 = vpop.eup %3718  ;;  %3738 = vtanh.f32 %v2067_v13  ;;  %v2769_v17 = vadd.f32 %v3717_v53, %v3709_v35  ;;  %v1773_v13 = vpop.permute.xlu0 %1772 }
 0x1bc   : > { %v1501_v59 = vadd.f32 %v1500_v50, %v1499_v40  ;;  %v1638_v55 = vrot.slane %v1637_v51, 1  ;;  %v3721_v63 = vpop.eup %3720  ;;  %3740 = vtanh.f32 %v2068_v42  ;;  %v2081_v37 = vsub.f32 %v5030_v28, %v5069_v38  ;;  %v2838_v40 = vld [vmem:[%s4472_s15] sm:$0xf] }
 0x1bd   : > { %v1570_v0 = vadd.f32 %v1569_v54, %v1568_v45  ;;  %v1707_v58 = vrot.slane %v1706_v2, 1  ;;  %v3723_v5 = vpop.eup %3722  ;;  %3742 = vtanh.f32 %v2069_v47  ;;  %v2563_v1 = vadd.f32 %v3721_v63, %v2562_v4 }
 0x1be   : > { %v1639_v6 = vadd.f32 %v1638_v55, %v1637_v51  ;;  %v3725_v9 = vpop.eup %3724  ;;  %3744 = vtanh.f32 %v2071_v20  ;;  %v2632_v19 = vadd.f32 %v3723_v5, %v2631_v8  ;;  %v2086_v42 = vsub.f32 %v5016_v16, %v5092_v23 }
 0x1bf   : > { %v1708_v12 = vadd.f32 %v1707_v58, %v1706_v2  ;;  %v2843_v14 = vcombine.low %v1501_v59, %v1570_v0  ;;  %v3727_v15 = vpop.eup %3726  ;;  %3746 = vtanh.f32 %v2072_v10  ;;  %v2701_v26 = vadd.f32 %v3725_v9, %v2700_v62  ;;  %v1783_v8 = vpop.permute.xlu0 %1782 }
 0x1c0   : > { %v3729_v22 = vpop.eup %3728  ;;  %3748 = vtanh.f32 %v2073_v32  ;;  %v2770_v29 = vadd.f32 %v3727_v15, %v2769_v17  ;;  %v2564_v10 = vadd.f32 %v3719_v57, %v2563_v1  ;;  %v2080_v32 = vsub.f32 %v5026_v7, %v5069_v38 }
 0x1c1   : > { %v2844_v24 = vcombine.low %v1639_v6, %v1708_v12  ;;  %v2851_v25 = vrot.slane %v2843_v14, %v5040_v44  ;;  %v3731_v27 = vpop.eup %3730  ;;  %3750 = vtanh.f32 %v2078_v52  ;;  %v2633_v11 = vadd.f32 %v3729_v22, %v2632_v19 }
 0x1c2   : > { %v3733_v20 = vpop.eup %3732  ;;  %3752 = vtanh.f32 %v2079_v56  ;;  %v2702_v36 = vadd.f32 %v3731_v27, %v2701_v26  ;;  %v2087_v47 = vsub.f32 %v5020_v21, %v5092_v23  ;;  %v2082_v50 = vsub.f32 %v5016_v16, %v1773_v13 }
 0x1c3   : > { %v2858_v30 = vrot.slane %v2844_v24, %v5040_v44  ;;  %v3735_v33 = vpop.eup %3734  ;;  %3754 = vtanh.f32 %v2074_v60  ;;  %v2771_v41 = vadd.f32 %v3733_v20, %v2770_v29  ;;  %v2083_v54 = vsub.f32 %v5020_v21, %v1773_v13  ;;  %v1788_v60 = vpop.permute.xlu1 %1787 }
 0x1c4   : > { %v3737_v34 = vpop.eup %3736  ;;  %3756 = vtanh.f32 %v2075_v18  ;;  %v2084_v57 = vsub.f32 %v5026_v7, %v1773_v13  ;;  %v2085_v55 = vsub.f32 %v5030_v28, %v1773_v13  ;;  %v2088_v58 = vsub.f32 %v5026_v7, %v5092_v23 }
 0x1c5   : > { %v2859_v35 = vcombine.low %v2851_v25, %v2858_v30  ;;  %v3739_v39 = vpop.eup %3738  ;;  %3758 = vtanh.f32 %v2076_v3  ;;  %v2565_v46 = vadd.f32 %v3737_v34, %v2564_v10  ;;  %v2089_v6 = vsub.f32 %v5030_v28, %v5092_v23 }
 0x1c6   : > { %v3741_v43 = vpop.eup %3740  ;;  %3760 = vtanh.f32 %v2077_v31  ;;  %v2634_v49 = vadd.f32 %v3739_v39, %v2633_v11  ;;  %v2094_v12 = vsub.f32 %v5016_v16, %v1788_v60  ;;  %v2095_v15 = vsub.f32 %v5020_v21, %v1788_v60 }
 0x1c7   : > { %v2866_v45 = vrot.slane %v2859_v35, %v5040_v44  ;;  %v3743_v48 = vpop.eup %3742  ;;  %3762 = vtanh.f32 %v2080_v32  ;;  %v2703_v53 = vadd.f32 %v3741_v43, %v2702_v36  ;;  %v2566_v61 = vadd.f32 %v3735_v33, %v2565_v46  ;;  %v1798_v10 = vpop.permute.xlu1 %1797 }
 0x1c8   : > { %v3745_v51 = vpop.eup %3744  ;;  %3764 = vtanh.f32 %v2081_v37  ;;  %v2772_v56 = vadd.f32 %v3743_v48, %v2771_v41  ;;  %v2090_v18 = vsub.f32 %v5016_v16, %v1783_v8  ;;  %v2091_v25 = vsub.f32 %v5020_v21, %v1783_v8  ;;  %v1793_v35 = vpop.permute.xlu0 %1792 }
 0x1c9   : > { %v2868_v52 = vadd.f32 %v2866_v45, %v2838_v40  ;;  %v3747_v2 = vpop.eup %3746  ;;  %3766 = vtanh.f32 %v2086_v42  ;;  %v2635_v0 = vadd.f32 %v3745_v51, %v2634_v49  ;;  %v2092_v29 = vsub.f32 %v5026_v7, %v1783_v8 }
 0x1ca   : > { %v3749_v59 = vpop.eup %3748  ;;  %3768 = vtanh.f32 %v2087_v47  ;;  %v2704_v5 = vadd.f32 %v3747_v2, %v2703_v53  ;;  %v2093_v30 = vsub.f32 %v5030_v28, %v1783_v8  ;;  %v2096_v33 = vsub.f32 %v5026_v7, %v1788_v60 }
 0x1cb   : > { %2873 = vst.msk [vmem:[%s4472_s15] sm:$0xf] %vm5105_vm1, %v2868_v52  ;;  %v3751_v63 = vpop.eup %3750  ;;  %3770 = vtanh.f32 %v2082_v50  ;;  %v2773_v9 = vadd.f32 %v3749_v59, %v2772_v56  ;;  %v2097_v34 = vsub.f32 %v5030_v28, %v1788_v60  ;;  %v2102_v13 = vsub.f32 %v5016_v16, %v1798_v10  ;;  %v1808_v2 = vpop.permute.xlu1 %1807 }
 0x1cc   : > { %v3753_v4 = vpop.eup %3752  ;;  %3772 = vtanh.f32 %v2083_v54  ;;  %v2103_v41 = vsub.f32 %v5020_v21, %v1798_v10  ;;  %v2098_v45 = vsub.f32 %v5016_v16, %v1793_v35  ;;  %v2099_v48 = vsub.f32 %v5020_v21, %v1793_v35 }
 0x1cd   : > { %v3755_v62 = vpop.eup %3754  ;;  %3774 = vtanh.f32 %v2084_v57  ;;  %v2100_v51 = vsub.f32 %v5026_v7, %v1793_v35  ;;  %v2101_v54 = vsub.f32 %v5030_v28, %v1793_v35  ;;  %v2104_v59 = vsub.f32 %v5026_v7, %v1798_v10 }
 0x1ce   : > { %v3757_v14 = vpop.eup %3756  ;;  %v2567_v1 = vadd.f32 %v3755_v62, %v2566_v61  ;;  %3776 = vtanh.f32 %v2085_v55  ;;  %v2105_v60 = vsub.f32 %v5030_v28, %v1798_v10  ;;  %v2111_v8 = vsub.f32 %v5020_v21, %v1808_v2 }
 0x1cf   : > { %v3759_v17 = vpop.eup %3758  ;;  %v2636_v19 = vadd.f32 %v3757_v14, %v2635_v0  ;;  %3778 = vtanh.f32 %v2088_v58  ;;  %v2113_v10 = vsub.f32 %v5030_v28, %v1808_v2 }
 0x1d0   : > { %v3761_v22 = vpop.eup %3760  ;;  %v2705_v24 = vadd.f32 %v3759_v17, %v2704_v5  ;;  %3780 = vtanh.f32 %v2089_v6  ;;  %v2568_v20 = vadd.f32 %v3751_v63, %v2567_v1  ;;  %v1803_v63 = vpop.permute.xlu0 %1802 }
 0x1d1   : > { %v3763_v26 = vpop.eup %3762  ;;  %v2774_v27 = vadd.f32 %v3761_v22, %v2773_v9  ;;  %3782 = vtanh.f32 %v2094_v12  ;;  %v2637_v23 = vadd.f32 %v3753_v4, %v2636_v19  ;;  %v2110_v4 = vsub.f32 %v5016_v16, %v1808_v2 }
 0x1d2   : > { %v3765_v3 = vpop.eup %3764  ;;  %3784 = vtanh.f32 %v2095_v15  ;;  %v2706_v32 = vadd.f32 %v3763_v26, %v2705_v24  ;;  %v2106_v12 = vsub.f32 %v5016_v16, %v1803_v63  ;;  %v2107_v15 = vsub.f32 %v5020_v21, %v1803_v63  ;;  %v1818_v26 = vpop.permute.xlu1 %1817 }
 0x1d3   : > { %v3767_v31 = vpop.eup %3766  ;;  %3786 = vtanh.f32 %v2090_v18  ;;  %v2775_v37 = vadd.f32 %v3765_v3, %v2774_v27  ;;  %v2108_v18 = vsub.f32 %v5026_v7, %v1803_v63  ;;  %v2112_v3 = vsub.f32 %v5026_v7, %v1808_v2 }
 0x1d4   : > { %v3769_v11 = vpop.eup %3768  ;;  %3788 = vtanh.f32 %v2091_v25  ;;  %v2109_v25 = vsub.f32 %v5030_v28, %v1803_v63  ;;  %v2119_v35 = vsub.f32 %v5020_v21, %v1818_v26  ;;  %v2121_v2 = vsub.f32 %v5030_v28, %v1818_v26 }
 0x1d5   : > { %v3771_v36 = vpop.eup %3770  ;;  %3790 = vtanh.f32 %v2092_v29 }
 0x1d6   : > { %v3773_v39 = vpop.eup %3772  ;;  %v2569_v40 = vadd.f32 %v3771_v36, %v2568_v20  ;;  %3792 = vtanh.f32 %v2093_v30 }
 0x1d7   : > { %v3775_v42 = vpop.eup %3774  ;;  %v2638_v43 = vadd.f32 %v3773_v39, %v2637_v23  ;;  %3794 = vtanh.f32 %v2096_v33 }
 0x1d8   : > { %v3777_v46 = vpop.eup %3776  ;;  %v2707_v47 = vadd.f32 %v3775_v42, %v2706_v32  ;;  %3796 = vtanh.f32 %v2097_v34  ;;  %v2570_v53 = vadd.f32 %v3767_v31, %v2569_v40  ;;  %v1813_v31 = vpop.permute.xlu0 %1812 }
 0x1d9   : > { %v3779_v49 = vpop.eup %3778  ;;  %v2776_v50 = vadd.f32 %v3777_v46, %v2775_v37  ;;  %3798 = vtanh.f32 %v2102_v13  ;;  %v2639_v57 = vadd.f32 %v3769_v11, %v2638_v43  ;;  %v2118_v11 = vsub.f32 %v5016_v16, %v1818_v26 }
 0x1da   : > { %v3781_v52 = vpop.eup %3780  ;;  %3800 = vtanh.f32 %v2103_v41  ;;  %v2708_v55 = vadd.f32 %v3779_v49, %v2707_v47  ;;  %v2114_v13 = vsub.f32 %v5016_v16, %v1813_v31  ;;  %v2115_v41 = vsub.f32 %v5020_v21, %v1813_v31  ;;  %v1828_v49 = vpop.permute.xlu1 %1827 }
 0x1db   : > { %v3783_v56 = vpop.eup %3782  ;;  %3802 = vtanh.f32 %v2098_v45  ;;  %v2777_v58 = vadd.f32 %v3781_v52, %v2776_v50  ;;  %v2116_v45 = vsub.f32 %v5026_v7, %v1813_v31  ;;  %v2120_v52 = vsub.f32 %v5026_v7, %v1818_v26 }
 0x1dc   : > { %v3785_v61 = vpop.eup %3784  ;;  %3804 = vtanh.f32 %v2099_v48  ;;  %v2117_v48 = vsub.f32 %v5030_v28, %v1813_v31  ;;  %v2127_v63 = vsub.f32 %v5020_v21, %v1828_v49  ;;  %v2129_v26 = vsub.f32 %v5030_v28, %v1828_v49 }
 0x1dd   : > { %v3787_v0 = vpop.eup %3786  ;;  %3806 = vtanh.f32 %v2100_v51 }
 0x1de   : > { %v3789_v5 = vpop.eup %3788  ;;  %v2571_v6 = vadd.f32 %v3787_v0, %v2570_v53  ;;  %3808 = vtanh.f32 %v2101_v54 }
 0x1df   : > { %v3791_v62 = vpop.eup %3790  ;;  %v2640_v9 = vadd.f32 %v3789_v5, %v2639_v57  ;;  %3810 = vtanh.f32 %v2104_v59 }
 0x1e0   : > { %v3793_v14 = vpop.eup %3792  ;;  %v2709_v1 = vadd.f32 %v3791_v62, %v2708_v55  ;;  %3812 = vtanh.f32 %v2105_v60  ;;  %v2572_v24 = vadd.f32 %v3783_v56, %v2571_v6  ;;  %v1823_v56 = vpop.permute.xlu0 %1822 }
 0x1e1   : > { %v3795_v17 = vpop.eup %3794  ;;  %v2778_v19 = vadd.f32 %v3793_v14, %v2777_v58  ;;  %3814 = vtanh.f32 %v2110_v4  ;;  %v2641_v29 = vadd.f32 %v3785_v61, %v2640_v9  ;;  %v2126_v61 = vsub.f32 %v5016_v16, %v1828_v49 }
 0x1e2   : > { %v3797_v22 = vpop.eup %3796  ;;  %3816 = vtanh.f32 %v2111_v8  ;;  %v2710_v30 = vadd.f32 %v3795_v17, %v2709_v1  ;;  %v2122_v4 = vsub.f32 %v5016_v16, %v1823_v56  ;;  %v2123_v8 = vsub.f32 %v5020_v21, %v1823_v56  ;;  %v1838_v17 = vpop.permute.xlu1 %1837 }
 0x1e3   : > { %v3799_v27 = vpop.eup %3798  ;;  %3818 = vtanh.f32 %v2106_v12  ;;  %v2779_v33 = vadd.f32 %v3797_v22, %v2778_v19  ;;  %v2124_v12 = vsub.f32 %v5026_v7, %v1823_v56  ;;  %v2128_v22 = vsub.f32 %v5026_v7, %v1828_v49 }
 0x1e4   : > { %v3801_v20 = vpop.eup %3800  ;;  %3820 = vtanh.f32 %v2107_v15  ;;  %v2125_v15 = vsub.f32 %v5030_v28, %v1823_v56  ;;  %v2135_v31 = vsub.f32 %v5020_v21, %v1838_v17  ;;  %v2137_v49 = vsub.f32 %v5030_v28, %v1838_v17 }
 0x1e5   : > { %v3803_v23 = vpop.eup %3802  ;;  %3822 = vtanh.f32 %v2108_v18 }
 0x1e6   : > { %v3805_v32 = vpop.eup %3804  ;;  %v2573_v34 = vadd.f32 %v3803_v23, %v2572_v24  ;;  %3824 = vtanh.f32 %v2109_v25 }
 0x1e7   : > { %v3807_v36 = vpop.eup %3806  ;;  %v2642_v37 = vadd.f32 %v3805_v32, %v2641_v29  ;;  %3826 = vtanh.f32 %v2112_v3 }
 0x1e8   : > { %v3809_v39 = vpop.eup %3808  ;;  %v2711_v40 = vadd.f32 %v3807_v36, %v2710_v30  ;;  %3828 = vtanh.f32 %v2113_v10  ;;  %v2574_v47 = vadd.f32 %v3799_v27, %v2573_v34  ;;  %v1833_v27 = vpop.permute.xlu0 %1832 }
 0x1e9   : > { %v3811_v42 = vpop.eup %3810  ;;  %v2780_v43 = vadd.f32 %v3809_v39, %v2779_v33  ;;  %3830 = vtanh.f32 %v2118_v11  ;;  %v2643_v51 = vadd.f32 %v3801_v20, %v2642_v37  ;;  %v2134_v20 = vsub.f32 %v5016_v16, %v1838_v17 }
 0x1ea   : > { %v3813_v46 = vpop.eup %3812  ;;  %3832 = vtanh.f32 %v2119_v35  ;;  %v2712_v54 = vadd.f32 %v3811_v42, %v2711_v40  ;;  %v2130_v11 = vsub.f32 %v5016_v16, %v1833_v27  ;;  %v2131_v35 = vsub.f32 %v5020_v21, %v1833_v27  ;;  %v1848_v42 = vpop.permute.xlu1 %1847 }
 0x1eb   : > { %v3815_v50 = vpop.eup %3814  ;;  %3834 = vtanh.f32 %v2114_v13  ;;  %v2781_v59 = vadd.f32 %v3813_v46, %v2780_v43  ;;  %v2132_v13 = vsub.f32 %v5026_v7, %v1833_v27  ;;  %v2136_v46 = vsub.f32 %v5026_v7, %v1838_v17 }
 0x1ec   : > { %v3817_v53 = vpop.eup %3816  ;;  %3836 = vtanh.f32 %v2115_v41  ;;  %v2133_v41 = vsub.f32 %v5030_v28, %v1833_v27  ;;  %v2143_v56 = vsub.f32 %v5020_v21, %v1848_v42  ;;  %v2145_v17 = vsub.f32 %v5030_v28, %v1848_v42 }
 0x1ed   : > { %v3819_v57 = vpop.eup %3818  ;;  %3838 = vtanh.f32 %v2116_v45 }
 0x1ee   : > { %v3821_v55 = vpop.eup %3820  ;;  %v2575_v60 = vadd.f32 %v3819_v57, %v2574_v47  ;;  %3840 = vtanh.f32 %v2117_v48 }
 0x1ef   : > { %v3823_v0 = vpop.eup %3822  ;;  %v2644_v58 = vadd.f32 %v3821_v55, %v2643_v51  ;;  %3842 = vtanh.f32 %v2120_v52 }
 0x1f0   : > { %v3825_v5 = vpop.eup %3824  ;;  %v2713_v6 = vadd.f32 %v3823_v0, %v2712_v54  ;;  %3844 = vtanh.f32 %v2121_v2  ;;  %v2576_v1 = vadd.f32 %v3815_v50, %v2575_v60  ;;  %v1843_v50 = vpop.permute.xlu0 %1842 }
 0x1f1   : > { %v3827_v62 = vpop.eup %3826  ;;  %v2782_v9 = vadd.f32 %v3825_v5, %v2781_v59  ;;  %3846 = vtanh.f32 %v2126_v61  ;;  %v2645_v18 = vadd.f32 %v3817_v53, %v2644_v58  ;;  %v2142_v53 = vsub.f32 %v5016_v16, %v1848_v42 }
 0x1f2   : > { %v3829_v14 = vpop.eup %3828  ;;  %3848 = vtanh.f32 %v2127_v63  ;;  %v2714_v25 = vadd.f32 %v3827_v62, %v2713_v6  ;;  %v2138_v61 = vsub.f32 %v5016_v16, %v1843_v50  ;;  %v2139_v63 = vsub.f32 %v5020_v21, %v1843_v50  ;;  %v1858_v62 = vpop.permute.xlu1 %1857 }
 0x1f3   : > { %v3831_v19 = vpop.eup %3830  ;;  %3850 = vtanh.f32 %v2122_v4  ;;  %v2783_v3 = vadd.f32 %v3829_v14, %v2782_v9  ;;  %v2140_v4 = vsub.f32 %v5026_v7, %v1843_v50  ;;  %v2144_v14 = vsub.f32 %v5026_v7, %v1848_v42 }
 0x1f4   : > { %v3833_v24 = vpop.eup %3832  ;;  %3852 = vtanh.f32 %v2123_v8  ;;  %v2141_v8 = vsub.f32 %v5030_v28, %v1843_v50  ;;  %v2151_v27 = vsub.f32 %v5020_v21, %v1858_v62  ;;  %v2153_v42 = vsub.f32 %v5030_v28, %v1858_v62 }
 0x1f5   : > { %v3835_v29 = vpop.eup %3834  ;;  %3854 = vtanh.f32 %v2124_v12 }
 0x1f6   : > { %v3837_v30 = vpop.eup %3836  ;;  %v2577_v10 = vadd.f32 %v3835_v29, %v2576_v1  ;;  %3856 = vtanh.f32 %v2125_v15 }
 0x1f7   : > { %v3839_v23 = vpop.eup %3838  ;;  %v2646_v33 = vadd.f32 %v3837_v30, %v2645_v18  ;;  %3858 = vtanh.f32 %v2128_v22 }
 0x1f8   : > { %v3841_v32 = vpop.eup %3840  ;;  %v2715_v34 = vadd.f32 %v3839_v23, %v2714_v25  ;;  %3860 = vtanh.f32 %v2129_v26  ;;  %v2578_v40 = vadd.f32 %v3831_v19, %v2577_v10  ;;  %v1853_v19 = vpop.permute.xlu0 %1852 }
 0x1f9   : > { %v3843_v36 = vpop.eup %3842  ;;  %v2784_v37 = vadd.f32 %v3841_v32, %v2783_v3  ;;  %3862 = vtanh.f32 %v2134_v20  ;;  %v2647_v45 = vadd.f32 %v3833_v24, %v2646_v33  ;;  %v2150_v24 = vsub.f32 %v5016_v16, %v1858_v62 }
 0x1fa   : > { %v3845_v39 = vpop.eup %3844  ;;  %3864 = vtanh.f32 %v2135_v31  ;;  %v2716_v48 = vadd.f32 %v3843_v36, %v2715_v34  ;;  %v2146_v20 = vsub.f32 %v5016_v16, %v1853_v19  ;;  %v2147_v31 = vsub.f32 %v5020_v21, %v1853_v19  ;;  %v1868_v36 = vpop.permute.xlu1 %1867 }
 0x1fb   : > { %v3847_v43 = vpop.eup %3846  ;;  %3866 = vtanh.f32 %v2130_v11  ;;  %v2785_v52 = vadd.f32 %v3845_v39, %v2784_v37  ;;  %v2148_v11 = vsub.f32 %v5026_v7, %v1853_v19  ;;  %v2152_v39 = vsub.f32 %v5026_v7, %v1858_v62 }
 0x1fc   : > { %v3849_v47 = vpop.eup %3848  ;;  %3868 = vtanh.f32 %v2131_v35  ;;  %v2149_v35 = vsub.f32 %v5030_v28, %v1853_v19  ;;  %v2159_v50 = vsub.f32 %v5020_v21, %v1868_v36  ;;  %v2161_v62 = vsub.f32 %v5030_v28, %v1868_v36 }
 0x1fd   : > { %v3851_v51 = vpop.eup %3850  ;;  %3870 = vtanh.f32 %v2132_v13 }
 0x1fe   : > { %v3853_v54 = vpop.eup %3852  ;;  %v2579_v2 = vadd.f32 %v3851_v51, %v2578_v40  ;;  %3872 = vtanh.f32 %v2133_v41 }
 0x1ff   : > { %v3855_v57 = vpop.eup %3854  ;;  %v2648_v59 = vadd.f32 %v3853_v54, %v2647_v45  ;;  %3874 = vtanh.f32 %v2136_v46 }
 0x200   : > { %v3857_v55 = vpop.eup %3856  ;;  %v2717_v60 = vadd.f32 %v3855_v57, %v2716_v48  ;;  %3876 = vtanh.f32 %v2137_v49  ;;  %v2580_v6 = vadd.f32 %v3847_v43, %v2579_v2  ;;  %v1863_v43 = vpop.permute.xlu0 %1862 }
 0x201   : > { %v3859_v0 = vpop.eup %3858  ;;  %v2786_v58 = vadd.f32 %v3857_v55, %v2785_v52  ;;  %3878 = vtanh.f32 %v2142_v53  ;;  %v2649_v12 = vadd.f32 %v3849_v47, %v2648_v59  ;;  %v2158_v47 = vsub.f32 %v5016_v16, %v1868_v36 }
 0x202   : > { %v3861_v5 = vpop.eup %3860  ;;  %3880 = vtanh.f32 %v2143_v56  ;;  %v2718_v15 = vadd.f32 %v3859_v0, %v2717_v60  ;;  %v2154_v53 = vsub.f32 %v5016_v16, %v1863_v43  ;;  %v2155_v56 = vsub.f32 %v5020_v21, %v1863_v43  ;;  %v1878_v0 = vpop.permute.xlu1 %1877 }
 0x203   : > { %v3863_v9 = vpop.eup %3862  ;;  %3882 = vtanh.f32 %v2138_v61  ;;  %v2787_v22 = vadd.f32 %v3861_v5, %v2786_v58  ;;  %v2156_v61 = vsub.f32 %v5026_v7, %v1863_v43  ;;  %v2160_v5 = vsub.f32 %v5026_v7, %v1868_v36 }
 0x204   : > { %v3865_v1 = vpop.eup %3864  ;;  %3884 = vtanh.f32 %v2139_v63  ;;  %v2157_v63 = vsub.f32 %v5030_v28, %v1863_v43  ;;  %v2167_v19 = vsub.f32 %v5020_v21, %v1878_v0  ;;  %v2169_v36 = vsub.f32 %v5030_v28, %v1878_v0 }
 0x205   : > { %v3867_v18 = vpop.eup %3866  ;;  %3886 = vtanh.f32 %v2140_v4 }
 0x206   : > { %v3869_v25 = vpop.eup %3868  ;;  %v2581_v26 = vadd.f32 %v3867_v18, %v2580_v6  ;;  %3888 = vtanh.f32 %v2141_v8 }
 0x207   : > { %v3871_v29 = vpop.eup %3870  ;;  %v2650_v3 = vadd.f32 %v3869_v25, %v2649_v12  ;;  %3890 = vtanh.f32 %v2144_v14 }
 0x208   : > { %v3873_v30 = vpop.eup %3872  ;;  %v2719_v10 = vadd.f32 %v3871_v29, %v2718_v15  ;;  %3892 = vtanh.f32 %v2145_v17  ;;  %v2582_v34 = vadd.f32 %v3863_v9, %v2581_v26  ;;  %v1873_v9 = vpop.permute.xlu0 %1872 }
 0x209   : > { %v3875_v23 = vpop.eup %3874  ;;  %v2788_v33 = vadd.f32 %v3873_v30, %v2787_v22  ;;  %3894 = vtanh.f32 %v2150_v24  ;;  %v2651_v13 = vadd.f32 %v3865_v1, %v2650_v3  ;;  %v2166_v1 = vsub.f32 %v5016_v16, %v1878_v0 }
 0x20a   : > { %v3877_v32 = vpop.eup %3876  ;;  %3896 = vtanh.f32 %v2151_v27  ;;  %v2720_v41 = vadd.f32 %v3875_v23, %v2719_v10  ;;  %v2162_v24 = vsub.f32 %v5016_v16, %v1873_v9  ;;  %v2163_v27 = vsub.f32 %v5020_v21, %v1873_v9  ;;  %v1888_v23 = vpop.permute.xlu1 %1887 }
 0x20b   : > { %v3879_v37 = vpop.eup %3878  ;;  %3898 = vtanh.f32 %v2146_v20  ;;  %v2789_v46 = vadd.f32 %v3877_v32, %v2788_v33  ;;  %v2164_v20 = vsub.f32 %v5026_v7, %v1873_v9  ;;  %v2168_v32 = vsub.f32 %v5026_v7, %v1878_v0 }
 0x20c   : > { %v3881_v40 = vpop.eup %3880  ;;  %3900 = vtanh.f32 %v2147_v31  ;;  %v2165_v31 = vsub.f32 %v5030_v28, %v1873_v9  ;;  %v2175_v43 = vsub.f32 %v5020_v21, %v1888_v23  ;;  %v2177_v0 = vsub.f32 %v5030_v28, %v1888_v23 }
 0x20d   : > { %v3883_v45 = vpop.eup %3882  ;;  %3902 = vtanh.f32 %v2148_v11 }
 0x20e   : > { %v3885_v48 = vpop.eup %3884  ;;  %v2583_v49 = vadd.f32 %v3883_v45, %v2582_v34  ;;  %3904 = vtanh.f32 %v2149_v35 }
 0x20f   : > { %v3887_v51 = vpop.eup %3886  ;;  %v2652_v52 = vadd.f32 %v3885_v48, %v2651_v13  ;;  %3906 = vtanh.f32 %v2152_v39 }
 0x210   : > { %v3889_v54 = vpop.eup %3888  ;;  %v2721_v2 = vadd.f32 %v3887_v51, %v2720_v41  ;;  %3908 = vtanh.f32 %v2153_v42  ;;  %v2584_v60 = vadd.f32 %v3879_v37, %v2583_v49  ;;  %v1883_v37 = vpop.permute.xlu0 %1882 }
 0x211   : > { %v3891_v57 = vpop.eup %3890  ;;  %v2790_v59 = vadd.f32 %v3889_v54, %v2789_v46  ;;  %3910 = vtanh.f32 %v2158_v47  ;;  %v2653_v4 = vadd.f32 %v3881_v40, %v2652_v52  ;;  %v2174_v40 = vsub.f32 %v5016_v16, %v1888_v23 }
 0x212   : > { %v3893_v55 = vpop.eup %3892  ;;  %3912 = vtanh.f32 %v2159_v50  ;;  %v2722_v8 = vadd.f32 %v3891_v57, %v2721_v2  ;;  %v2170_v47 = vsub.f32 %v5016_v16, %v1883_v37  ;;  %v2171_v50 = vsub.f32 %v5020_v21, %v1883_v37  ;;  %v1898_v57 = vpop.permute.xlu1 %1897 }
 0x213   : > { %v3895_v58 = vpop.eup %3894  ;;  %3914 = vtanh.f32 %v2154_v53  ;;  %v2791_v14 = vadd.f32 %v3893_v55, %v2790_v59  ;;  %v2172_v53 = vsub.f32 %v5026_v7, %v1883_v37  ;;  %v2176_v55 = vsub.f32 %v5026_v7, %v1888_v23 }
 0x214   : > { %v3897_v6 = vpop.eup %3896  ;;  %3916 = vtanh.f32 %v2155_v56  ;;  %v2173_v56 = vsub.f32 %v5030_v28, %v1883_v37  ;;  %v2183_v9 = vsub.f32 %v5020_v21, %v1898_v57  ;;  %v2185_v23 = vsub.f32 %v5030_v28, %v1898_v57 }
 0x215   : > { %v3899_v12 = vpop.eup %3898  ;;  %3918 = vtanh.f32 %v2156_v61 }
 0x216   : > { %v3901_v15 = vpop.eup %3900  ;;  %v2585_v17 = vadd.f32 %v3899_v12, %v2584_v60  ;;  %3920 = vtanh.f32 %v2157_v63 }
 0x217   : > { %v3903_v18 = vpop.eup %3902  ;;  %v2654_v22 = vadd.f32 %v3901_v15, %v2653_v4  ;;  %3922 = vtanh.f32 %v2160_v5 }
 0x218   : > { %v3905_v25 = vpop.eup %3904  ;;  %v2723_v26 = vadd.f32 %v3903_v18, %v2722_v8  ;;  %3924 = vtanh.f32 %v2161_v62  ;;  %v2586_v10 = vadd.f32 %v3895_v58, %v2585_v17  ;;  %v1893_v58 = vpop.permute.xlu0 %1892 }
 0x219   : > { %v3907_v29 = vpop.eup %3906  ;;  %v2792_v3 = vadd.f32 %v3905_v25, %v2791_v14  ;;  %3926 = vtanh.f32 %v2166_v1  ;;  %v2655_v11 = vadd.f32 %v3897_v6, %v2654_v22  ;;  %v2182_v6 = vsub.f32 %v5016_v16, %v1898_v57 }
 0x21a   : > { %v3909_v30 = vpop.eup %3908  ;;  %3928 = vtanh.f32 %v2167_v19  ;;  %v2724_v35 = vadd.f32 %v3907_v29, %v2723_v26  ;;  %v2178_v1 = vsub.f32 %v5016_v16, %v1893_v58  ;;  %v2179_v19 = vsub.f32 %v5020_v21, %v1893_v58  ;;  %v1908_v29 = vpop.permute.xlu1 %1907 }
 0x21b   : > { %v3911_v33 = vpop.eup %3910  ;;  %3930 = vtanh.f32 %v2162_v24  ;;  %v2793_v39 = vadd.f32 %v3909_v30, %v2792_v3  ;;  %v2180_v24 = vsub.f32 %v5026_v7, %v1893_v58  ;;  %v2184_v30 = vsub.f32 %v5026_v7, %v1898_v57 }
 0x21c   : > { %v3913_v34 = vpop.eup %3912  ;;  %3932 = vtanh.f32 %v2163_v27  ;;  %v2181_v27 = vsub.f32 %v5030_v28, %v1893_v58  ;;  %v2191_v37 = vsub.f32 %v5020_v21, %v1908_v29  ;;  %v2193_v57 = vsub.f32 %v5030_v28, %v1908_v29 }
 0x21d   : > { %v3915_v13 = vpop.eup %3914  ;;  %3934 = vtanh.f32 %v2164_v20 }
 0x21e   : > { %v3917_v41 = vpop.eup %3916  ;;  %v2587_v42 = vadd.f32 %v3915_v13, %v2586_v10  ;;  %3936 = vtanh.f32 %v2165_v31 }
 0x21f   : > { %v3919_v45 = vpop.eup %3918  ;;  %v2656_v46 = vadd.f32 %v3917_v41, %v2655_v11  ;;  %3938 = vtanh.f32 %v2168_v32 }
 0x220   : > { %v3921_v48 = vpop.eup %3920  ;;  %v2725_v49 = vadd.f32 %v3919_v45, %v2724_v35  ;;  %3940 = vtanh.f32 %v2169_v36  ;;  %v2588_v2 = vadd.f32 %v3911_v33, %v2587_v42  ;;  %v1903_v33 = vpop.permute.xlu0 %1902 }
 0x221   : > { %v3923_v51 = vpop.eup %3922  ;;  %v2794_v52 = vadd.f32 %v3921_v48, %v2793_v39  ;;  %3942 = vtanh.f32 %v2174_v40  ;;  %v2657_v61 = vadd.f32 %v3913_v34, %v2656_v46  ;;  %v2190_v34 = vsub.f32 %v5016_v16, %v1908_v29 }
 0x222   : > { %v3925_v54 = vpop.eup %3924  ;;  %3944 = vtanh.f32 %v2175_v43  ;;  %v2726_v63 = vadd.f32 %v3923_v51, %v2725_v49  ;;  %v2186_v40 = vsub.f32 %v5016_v16, %v1903_v33  ;;  %v2187_v43 = vsub.f32 %v5020_v21, %v1903_v33  ;;  %v1918_v51 = vpop.permute.xlu1 %1917 }
 0x223   : > { %v3927_v59 = vpop.eup %3926  ;;  %3946 = vtanh.f32 %v2170_v47  ;;  %v2795_v5 = vadd.f32 %v3925_v54, %v2794_v52  ;;  %v2188_v47 = vsub.f32 %v5026_v7, %v1903_v33  ;;  %v2192_v54 = vsub.f32 %v5026_v7, %v1908_v29 }
 0x224   : > { %v3929_v60 = vpop.eup %3928  ;;  %3948 = vtanh.f32 %v2171_v50  ;;  %v2189_v50 = vsub.f32 %v5030_v28, %v1903_v33  ;;  %v2199_v58 = vsub.f32 %v5020_v21, %v1918_v51  ;;  %v2201_v29 = vsub.f32 %v5030_v28, %v1918_v51 }
 0x225   : > { %v3931_v4 = vpop.eup %3930  ;;  %3950 = vtanh.f32 %v2172_v53 }
 0x226   : > { %v3933_v8 = vpop.eup %3932  ;;  %v2589_v62 = vadd.f32 %v3931_v4, %v2588_v2  ;;  %3952 = vtanh.f32 %v2173_v56 }
 0x227   : > { %v3935_v12 = vpop.eup %3934  ;;  %v2658_v14 = vadd.f32 %v3933_v8, %v2657_v61  ;;  %3954 = vtanh.f32 %v2176_v55 }
 0x228   : > { %v3937_v15 = vpop.eup %3936  ;;  %v2727_v17 = vadd.f32 %v3935_v12, %v2726_v63  ;;  %3956 = vtanh.f32 %v2177_v0  ;;  %v2590_v26 = vadd.f32 %v3927_v59, %v2589_v62  ;;  %v1913_v59 = vpop.permute.xlu0 %1912 }
 0x229   : > { %v3939_v18 = vpop.eup %3938  ;;  %v2796_v22 = vadd.f32 %v3937_v15, %v2795_v5  ;;  %3958 = vtanh.f32 %v2182_v6  ;;  %v2659_v20 = vadd.f32 %v3929_v60, %v2658_v14  ;;  %v2198_v60 = vsub.f32 %v5016_v16, %v1918_v51 }
 0x22a   : > { %v3941_v25 = vpop.eup %3940  ;;  %3960 = vtanh.f32 %v2183_v9  ;;  %v2728_v31 = vadd.f32 %v3939_v18, %v2727_v17  ;;  %v2194_v6 = vsub.f32 %v5016_v16, %v1913_v59  ;;  %v2195_v9 = vsub.f32 %v5020_v21, %v1913_v59  ;;  %v1928_v18 = vpop.permute.xlu1 %1927 }
 0x22b   : > { %v3943_v3 = vpop.eup %3942  ;;  %3962 = vtanh.f32 %v2178_v1  ;;  %v2797_v32 = vadd.f32 %v3941_v25, %v2796_v22  ;;  %v2196_v1 = vsub.f32 %v5026_v7, %v1913_v59  ;;  %v2200_v25 = vsub.f32 %v5026_v7, %v1918_v51 }
 0x22c   : > { %v3945_v10 = vpop.eup %3944  ;;  %3964 = vtanh.f32 %v2179_v19  ;;  %v2197_v19 = vsub.f32 %v5030_v28, %v1913_v59  ;;  %v2207_v33 = vsub.f32 %v5020_v21, %v1928_v18  ;;  %v2209_v51 = vsub.f32 %v5030_v28, %v1928_v18 }
 0x22d   : > { %v3947_v11 = vpop.eup %3946  ;;  %3966 = vtanh.f32 %v2180_v24 }
 0x22e   : > { %v3949_v35 = vpop.eup %3948  ;;  %v2591_v36 = vadd.f32 %v3947_v11, %v2590_v26  ;;  %3968 = vtanh.f32 %v2181_v27 }
 0x22f   : > { %v3951_v13 = vpop.eup %3950  ;;  %v2660_v39 = vadd.f32 %v3949_v35, %v2659_v20  ;;  %3970 = vtanh.f32 %v2184_v30 }
 0x230   : > { %v3953_v41 = vpop.eup %3952  ;;  %v2729_v42 = vadd.f32 %v3951_v13, %v2728_v31  ;;  %3972 = vtanh.f32 %v2185_v23  ;;  %v2592_v49 = vadd.f32 %v3943_v3, %v2591_v36  ;;  %v1923_v3 = vpop.permute.xlu0 %1922 }
 0x231   : > { %v3955_v45 = vpop.eup %3954  ;;  %v2798_v46 = vadd.f32 %v3953_v41, %v2797_v32  ;;  %3974 = vtanh.f32 %v2190_v34  ;;  %v2661_v53 = vadd.f32 %v3945_v10, %v2660_v39  ;;  %v2206_v10 = vsub.f32 %v5016_v16, %v1928_v18 }
 0x232   : > { %v3957_v48 = vpop.eup %3956  ;;  %3976 = vtanh.f32 %v2191_v37  ;;  %v2730_v56 = vadd.f32 %v3955_v45, %v2729_v42  ;;  %v2202_v34 = vsub.f32 %v5016_v16, %v1923_v3  ;;  %v2203_v37 = vsub.f32 %v5020_v21, %v1923_v3  ;;  %v1938_v45 = vpop.permute.xlu1 %1937 }
 0x233   : > { %v3959_v52 = vpop.eup %3958  ;;  %3978 = vtanh.f32 %v2186_v40  ;;  %v2799_v55 = vadd.f32 %v3957_v48, %v2798_v46  ;;  %v2204_v40 = vsub.f32 %v5026_v7, %v1923_v3  ;;  %v2208_v48 = vsub.f32 %v5026_v7, %v1928_v18 }
 0x234   : > { %v3961_v2 = vpop.eup %3960  ;;  %3980 = vtanh.f32 %v2187_v43  ;;  %v2205_v43 = vsub.f32 %v5030_v28, %v1923_v3  ;;  %v2215_v59 = vsub.f32 %v5020_v21, %v1938_v45  ;;  %v2217_v18 = vsub.f32 %v5030_v28, %v1938_v45 }
 0x235   : > { %v3963_v61 = vpop.eup %3962  ;;  %3982 = vtanh.f32 %v2188_v47 }
 0x236   : > { %v3965_v63 = vpop.eup %3964  ;;  %v2593_v0 = vadd.f32 %v3963_v61, %v2592_v49  ;;  %3984 = vtanh.f32 %v2189_v50 }
 0x237   : > { %v3967_v4 = vpop.eup %3966  ;;  %v2662_v5 = vadd.f32 %v3965_v63, %v2661_v53  ;;  %3986 = vtanh.f32 %v2192_v54 }
 0x238   : > { %v3969_v8 = vpop.eup %3968  ;;  %v2731_v62 = vadd.f32 %v3967_v4, %v2730_v56  ;;  %3988 = vtanh.f32 %v2193_v57  ;;  %v2594_v17 = vadd.f32 %v3959_v52, %v2593_v0  ;;  %v1933_v52 = vpop.permute.xlu0 %1932 }
 0x239   : > { %v3971_v12 = vpop.eup %3970  ;;  %v2800_v14 = vadd.f32 %v3969_v8, %v2799_v55  ;;  %3990 = vtanh.f32 %v2198_v60  ;;  %v2663_v24 = vadd.f32 %v3961_v2, %v2662_v5  ;;  %v2214_v2 = vsub.f32 %v5016_v16, %v1938_v45 }
 0x23a   : > { %v3973_v15 = vpop.eup %3972  ;;  %3992 = vtanh.f32 %v2199_v58  ;;  %v2732_v27 = vadd.f32 %v3971_v12, %v2731_v62  ;;  %v2210_v60 = vsub.f32 %v5016_v16, %v1933_v52  ;;  %v2211_v58 = vsub.f32 %v5020_v21, %v1933_v52  ;;  %v1948_v12 = vpop.permute.xlu1 %1947 }
 0x23b   : > { %v3975_v22 = vpop.eup %3974  ;;  %3994 = vtanh.f32 %v2194_v6  ;;  %v2801_v30 = vadd.f32 %v3973_v15, %v2800_v14  ;;  %v2212_v6 = vsub.f32 %v5026_v7, %v1933_v52  ;;  %v2216_v15 = vsub.f32 %v5026_v7, %v1938_v45 }
 0x23c   : > { %v3977_v26 = vpop.eup %3976  ;;  %3996 = vtanh.f32 %v2195_v9  ;;  %v2213_v9 = vsub.f32 %v5030_v28, %v1933_v52  ;;  %v2223_v3 = vsub.f32 %v5020_v21, %v1948_v12  ;;  %v2225_v45 = vsub.f32 %v5030_v28, %v1948_v12 }
 0x23d   : > { %v3979_v20 = vpop.eup %3978  ;;  %3998 = vtanh.f32 %v2196_v1 }
 0x23e   : > { %v3981_v31 = vpop.eup %3980  ;;  %v2595_v23 = vadd.f32 %v3979_v20, %v2594_v17  ;;  %4000 = vtanh.f32 %v2197_v19 }
 0x23f   : > { %v3983_v11 = vpop.eup %3982  ;;  %v2664_v32 = vadd.f32 %v3981_v31, %v2663_v24  ;;  %4002 = vtanh.f32 %v2200_v25 }
 0x240   : > { %v3985_v35 = vpop.eup %3984  ;;  %v2733_v36 = vadd.f32 %v3983_v11, %v2732_v27  ;;  %4004 = vtanh.f32 %v2201_v29  ;;  %v2596_v42 = vadd.f32 %v3975_v22, %v2595_v23  ;;  %v1943_v22 = vpop.permute.xlu0 %1942 }
 0x241   : > { %v3987_v13 = vpop.eup %3986  ;;  %v2802_v39 = vadd.f32 %v3985_v35, %v2801_v30  ;;  %4006 = vtanh.f32 %v2206_v10  ;;  %v2665_v47 = vadd.f32 %v3977_v26, %v2664_v32  ;;  %v2222_v26 = vsub.f32 %v5016_v16, %v1948_v12 }
 0x242   : > { %v3989_v41 = vpop.eup %3988  ;;  %4008 = vtanh.f32 %v2207_v33  ;;  %v2734_v50 = vadd.f32 %v3987_v13, %v2733_v36  ;;  %v2218_v10 = vsub.f32 %v5016_v16, %v1943_v22  ;;  %v2219_v33 = vsub.f32 %v5020_v21, %v1943_v22  ;;  %v1958_v13 = vpop.permute.xlu1 %1957 }
 0x243   : > { %v3991_v46 = vpop.eup %3990  ;;  %4010 = vtanh.f32 %v2202_v34  ;;  %v2803_v54 = vadd.f32 %v3989_v41, %v2802_v39  ;;  %v2220_v34 = vsub.f32 %v5026_v7, %v1943_v22  ;;  %v2224_v41 = vsub.f32 %v5026_v7, %v1948_v12 }
 0x244   : > { %v3993_v49 = vpop.eup %3992  ;;  %4012 = vtanh.f32 %v2203_v37  ;;  %v2221_v37 = vsub.f32 %v5030_v28, %v1943_v22  ;;  %v2231_v52 = vsub.f32 %v5020_v21, %v1958_v13  ;;  %v2233_v12 = vsub.f32 %v5030_v28, %v1958_v13 }
 0x245   : > { %v3995_v53 = vpop.eup %3994  ;;  %4014 = vtanh.f32 %v2204_v40 }
 0x246   : > { %v3997_v56 = vpop.eup %3996  ;;  %v2597_v57 = vadd.f32 %v3995_v53, %v2596_v42  ;;  %4016 = vtanh.f32 %v2205_v43 }
 0x247   : > { %v3999_v61 = vpop.eup %3998  ;;  %v2666_v55 = vadd.f32 %v3997_v56, %v2665_v47  ;;  %4018 = vtanh.f32 %v2208_v48 }
 0x248   : > { %v4001_v63 = vpop.eup %4000  ;;  %v2735_v0 = vadd.f32 %v3999_v61, %v2734_v50  ;;  %4020 = vtanh.f32 %v2209_v51  ;;  %v2598_v62 = vadd.f32 %v3991_v46, %v2597_v57  ;;  %v1953_v46 = vpop.permute.xlu0 %1952 }
 0x249   : > { %v4003_v4 = vpop.eup %4002  ;;  %v2804_v5 = vadd.f32 %v4001_v63, %v2803_v54  ;;  %4022 = vtanh.f32 %v2214_v2  ;;  %v2667_v1 = vadd.f32 %v3993_v49, %v2666_v55  ;;  %v2230_v49 = vsub.f32 %v5016_v16, %v1958_v13 }
 0x24a   : > { %v4005_v8 = vpop.eup %4004  ;;  %4024 = vtanh.f32 %v2215_v59  ;;  %v2736_v19 = vadd.f32 %v4003_v4, %v2735_v0  ;;  %v2226_v2 = vsub.f32 %v5016_v16, %v1953_v46  ;;  %v2227_v59 = vsub.f32 %v5020_v21, %v1953_v46  ;;  %v1968_v4 = vpop.permute.xlu1 %1967 }
 0x24b   : > { %v4007_v14 = vpop.eup %4006  ;;  %4026 = vtanh.f32 %v2210_v60  ;;  %v2805_v25 = vadd.f32 %v4005_v8, %v2804_v5  ;;  %v2228_v60 = vsub.f32 %v5026_v7, %v1953_v46  ;;  %v2232_v8 = vsub.f32 %v5026_v7, %v1958_v13 }
 0x24c   : > { %v4009_v17 = vpop.eup %4008  ;;  %4028 = vtanh.f32 %v2211_v58  ;;  %v2229_v58 = vsub.f32 %v5030_v28, %v1953_v46  ;;  %v2239_v22 = vsub.f32 %v5020_v21, %v1968_v4  ;;  %v2241_v13 = vsub.f32 %v5030_v28, %v1968_v4 }
 0x24d   : > { %v4011_v24 = vpop.eup %4010  ;;  %4030 = vtanh.f32 %v2212_v6 }
 0x24e   : > { %v4013_v27 = vpop.eup %4012  ;;  %v2599_v29 = vadd.f32 %v4011_v24, %v2598_v62  ;;  %4032 = vtanh.f32 %v2213_v9 }
 0x24f   : > { %v4015_v20 = vpop.eup %4014  ;;  %v2668_v30 = vadd.f32 %v4013_v27, %v2667_v1  ;;  %4034 = vtanh.f32 %v2216_v15 }
 0x250   : > { %v4017_v31 = vpop.eup %4016  ;;  %v2737_v23 = vadd.f32 %v4015_v20, %v2736_v19  ;;  %4036 = vtanh.f32 %v2217_v18  ;;  %v2600_v36 = vadd.f32 %v4007_v14, %v2599_v29  ;;  %v1963_v14 = vpop.permute.xlu0 %1962 }
 0x251   : > { %v4019_v11 = vpop.eup %4018  ;;  %v2806_v32 = vadd.f32 %v4017_v31, %v2805_v25  ;;  %4038 = vtanh.f32 %v2222_v26  ;;  %v2669_v40 = vadd.f32 %v4009_v17, %v2668_v30  ;;  %v2238_v17 = vsub.f32 %v5016_v16, %v1968_v4 }
 0x252   : > { %v4021_v35 = vpop.eup %4020  ;;  %4040 = vtanh.f32 %v2223_v3  ;;  %v2738_v43 = vadd.f32 %v4019_v11, %v2737_v23  ;;  %v2234_v26 = vsub.f32 %v5016_v16, %v1963_v14  ;;  %v2235_v3 = vsub.f32 %v5020_v21, %v1963_v14  ;;  %v1978_v11 = vpop.permute.xlu1 %1977 }
 0x253   : > { %v4023_v39 = vpop.eup %4022  ;;  %4042 = vtanh.f32 %v2218_v10  ;;  %v2807_v48 = vadd.f32 %v4021_v35, %v2806_v32  ;;  %v2236_v10 = vsub.f32 %v5026_v7, %v1963_v14  ;;  %v2240_v35 = vsub.f32 %v5026_v7, %v1968_v4 }
 0x254   : > { %v4025_v42 = vpop.eup %4024  ;;  %4044 = vtanh.f32 %v2219_v33  ;;  %v2237_v33 = vsub.f32 %v5030_v28, %v1963_v14  ;;  %v2247_v46 = vsub.f32 %v5020_v21, %v1978_v11  ;;  %v2249_v4 = vsub.f32 %v5030_v28, %v1978_v11 }
 0x255   : > { %v4027_v47 = vpop.eup %4026  ;;  %4046 = vtanh.f32 %v2220_v34 }
 0x256   : > { %v4029_v50 = vpop.eup %4028  ;;  %v2601_v51 = vadd.f32 %v4027_v47, %v2600_v36  ;;  %4048 = vtanh.f32 %v2221_v37 }
 0x257   : > { %v4031_v53 = vpop.eup %4030  ;;  %v2670_v54 = vadd.f32 %v4029_v50, %v2669_v40  ;;  %4050 = vtanh.f32 %v2224_v41 }
 0x258   : > { %v4033_v56 = vpop.eup %4032  ;;  %v2739_v57 = vadd.f32 %v4031_v53, %v2738_v43  ;;  %4052 = vtanh.f32 %v2225_v45  ;;  %v2602_v0 = vadd.f32 %v4023_v39, %v2601_v51  ;;  %v1973_v39 = vpop.permute.xlu0 %1972 }
 0x259   : > { %v4035_v61 = vpop.eup %4034  ;;  %v2808_v55 = vadd.f32 %v4033_v56, %v2807_v48  ;;  %4054 = vtanh.f32 %v2230_v49  ;;  %v2671_v6 = vadd.f32 %v4025_v42, %v2670_v54  ;;  %v2246_v42 = vsub.f32 %v5016_v16, %v1978_v11 }
 0x25a   : > { %v4037_v63 = vpop.eup %4036  ;;  %4056 = vtanh.f32 %v2231_v52  ;;  %v2740_v9 = vadd.f32 %v4035_v61, %v2739_v57  ;;  %v2242_v49 = vsub.f32 %v5016_v16, %v1973_v39  ;;  %v2243_v52 = vsub.f32 %v5020_v21, %v1973_v39  ;;  %v1988_v61 = vpop.permute.xlu1 %1987 }
 0x25b   : > { %v4039_v5 = vpop.eup %4038  ;;  %4058 = vtanh.f32 %v2226_v2  ;;  %v2809_v15 = vadd.f32 %v4037_v63, %v2808_v55  ;;  %v2244_v2 = vsub.f32 %v5026_v7, %v1973_v39  ;;  %v2248_v63 = vsub.f32 %v5026_v7, %v1978_v11 }
 0x25c   : > { %v4041_v62 = vpop.eup %4040  ;;  %4060 = vtanh.f32 %v2227_v59  ;;  %v2245_v59 = vsub.f32 %v5030_v28, %v1973_v39  ;;  %v2255_v14 = vsub.f32 %v5020_v21, %v1988_v61  ;;  %v2257_v11 = vsub.f32 %v5030_v28, %v1988_v61 }
 0x25d   : > { %v4043_v1 = vpop.eup %4042  ;;  %4062 = vtanh.f32 %v2228_v60 }
 0x25e   : > { %v4045_v19 = vpop.eup %4044  ;;  %v2603_v18 = vadd.f32 %v4043_v1, %v2602_v0  ;;  %4064 = vtanh.f32 %v2229_v58 }
 0x25f   : > { %v4047_v24 = vpop.eup %4046  ;;  %v2672_v25 = vadd.f32 %v4045_v19, %v2671_v6  ;;  %4066 = vtanh.f32 %v2232_v8 }
 0x260   : > { %v4049_v27 = vpop.eup %4048  ;;  %v2741_v29 = vadd.f32 %v4047_v24, %v2740_v9  ;;  %4068 = vtanh.f32 %v2233_v12  ;;  %v2604_v23 = vadd.f32 %v4039_v5, %v2603_v18  ;;  %v1983_v5 = vpop.permute.xlu0 %1982 }
 0x261   : > { %v4051_v20 = vpop.eup %4050  ;;  %v2810_v30 = vadd.f32 %v4049_v27, %v2809_v15  ;;  %4070 = vtanh.f32 %v2238_v17  ;;  %v2673_v34 = vadd.f32 %v4041_v62, %v2672_v25  ;;  %v2254_v62 = vsub.f32 %v5016_v16, %v1988_v61 }
 0x262   : > { %v4053_v31 = vpop.eup %4052  ;;  %4072 = vtanh.f32 %v2239_v22  ;;  %v2742_v37 = vadd.f32 %v4051_v20, %v2741_v29  ;;  %v2250_v17 = vsub.f32 %v5016_v16, %v1983_v5  ;;  %v2251_v22 = vsub.f32 %v5020_v21, %v1983_v5  ;;  %v1998_v20 = vpop.permute.xlu1 %1997 }
 0x263   : > { %v4055_v32 = vpop.eup %4054  ;;  %4074 = vtanh.f32 %v2234_v26  ;;  %v2811_v41 = vadd.f32 %v4053_v31, %v2810_v30  ;;  %v2252_v26 = vsub.f32 %v5026_v7, %v1983_v5  ;;  %v2256_v31 = vsub.f32 %v5026_v7, %v1988_v61 }
 0x264   : > { %v4057_v36 = vpop.eup %4056  ;;  %4076 = vtanh.f32 %v2235_v3  ;;  %v2253_v3 = vsub.f32 %v5030_v28, %v1983_v5  ;;  %v2263_v39 = vsub.f32 %v5020_v21, %v1998_v20  ;;  %v2265_v61 = vsub.f32 %v5030_v28, %v1998_v20 }
 0x265   : > { %v4059_v40 = vpop.eup %4058  ;;  %4078 = vtanh.f32 %v2236_v10 }
 0x266   : > { %v4061_v43 = vpop.eup %4060  ;;  %v2605_v45 = vadd.f32 %v4059_v40, %v2604_v23  ;;  %4080 = vtanh.f32 %v2237_v33 }
 0x267   : > { %v4063_v47 = vpop.eup %4062  ;;  %v2674_v48 = vadd.f32 %v4061_v43, %v2673_v34  ;;  %4082 = vtanh.f32 %v2240_v35 }
 0x268   : > { %v4065_v50 = vpop.eup %4064  ;;  %v2743_v51 = vadd.f32 %v4063_v47, %v2742_v37  ;;  %4084 = vtanh.f32 %v2241_v13  ;;  %v2606_v57 = vadd.f32 %v4055_v32, %v2605_v45  ;;  %v1993_v32 = vpop.permute.xlu0 %1992 }
 0x269   : > { %v4067_v53 = vpop.eup %4066  ;;  %v2812_v54 = vadd.f32 %v4065_v50, %v2811_v41  ;;  %4086 = vtanh.f32 %v2246_v42  ;;  %v2675_v60 = vadd.f32 %v4057_v36, %v2674_v48  ;;  %v2262_v36 = vsub.f32 %v5016_v16, %v1998_v20 }
 0x26a   : > { %v4069_v56 = vpop.eup %4068  ;;  %4088 = vtanh.f32 %v2247_v46  ;;  %v2744_v58 = vadd.f32 %v4067_v53, %v2743_v51  ;;  %v2258_v42 = vsub.f32 %v5016_v16, %v1993_v32  ;;  %v2259_v46 = vsub.f32 %v5020_v21, %v1993_v32  ;;  %v2008_v53 = vpop.permute.xlu1 %2007 }
 0x26b   : > { %v4071_v55 = vpop.eup %4070  ;;  %4090 = vtanh.f32 %v2242_v49  ;;  %v2813_v8 = vadd.f32 %v4069_v56, %v2812_v54  ;;  %v2260_v49 = vsub.f32 %v5026_v7, %v1993_v32  ;;  %v2264_v56 = vsub.f32 %v5026_v7, %v1998_v20 }
 0x26c   : > { %v4073_v0 = vpop.eup %4072  ;;  %4092 = vtanh.f32 %v2243_v52  ;;  %v2261_v52 = vsub.f32 %v5030_v28, %v1993_v32  ;;  %v2271_v5 = vsub.f32 %v5020_v21, %v2008_v53  ;;  %v2273_v20 = vsub.f32 %v5030_v28, %v2008_v53 }
 0x26d   : > { %v4075_v6 = vpop.eup %4074  ;;  %4094 = vtanh.f32 %v2244_v2 }
 0x26e   : > { %v4077_v9 = vpop.eup %4076  ;;  %v2607_v12 = vadd.f32 %v4075_v6, %v2606_v57  ;;  %4096 = vtanh.f32 %v2245_v59 }
 0x26f   : > { %v4079_v1 = vpop.eup %4078  ;;  %v2676_v15 = vadd.f32 %v4077_v9, %v2675_v60  ;;  %4098 = vtanh.f32 %v2248_v63 }
 0x270   : > { %v4081_v19 = vpop.eup %4080  ;;  %v2745_v18 = vadd.f32 %v4079_v1, %v2744_v58  ;;  %4100 = vtanh.f32 %v2249_v4  ;;  %v2608_v29 = vadd.f32 %v4071_v55, %v2607_v12  ;;  %v2003_v55 = vpop.permute.xlu0 %2002 }
 0x271   : > { %v4083_v24 = vpop.eup %4082  ;;  %v2814_v25 = vadd.f32 %v4081_v19, %v2813_v8  ;;  %4102 = vtanh.f32 %v2254_v62  ;;  %v2677_v10 = vadd.f32 %v4073_v0, %v2676_v15  ;;  %v2270_v0 = vsub.f32 %v5016_v16, %v2008_v53 }
 0x272   : > { %v4085_v27 = vpop.eup %4084  ;;  %4104 = vtanh.f32 %v2255_v14  ;;  %v2746_v33 = vadd.f32 %v4083_v24, %v2745_v18  ;;  %v2266_v62 = vsub.f32 %v5016_v16, %v2003_v55  ;;  %v2267_v14 = vsub.f32 %v5020_v21, %v2003_v55  ;;  %v2018_v24 = vpop.permute.xlu1 %2017 }
 0x273   : > { %v4087_v30 = vpop.eup %4086  ;;  %4106 = vtanh.f32 %v2250_v17  ;;  %v2815_v35 = vadd.f32 %v4085_v27, %v2814_v25  ;;  %v2268_v17 = vsub.f32 %v5026_v7, %v2003_v55  ;;  %v2272_v27 = vsub.f32 %v5026_v7, %v2008_v53 }
 0x274   : > { %v4089_v23 = vpop.eup %4088  ;;  %4108 = vtanh.f32 %v2251_v22  ;;  %v2269_v22 = vsub.f32 %v5030_v28, %v2003_v55  ;;  %v2279_v32 = vsub.f32 %v5020_v21, %v2018_v24  ;;  %v2281_v53 = vsub.f32 %v5030_v28, %v2018_v24 }
 0x275   : > { %v4091_v34 = vpop.eup %4090  ;;  %4110 = vtanh.f32 %v2252_v26 }
 0x276   : > { %v4093_v37 = vpop.eup %4092  ;;  %v2609_v13 = vadd.f32 %v4091_v34, %v2608_v29  ;;  %4112 = vtanh.f32 %v2253_v3 }
 0x277   : > { %v4095_v40 = vpop.eup %4094  ;;  %v2678_v41 = vadd.f32 %v4093_v37, %v2677_v10  ;;  %4114 = vtanh.f32 %v2256_v31 }
 0x278   : > { %v4097_v43 = vpop.eup %4096  ;;  %v2747_v45 = vadd.f32 %v4095_v40, %v2746_v33  ;;  %4116 = vtanh.f32 %v2257_v11  ;;  %v2610_v51 = vadd.f32 %v4087_v30, %v2609_v13  ;;  %v2013_v30 = vpop.permute.xlu0 %2012 }
 0x279   : > { %v4099_v47 = vpop.eup %4098  ;;  %v2816_v48 = vadd.f32 %v4097_v43, %v2815_v35  ;;  %4118 = vtanh.f32 %v2262_v36  ;;  %v2679_v2 = vadd.f32 %v4089_v23, %v2678_v41  ;;  %v2278_v23 = vsub.f32 %v5016_v16, %v2018_v24 }
 0x27a   : > { %v4101_v50 = vpop.eup %4100  ;;  %4120 = vtanh.f32 %v2263_v39  ;;  %v2748_v59 = vadd.f32 %v4099_v47, %v2747_v45  ;;  %v2274_v36 = vsub.f32 %v5016_v16, %v2013_v30  ;;  %v2275_v39 = vsub.f32 %v5020_v21, %v2013_v30  ;;  %v2028_v47 = vpop.permute.xlu1 %2027 }
 0x27b   : > { %v4103_v54 = vpop.eup %4102  ;;  %4122 = vtanh.f32 %v2258_v42  ;;  %v2817_v63 = vadd.f32 %v4101_v50, %v2816_v48  ;;  %v2276_v42 = vsub.f32 %v5026_v7, %v2013_v30  ;;  %v2280_v50 = vsub.f32 %v5026_v7, %v2018_v24 }
 0x27c   : > { %v4105_v57 = vpop.eup %4104  ;;  %4124 = vtanh.f32 %v2259_v46  ;;  %v2277_v46 = vsub.f32 %v5030_v28, %v2013_v30  ;;  %v2287_v55 = vsub.f32 %v5020_v21, %v2028_v47  ;;  %v2289_v24 = vsub.f32 %v5030_v28, %v2028_v47 }
 0x27d   : > { %v4107_v60 = vpop.eup %4106  ;;  %4126 = vtanh.f32 %v2260_v49 }
 0x27e   : > { %v4109_v58 = vpop.eup %4108  ;;  %v2611_v4 = vadd.f32 %v4107_v60, %v2610_v51  ;;  %4128 = vtanh.f32 %v2261_v52 }
 0x27f   : > { %v4111_v6 = vpop.eup %4110  ;;  %v2680_v8 = vadd.f32 %v4109_v58, %v2679_v2  ;;  %4130 = vtanh.f32 %v2264_v56 }
 0x280   : > { %v4113_v9 = vpop.eup %4112  ;;  %v2749_v12 = vadd.f32 %v4111_v6, %v2748_v59  ;;  %4132 = vtanh.f32 %v2265_v61  ;;  %v2612_v18 = vadd.f32 %v4103_v54, %v2611_v4  ;;  %v2023_v54 = vpop.permute.xlu0 %2022 }
 0x281   : > { %v4115_v1 = vpop.eup %4114  ;;  %v2818_v15 = vadd.f32 %v4113_v9, %v2817_v63  ;;  %4134 = vtanh.f32 %v2270_v0  ;;  %v2681_v26 = vadd.f32 %v4105_v57, %v2680_v8  ;;  %v2286_v57 = vsub.f32 %v5016_v16, %v2028_v47 }
 0x282   : > { %v4117_v19 = vpop.eup %4116  ;;  %4136 = vtanh.f32 %v2271_v5  ;;  %v2750_v3 = vadd.f32 %v4115_v1, %v2749_v12  ;;  %v2282_v0 = vsub.f32 %v5016_v16, %v2023_v54  ;;  %v2283_v5 = vsub.f32 %v5020_v21, %v2023_v54  ;;  %v2038_v1 = vpop.permute.xlu1 %2037 }
 0x283   : > { %v4119_v25 = vpop.eup %4118  ;;  %4138 = vtanh.f32 %v2266_v62  ;;  %v2819_v31 = vadd.f32 %v4117_v19, %v2818_v15  ;;  %v2284_v62 = vsub.f32 %v5026_v7, %v2023_v54  ;;  %v2288_v19 = vsub.f32 %v5026_v7, %v2028_v47 }
 0x284   : > { %v4121_v29 = vpop.eup %4120  ;;  %4140 = vtanh.f32 %v2267_v14  ;;  %v2285_v14 = vsub.f32 %v5030_v28, %v2023_v54  ;;  %v2295_v30 = vsub.f32 %v5020_v21, %v2038_v1  ;;  %v2297_v47 = vsub.f32 %v5030_v28, %v2038_v1 }
 0x285   : > { %v4123_v10 = vpop.eup %4122  ;;  %4142 = vtanh.f32 %v2268_v17 }
 0x286   : > { %v4125_v33 = vpop.eup %4124  ;;  %v2613_v11 = vadd.f32 %v4123_v10, %v2612_v18  ;;  %4144 = vtanh.f32 %v2269_v22 }
 0x287   : > { %v4127_v34 = vpop.eup %4126  ;;  %v2682_v35 = vadd.f32 %v4125_v33, %v2681_v26  ;;  %4146 = vtanh.f32 %v2272_v27 }
 0x288   : > { %v4129_v37 = vpop.eup %4128  ;;  %v2751_v13 = vadd.f32 %v4127_v34, %v2750_v3  ;;  %4148 = vtanh.f32 %v2273_v20  ;;  %v2614_v45 = vadd.f32 %v4119_v25, %v2613_v11  ;;  %v2033_v25 = vpop.permute.xlu0 %2032 }
 0x289   : > { %v4131_v40 = vpop.eup %4130  ;;  %v2820_v41 = vadd.f32 %v4129_v37, %v2819_v31  ;;  %4150 = vtanh.f32 %v2278_v23  ;;  %v2683_v49 = vadd.f32 %v4121_v29, %v2682_v35  ;;  %v2294_v29 = vsub.f32 %v5016_v16, %v2038_v1 }
 0x28a   : > { %v4133_v43 = vpop.eup %4132  ;;  %4152 = vtanh.f32 %v2279_v32  ;;  %v2752_v52 = vadd.f32 %v4131_v40, %v2751_v13  ;;  %v2290_v23 = vsub.f32 %v5016_v16, %v2033_v25  ;;  %v2291_v32 = vsub.f32 %v5020_v21, %v2033_v25  ;;  %v2048_v40 = vpop.permute.xlu1 %2047 }
 0x28b   : > { %v4135_v48 = vpop.eup %4134  ;;  %4154 = vtanh.f32 %v2274_v36  ;;  %v2821_v56 = vadd.f32 %v4133_v43, %v2820_v41  ;;  %v2292_v36 = vsub.f32 %v5026_v7, %v2033_v25  ;;  %v2296_v43 = vsub.f32 %v5026_v7, %v2038_v1 }
 0x28c   : > { %v4137_v51 = vpop.eup %4136  ;;  %4156 = vtanh.f32 %v2275_v39  ;;  %v2293_v39 = vsub.f32 %v5030_v28, %v2033_v25  ;;  %v2303_v54 = vsub.f32 %v5020_v21, %v2048_v40 }
 0x28d   : > { %v4139_v2 = vpop.eup %4138  ;;  %4158 = vtanh.f32 %v2276_v42 }
 0x28e   : > { %v4141_v59 = vpop.eup %4140  ;;  %v2615_v61 = vadd.f32 %v4139_v2, %v2614_v45  ;;  %4160 = vtanh.f32 %v2277_v46 }
 0x28f   : > { %v4143_v60 = vpop.eup %4142  ;;  %v2684_v63 = vadd.f32 %v4141_v59, %v2683_v49  ;;  %4162 = vtanh.f32 %v2280_v50 }
 0x290   : > { %v4145_v58 = vpop.eup %4144  ;;  %v2753_v4 = vadd.f32 %v4143_v60, %v2752_v52  ;;  %4164 = vtanh.f32 %v2281_v53  ;;  %v2616_v12 = vadd.f32 %v4135_v48, %v2615_v61  ;;  %v2043_v48 = vpop.permute.xlu0 %2042 }
 0x291   : > { %v4147_v6 = vpop.eup %4146  ;;  %v2822_v8 = vadd.f32 %v4145_v58, %v2821_v56  ;;  %4166 = vtanh.f32 %v2286_v57  ;;  %v2685_v17 = vadd.f32 %v4137_v51, %v2684_v63  ;;  %v2302_v51 = vsub.f32 %v5016_v16, %v2048_v40 }
 0x292   : > { %v4149_v9 = vpop.eup %4148  ;;  %4168 = vtanh.f32 %v2287_v55  ;;  %v2754_v22 = vadd.f32 %v4147_v6, %v2753_v4  ;;  %v2298_v57 = vsub.f32 %v5016_v16, %v2043_v48  ;;  %v2299_v55 = vsub.f32 %v5020_v21, %v2043_v48 }
 0x293   : > { %v4151_v15 = vpop.eup %4150  ;;  %4170 = vtanh.f32 %v2282_v0  ;;  %v2823_v27 = vadd.f32 %v4149_v9, %v2822_v8  ;;  %v2300_v0 = vsub.f32 %v5026_v7, %v2043_v48 }
 0x294   : > { %v4153_v18 = vpop.eup %4152  ;;  %4172 = vtanh.f32 %v2283_v5  ;;  %v2301_v5 = vsub.f32 %v5030_v28, %v2043_v48 }
 0x295   : > { %v4155_v26 = vpop.eup %4154  ;;  %4174 = vtanh.f32 %v2284_v62  ;;  %v2304_v62 = vsub.f32 %v5026_v7, %v2048_v40 }
 0x296   : > { %v4157_v3 = vpop.eup %4156  ;;  %v2617_v20 = vadd.f32 %v4155_v26, %v2616_v12  ;;  %4176 = vtanh.f32 %v2285_v14  ;;  %v2305_v12 = vsub.f32 %v5030_v28, %v2048_v40 }
 0x297   : > { %v4159_v10 = vpop.eup %4158  ;;  %v2686_v31 = vadd.f32 %v4157_v3, %v2685_v17  ;;  %4178 = vtanh.f32 %v2288_v19 }
 0x298   : > { %v4161_v33 = vpop.eup %4160  ;;  %v2755_v11 = vadd.f32 %v4159_v10, %v2754_v22  ;;  %4180 = vtanh.f32 %v2289_v24  ;;  %v2618_v13 = vadd.f32 %v4151_v15, %v2617_v20 }
 0x299   : > { %v4163_v34 = vpop.eup %4162  ;;  %v2824_v35 = vadd.f32 %v4161_v33, %v2823_v27  ;;  %4182 = vtanh.f32 %v2294_v29  ;;  %v2687_v42 = vadd.f32 %v4153_v18, %v2686_v31 }
 0x29a   : > { %v4165_v37 = vpop.eup %4164  ;;  %4184 = vtanh.f32 %v2295_v30  ;;  %v2756_v46 = vadd.f32 %v4163_v34, %v2755_v11 }
 0x29b   : > { %v4167_v41 = vpop.eup %4166  ;;  %4186 = vtanh.f32 %v2290_v23  ;;  %v2825_v50 = vadd.f32 %v4165_v37, %v2824_v35 }
 0x29c   : > { %v4169_v45 = vpop.eup %4168  ;;  %4188 = vtanh.f32 %v2291_v32 }
 0x29d   : > { %v4171_v49 = vpop.eup %4170  ;;  %4190 = vtanh.f32 %v2292_v36 }
 0x29e   : > { %v4173_v52 = vpop.eup %4172  ;;  %v2619_v53 = vadd.f32 %v4171_v49, %v2618_v13  ;;  %4192 = vtanh.f32 %v2293_v39 }
 0x29f   : > { %v4175_v2 = vpop.eup %4174  ;;  %v2688_v56 = vadd.f32 %v4173_v52, %v2687_v42  ;;  %4194 = vtanh.f32 %v2296_v43 }
 0x2a0   : > { %v4177_v59 = vpop.eup %4176  ;;  %v2757_v61 = vadd.f32 %v4175_v2, %v2756_v46  ;;  %4196 = vtanh.f32 %v2297_v47  ;;  %v2620_v4 = vadd.f32 %v4167_v41, %v2619_v53 }
 0x2a1   : > { %v4179_v60 = vpop.eup %4178  ;;  %v2826_v63 = vadd.f32 %v4177_v59, %v2825_v50  ;;  %4198 = vtanh.f32 %v2302_v51  ;;  %v2689_v8 = vadd.f32 %v4169_v45, %v2688_v56 }
 0x2a2   : > { %v4181_v58 = vpop.eup %4180  ;;  %4200 = vtanh.f32 %v2303_v54  ;;  %v2758_v9 = vadd.f32 %v4179_v60, %v2757_v61 }
 0x2a3   : > { %v4183_v6 = vpop.eup %4182  ;;  %4202 = vtanh.f32 %v2298_v57  ;;  %v2827_v14 = vadd.f32 %v4181_v58, %v2826_v63 }
 0x2a4   : > { %v4185_v16 = vpop.eup %4184  ;;  %4204 = vtanh.f32 %v2299_v55 }
 0x2a5   : > { %v4187_v21 = vpop.eup %4186  ;;  %4206 = vtanh.f32 %v2300_v0 }
 0x2a6   : > { %v4189_v1 = vpop.eup %4188  ;;  %v2621_v15 = vadd.f32 %v4187_v21, %v2620_v4  ;;  %4208 = vtanh.f32 %v2301_v5 }
 0x2a7   : > { %v4191_v17 = vpop.eup %4190  ;;  %v2690_v19 = vadd.f32 %v4189_v1, %v2689_v8  ;;  %4210 = vtanh.f32 %v2304_v62 }
 0x2a8   : > { %v4193_v18 = vpop.eup %4192  ;;  %v2759_v22 = vadd.f32 %v4191_v17, %v2758_v9  ;;  %4212 = vtanh.f32 %v2305_v12  ;;  %v2622_v26 = vadd.f32 %v4183_v6, %v2621_v15  ;;  %v2874_v9 = vld [vmem:[%s4474_s16] sm:$0xf] }
 0x2a9   : > { %v4195_v24 = vpop.eup %4194  ;;  %v2828_v7 = vadd.f32 %v4193_v18, %v2827_v14  ;;  %v2691_v29 = vadd.f32 %v4185_v16, %v2690_v19  ;;  %v2910_v14 = vld [vmem:[%s4472_s15] sm:$0xf] (!%p3098_p1) }
 0x2aa   : > { %v4197_v25 = vpop.eup %4196  ;;  %v2760_v3 = vadd.f32 %v4195_v24, %v2759_v22  ;;  %v2911_v15 = vmul.f32 (!%p3098_p1), 0.5, %v2910_v14 }
 0x2ab   : > { %v4199_v27 = vpop.eup %4198  ;;  %v2829_v30 = vadd.f32 %v4197_v25, %v2828_v7 }
 0x2ac   : > { %v4201_v28 = vpop.eup %4200  ;;  %v2912_v19 = vadd.f32 (!%p3098_p1), 513.0, %v2911_v15 }
 0x2ad   : > { %v4203_v20 = vpop.eup %4202 }
 0x2ae   : > { %v4205_v10 = vpop.eup %4204  ;;  %v2623_v31 = vadd.f32 %v4203_v20, %v2622_v26  ;;  %2913 = vst.msk [vmem:[%s4472_s15] sm:$0xf] (!%p3098_p1), %vm5105_vm1, %v2912_v19 }
 0x2af   : > { %v4207_v23 = vpop.eup %4206  ;;  %v2692_v33 = vadd.f32 %v4205_v10, %v2691_v29 }
 0x2b0   : > { %v4209_v11 = vpop.eup %4208  ;;  %v2624_v32 = vadd.f32 %v4199_v27, %v2623_v31  ;;  %v2761_v34 = vadd.f32 %v4207_v23, %v2760_v3 }
 0x2b1   : > { %v4211_v35 = vpop.eup %4210  ;;  %v2693_v36 = vadd.f32 %v4201_v28, %v2692_v33  ;;  %v2830_v37 = vadd.f32 %v4209_v11, %v2829_v30 }
 0x2b2   : > { %v4213_v13 = vpop.eup %4212  ;;  %v2625_v39 = vrot.slane %v2624_v32, 4  ;;  %v2762_v40 = vadd.f32 %v4211_v35, %v2761_v34 }
 0x2b3   : > { %v2694_v41 = vrot.slane %v2693_v36, 4  ;;  %v2831_v42 = vadd.f32 %v4213_v13, %v2830_v37 }
 0x2b4   : > { %v2626_v43 = vadd.f32 %v2625_v39, %v2624_v32  ;;  %v2763_v45 = vrot.slane %v2762_v40, 4 }
 0x2b5   : > { %v2695_v46 = vadd.f32 %v2694_v41, %v2693_v36  ;;  %v2832_v47 = vrot.slane %v2831_v42, 4 }
 0x2b6   : > { %v2627_v48 = vrot.slane %v2626_v43, 2  ;;  %v2764_v49 = vadd.f32 %v2763_v45, %v2762_v40 }
 0x2b7   : > { %v2696_v50 = vrot.slane %v2695_v46, 2  ;;  %v2833_v51 = vadd.f32 %v2832_v47, %v2831_v42 }
 0x2b8   : > { %v2628_v52 = vadd.f32 %v2627_v48, %v2626_v43  ;;  %v2765_v53 = vrot.slane %v2764_v49, 2 }
 0x2b9   : > { %v2697_v54 = vadd.f32 %v2696_v50, %v2695_v46  ;;  %v2834_v2 = vrot.slane %v2833_v51, 2 }
 0x2ba   : > { %v2629_v56 = vrot.slane %v2628_v52, 1  ;;  %v2766_v57 = vadd.f32 %v2765_v53, %v2764_v49 }
 0x2bb   : > { %v2698_v59 = vrot.slane %v2697_v54, 1  ;;  %v2835_v61 = vadd.f32 %v2834_v2, %v2833_v51 }
 0x2bc   : > { %v2630_v55 = vadd.f32 %v2629_v56, %v2628_v52  ;;  %v2767_v60 = vrot.slane %v2766_v57, 1 }
 0x2bd   : > { %v2699_v63 = vadd.f32 %v2698_v59, %v2697_v54  ;;  %v2836_v0 = vrot.slane %v2835_v61, 1 }
 0x2be   : > { %v2768_v58 = vadd.f32 %v2767_v60, %v2766_v57 }
 0x2bf   : > { %v2837_v4 = vadd.f32 %v2836_v0, %v2835_v61  ;;  %v2879_v5 = vcombine.low %v2630_v55, %v2699_v63 }
 0x2c1   : > { %v2880_v6 = vcombine.low %v2768_v58, %v2837_v4  ;;  %v2887_v8 = vrot.slane %v2879_v5, %v5040_v44 }
 0x2c3   : > { %v2894_v62 = vrot.slane %v2880_v6, %v5040_v44 }
 0x2c5   : > { %v2895_v16 = vcombine.low %v2887_v8, %v2894_v62  ;;  %2909 = sbr.rel (%p3098_p1) target bundleno = 728 (0x2d8), region = 44 }
 0x2c7   : > { %v2902_v12 = vrot.slane %v2895_v16, %v5040_v44 }
 0x2c9   : > { %v2904_v21 = vadd.f32 %v2902_v12, %v2874_v9 }
 0x2cb   : > { %2905 = vst.msk [vmem:[%s4474_s16] sm:$0xf] %vm5105_vm1, %v2904_v21 }
 0x2d2   : > { %v2914_v1 = vld [vmem:[%s4474_s16] sm:$0xf] }
 0x2d3   : > { %v2915_v17 = vmul.f32 0.5, %v2914_v1 }
 0x2d5   : > { %v2916_v18 = vadd.f32 513.0, %v2915_v17 }
 0x2d7   : > { %2917 = vst.msk [vmem:[%s4474_s16] sm:$0xf] %vm5105_vm1, %v2916_v18 }
 0x2d8 PF: > { %s3107_s21 = sshll.u32 %s4328_s22, 6  ;;  %s2938_s17 = sshll.u32 %s4472_s15, 4  ;;  %s2939_s17 = int_to_ptr.vmem [resolvable:$true] %s2938_s17 }
 0x2d9   : > { %s5358_s14 = scalar_lea.hbm %s5437_s4, %s3107_s21  ;;  %s2919_s26 = scalar_lea.sflag [#allocation3], %s4447_s10 }
 0x2da   : > { %s4214_s27 = scalar_lea.vmem %s2939_s17, 64  ;;  %s4345_s7 = smov [#allocation2]  }
 0x2db   : > { %p4215_p2 = scmp.ne.s32.totalorder %s2939_s17, %s4214_s27  ;;  %s4218_s8 = sshll.u32 %s4345_s7, 4  ;;  %s4219_s8 = int_to_ptr.vmem [resolvable:$false] %s4218_s8 }
 0x2dc   : > { %s4220_s11 = scalar_lea.vmem %s4219_s8, 128  ;;  %p4221_p6 = scmp.lt.s32.totalorder %s2939_s17, %s4219_s8 }
 0x2dd   : > { %p4216_p4 = pnand %p4215_p2, %p4426_p3  ;;  %p4222_p7 = scmp.lt.s32.totalorder %s4220_s11, %s4214_s27 }
 0x2df   : > { %p4217_p5 = pneg %p4216_p4  ;;  %p4223_p8 = por %p4222_p7, %p4221_p6 }
 0x2e1   : > { %p4224_p10 = pnand %p4223_p8, %p4217_p5 }
 0x2e3   : > { %4227 = shalt.err (!%p4224_p10)
}
 0x2e4   : > { %s4228_s15 = scalar_lea.hbm %s5358_s14, 64  ;;  %s4232_s28 = scalar_lea.hbm %s5437_s4, 128 }
 0x2e5   : > { %p4229_p11 = scmp.ne.s32.totalorder %s5358_s14, %s4228_s15  ;;  %p4233_p0 = scmp.lt.u32.totalorder %s5358_s14, %s5437_s4 }
 0x2e6   : > { %p4234_p1 = scmp.lt.u32.totalorder %s4232_s28, %s4228_s15  ;;  %p4236_p4 = scmp.lt.u32.totalorder %s4228_s15, %s5358_s14 }
 0x2e7   : > { %p4230_p12 = pnand %p4229_p11, %p4426_p3 }
 0x2e8   : > { %p4235_p2 = por %p4234_p1, %p4233_p0 }
 0x2e9   : > { %p4231_p13 = pneg %p4230_p12 }
 0x2ea   : > { %p4237_p5 = por %p4236_p4, %p4235_p2 }
 0x2ec   : > { %p4238_p6 = pnand %p4237_p5, %p4231_p13 }
 0x2ee   : > { %4241 = shalt.err (!%p4238_p6)
}
 0x2ef   : > { %3109 = dma.vmem_to_hbm [thread:$0]  (%p4426_p3), %s2939_s17, 64, %s5358_s14, %s2919_s26  }
 0x2f0   : > { %s5384_s7 = scalar_lea.hbm %s5438_s5, %s3107_s21  ;;  %s2952_s8 = sshll.u32 %s4474_s16, 4  ;;  %s2953_s8 = int_to_ptr.vmem [resolvable:$true] %s2952_s8 }
 0x2f1   : > { %s2924_s11 = scalar_lea.sflag [#allocation5], %s4447_s10  ;;  %s4242_s15 = scalar_lea.vmem %s2953_s8, 64 }
 0x2f2   : > { %p4243_p7 = scmp.ne.s32.totalorder %s2953_s8, %s4242_s15  ;;  %s4346_s24 = smov [#allocation4]  }
 0x2f3   : > { %s4246_s29 = sshll.u32 %s4346_s24, 4  ;;  %s4247_s29 = int_to_ptr.vmem [resolvable:$false] %s4246_s29 }
 0x2f4   : > { %p4244_p8 = pnand %p4243_p7, %p4426_p3  ;;  %s4248_s28 = scalar_lea.vmem %s4247_s29, 128 }
 0x2f5   : > { %p4249_p11 = scmp.lt.s32.totalorder %s2953_s8, %s4247_s29  ;;  %p4250_p12 = scmp.lt.s32.totalorder %s4248_s28, %s4242_s15 }
 0x2f6   : > { %p4245_p10 = pneg %p4244_p8 }
 0x2f7   : > { %p4251_p13 = por %p4250_p12, %p4249_p11 }
 0x2f9   : > { %p4252_p0 = pnand %p4251_p13, %p4245_p10 }
 0x2fb   : > { %4255 = shalt.err (!%p4252_p0)
}
 0x2fc   : > { %s4256_s22 = scalar_lea.hbm %s5384_s7, 64  ;;  %s4260_s21 = scalar_lea.hbm %s5438_s5, 128 }
 0x2fd   : > { %p4257_p1 = scmp.ne.s32.totalorder %s5384_s7, %s4256_s22  ;;  %p4261_p5 = scmp.lt.u32.totalorder %s5384_s7, %s5438_s5 }
 0x2fe   : > { %p4262_p6 = scmp.lt.u32.totalorder %s4260_s21, %s4256_s22  ;;  %p4264_p8 = scmp.lt.u32.totalorder %s4256_s22, %s5384_s7 }
 0x2ff   : > { %p4258_p2 = pnand %p4257_p1, %p4426_p3 }
 0x300   : > { %p4263_p7 = por %p4262_p6, %p4261_p5 }
 0x301   : > { %p4259_p4 = pneg %p4258_p2 }
 0x302   : > { %p4265_p10 = por %p4264_p8, %p4263_p7 }
 0x304   : > { %p4266_p11 = pnand %p4265_p10, %p4259_p4 }
 0x306   : > { %4269 = shalt.err (!%p4266_p11)
}
 0x307   : > { %3110 = dma.vmem_to_hbm [thread:$0]  (%p4426_p3), %s2953_s8, 64, %s5384_s7, %s2924_s11  }
 0x308 PF: > { %p3120_p12 = scmp.ge.s32.totalorder %s4340_s25, 2  ;;  %s2964_s26 = sand.u32 1, %s4312_s18  }
 0x309   : > { %s2965_s12 = scalar_lea.sflag [#allocation3], %s2964_s26 }
 0x30a   : > { %p3114_p13 = pnand %p3120_p12, %p4436_p9 }
 0x30c   : > { %4303 = dma.done.wait (!%p3114_p13), %s2965_s12, 64  }
 0x30d   : > { %4305 = vsyncadd (!%p3114_p13), %s2965_s12, 4294967232  ;;  %s2974_s23 = scalar_lea.sflag [#allocation5], %s2964_s26 }
 0x30e   : > { %4307 = dma.done.wait (!%p3114_p13), %s2974_s23, 64  }
 0x30f   : > { %4309 = vsyncadd (!%p3114_p13), %s2974_s23, 4294967232  ;;  %s22_s25 = sadd.s32 1, %s4340_s25   ;;  %s5450_s21 = sld [smem:[#allocation8_spill]] }
 0x310   : > { %p19_p0 = scmp.ge.s32.totalorder %s22_s25, 6   ;;  %s5451_s22 = sld [smem:[#allocation9_spill]] }
 0x311   : > { %s5452_s23 = sld [smem:[#allocation10_spill]]  ;;  %s5453_s24 = sld [smem:[#allocation11_spill]] }
 0x312   : > { %s5454_s18 = smov %s4316_s19  ;;  %s5455_s19 = smov %s4320_s20 }
 0x313   : > { %s5456_s20 = smov %s4444_s9  ;;  %21 = sbr.rel (!%p19_p0) target bundleno = 7 (0x7), region = 105 }
 0x31a   :  { %2979 = vsyncpa [#allocation3], 1 }
 0x31b   :  { %2981 = vsyncpa [#allocation3 + $0x1], 1 }
 0x31c   :  { %2982 = vsyncpa [#allocation5], 1 }
 0x31d   :  { %2984 = vsyncpa [#allocation5 + $0x1], 1 }

</bundles_post_ra>
